<compile_context>
chip_gen: v7x
topology: tpu7x:2x2x1
jax: 0.10.0
libtpu: 0.0.40
codegen_flags: <defaults>
</compile_context>

<pallas_src>
import jax
import jax.numpy as jnp
import numpy as np
from jax.experimental import pallas as pl
from jax.experimental.pallas import tpu as pltpu


# --------------------------------------------------------------------------- #
# helpers
# --------------------------------------------------------------------------- #
def _fold_bn(bn, eps=1e-5):
    gamma, beta, mean, var = bn
    scale = gamma / jnp.sqrt(var + eps)
    bias = beta - mean * scale
    return scale.astype(jnp.float32), bias.astype(jnp.float32)      # (C,), (C,)


def _pick_row_tile(Ho, Wo):
    """Largest output-row tile with ~2048 output rows' worth of work (raised from
    512 per the review) whose flattened row count stays sublane-aligned."""
    target = max(1, 2048 // max(Wo, 1))
    best = Ho
    for cand in range(1, Ho + 1):
        if Ho % cand == 0 and cand <= target and (cand * Wo) % 8 == 0:
            best = cand
    return best


def _vmem_limit_bytes():
    """96 MiB on 128-MiB-VMEM parts (v5e/v6e), 32 MiB otherwise (v7x / unknown)."""
    try:
        cap = pltpu.get_tpu_info().vmem_capacity_bytes
        if cap >= 128 * 1024 * 1024:
            return 96 * 1024 * 1024
        return 32 * 1024 * 1024
    except Exception:
        return 32 * 1024 * 1024


def _default_split_taps():
    """Tap-split accumulation on v6e/v7x (concat relayout is the binding slot for
    C<=128); fused deep-K matmul elsewhere (v5e and unknown parts)."""
    try:
        kind = jax.devices()[0].device_kind.lower()
    except Exception:
        return False
    return any(tag in kind for tag in ("v6", "v7", "6e", "7x"))


# --------------------------------------------------------------------------- #
# kernel
# --------------------------------------------------------------------------- #
def _make_kernel(TR, Ho, Wo, Cin, Cout, stride, use_proj, split_k):
    s = stride
    M1 = (TR + 2) * Wo      # conv1 rows incl. 1-row halo on each side
    M2 = TR * Wo            # output rows of this tile

    def kernel(*refs):
        if use_proj and split_k:
            xp_ref, w1_ref, b1_ref, w2_ref, bs_ref, ws_ref, out_ref = refs
        else:
            xp_ref, w1_ref, b1_ref, w2_ref, bs_ref, out_ref = refs
            ws_ref = None

        r_id = pl.program_id(1)
        row0 = r_id * TR                       # first output row of this tile

        # ---- gather the nine conv1 taps from the resident phase-split input.
        # Tap (kh, kw) for h1 rows [row0-1, row0+TR+1) is a CONTIGUOUS window of
        # phase plane (kh % s, kw % s) at row offset kh//s, col offset kw//s.
        taps = []
        center = None
        for kh in range(3):
            ph, dh = kh % s, kh // s
            for kw in range(3):
                pw, dw = kw % s, kw // s
                t = xp_ref[0, ph * s + pw,
                           pl.ds(row0 + dh, TR + 2), dw:dw + Wo, :]
                taps.append(t)
                if kh == 1 and kw == 1:
                    center = t                 # == x[::s, ::s] window (residual)

        # ---- conv1 (bn1 scale pre-folded into weights) ----
        if split_k:
            acc1 = jnp.zeros((M1, Cout), jnp.float32)
            for idx in range(9):
                acc1 = acc1 + jnp.dot(taps[idx].reshape(M1, Cin), w1_ref[idx],
                                      preferred_element_type=jnp.float32)
        else:
            t1 = jnp.concatenate(taps, axis=-1).reshape(M1, 9 * Cin)
            acc1 = jnp.dot(t1, w1_ref[...], preferred_element_type=jnp.float32)
        h1 = jnp.maximum(acc1 + b1_ref[...], 0.0).reshape(TR + 2, Wo, Cout)

        # ---- conv2 zero padding: mask ONLY the two halo rows, then bf16 cast ----
        top_keep = (r_id > 0).astype(jnp.float32)
        bot_keep = (r_id < pl.num_programs(1) - 1).astype(jnp.float32)
        h1 = jnp.concatenate([h1[0:1] * top_keep,
                              h1[1:TR + 1],
                              h1[TR + 1:TR + 2] * bot_keep],
                             axis=0).astype(jnp.bfloat16)

        # one zero column of W-padding each side
        zcol = jnp.zeros((TR + 2, 1, Cout), jnp.bfloat16)
        h1p = jnp.concatenate([zcol, h1, zcol], axis=1)     # (TR+2, Wo+2, Cout)

        res = center[1:TR + 1]                               # (TR, Wo, Cin), bf16

        # ---- conv2 (+ fused projection shortcut) ----
        if split_k:
            acc2 = jnp.zeros((M2, Cout), jnp.float32)
            idx = 0
            for kh in range(3):
                for kw in range(3):
                    tap = h1p[kh:kh + TR, kw:kw + Wo, :].reshape(M2, Cout)
                    acc2 = acc2 + jnp.dot(tap, w2_ref[idx],
                                          preferred_element_type=jnp.float32)
                    idx += 1
            if use_proj:
                acc2 = acc2 + jnp.dot(res.reshape(M2, Cin), ws_ref[...],
                                      preferred_element_type=jnp.float32)
            y = acc2 + bs_ref[...]
        else:
            taps2 = [h1p[kh:kh + TR, kw:kw + Wo, :]
                     for kh in range(3) for kw in range(3)]
            if use_proj:
                taps2.append(res)                            # projection fused into K
            K2 = 9 * Cout + (Cin if use_proj else 0)
            t2 = jnp.concatenate(taps2, axis=-1).reshape(M2, K2)
            y = jnp.dot(t2, w2_ref[...], preferred_element_type=jnp.float32) + bs_ref[...]

        if not use_proj:                                     # identity shortcut
            y = y + res.reshape(M2, Cin).astype(jnp.float32)

        out_ref[0] = jnp.maximum(y, 0.0).astype(out_ref.dtype)

    return kernel


# --------------------------------------------------------------------------- #
# wrapper
# --------------------------------------------------------------------------- #
def basic_block_forward(x_nchw, params, stride, row_tile=None,
                        out_dtype=jnp.float32, split_taps=None):
    """BasicBlock forward.  x_nchw: (N, Cin, H, W) float32 -> (N, Cout, Ho, Wo)."""
    x = jnp.transpose(x_nchw, (0, 2, 3, 1)).astype(jnp.float32)     # NHWC
    N, H, W, Cin = x.shape
    Cout = params["w1"].shape[0]
    s = int(stride)
    assert H % s == 0 and W % s == 0
    Ho, Wo = H // s, W // s
    use_proj = (s != 1) or (Cin != Cout)
    split_k = _default_split_taps() if split_taps is None else bool(split_taps)

    TR = _pick_row_tile(Ho, Wo) if row_tile is None else int(row_tile)
    assert Ho % TR == 0 and (TR == Ho or (TR * Wo) % 8 == 0)
    R = Ho // TR

    # ---- fold BN (inference mode) and pre-scale conv weights in F32, cast once ----
    a1, b1 = _fold_bn(params["bn1"])
    a2, b2 = _fold_bn(params["bn2"])

    def tap_weight(w, scale):    # (Co, Ci, 3, 3) -> (3, 3, Ci, Co) * per-Co scale, f32
        return jnp.transpose(w, (2, 3, 1, 0)).astype(jnp.float32) * scale

    w1t = tap_weight(params["w1"], a1)                   # (3, 3, Cin, Cout)
    w2t = tap_weight(params["w2"], a2)                   # (3, 3, Cout, Cout)

    has_ws = False
    ws_arg = None
    if use_proj:
        as_, bs = _fold_bn(params["bns"])
        wst = params["ws"][:, :, 0, 0].T.astype(jnp.float32) * as_   # (Cin, Cout)
        bsum = (b2 + bs).reshape(1, Cout)                 # conv2 bias + shortcut bias
    else:
        bsum = b2.reshape(1, Cout)

    if split_k:
        w1_arg = w1t.reshape(9, Cin, Cout).astype(jnp.bfloat16)
        w2_arg = w2t.reshape(9, Cout, Cout).astype(jnp.bfloat16)
        if use_proj:
            ws_arg = wst.astype(jnp.bfloat16)
            has_ws = True
    else:
        w1_arg = w1t.reshape(9 * Cin, Cout).astype(jnp.bfloat16)
        w2_arg = w2t.reshape(9 * Cout, Cout)
        if use_proj:
            w2_arg = jnp.concatenate([w2_arg, wst], axis=0)          # (9*Cout+Cin, Cout)
        w2_arg = w2_arg.astype(jnp.bfloat16)

    b1_arg = b1.reshape(1, Cout)

    # ---- phase-split (space-to-depth) zero-padded input: ~1x input bytes, every
    # 3x3 tap is a contiguous window of one phase plane (no strided loads in-kernel).
    dmax = 2 // s                  # 2 for stride 1, 1 for stride 2
    Rp = Ho + dmax + 2             # plane rows (incl. halo + zero guard rows)
    Cp = Wo + dmax                 # plane cols
    xe = jnp.pad(x.astype(jnp.bfloat16),
                 ((0, 0), (1 + s, 1 + 2 * s), (1, 1 + 2 * s), (0, 0)))
    planes = jnp.stack(
        [xe[:, ph:ph + Rp * s:s, pw:pw + Cp * s:s, :]
         for ph in range(s) for pw in range(s)], axis=1)   # (N, s*s, Rp, Cp, Cin)

    kernel = _make_kernel(TR, Ho, Wo, Cin, Cout, s, use_proj, split_k)
    args = [planes, w1_arg, b1_arg, w2_arg, bsum] + ([ws_arg] if has_ws else [])

    def build(single_buffer_consts):
        def const_spec(shape):
            zeros = (0,) * len(shape)
            idx = lambda n, r, _z=zeros: _z
            if single_buffer_consts:
                # constant-index blocks never change -> no point double-buffering
                return pl.BlockSpec(shape, idx, pipeline_mode=pl.Buffered(1))
            return pl.BlockSpec(shape, idx)

        in_specs = [
            # per-image plane: resident across the r axis (index depends on n only)
            pl.BlockSpec((1, s * s, Rp, Cp, Cin), lambda n, r: (n, 0, 0, 0, 0)),
            const_spec(w1_arg.shape), const_spec((1, Cout)),
            const_spec(w2_arg.shape), const_spec((1, Cout)),
        ]
        if has_ws:
            in_specs.append(const_spec((Cin, Cout)))

        return pl.pallas_call(
            kernel,
            out_shape=jax.ShapeDtypeStruct((N, Ho * Wo, Cout), out_dtype),
            grid_spec=pltpu.PrefetchScalarGridSpec(
                num_scalar_prefetch=0,
                grid=(N, R),
                in_specs=in_specs,
                out_specs=pl.BlockSpec((1, TR * Wo, Cout), lambda n, r: (n, r, 0))),
            compiler_params=pltpu.CompilerParams(
                # batch axis parallel, row-tile axis arbitrary: a 2-TC part splits
                # on batch so the per-image input plane is DMA'd once per image.
                dimension_semantics=("parallel", "arbitrary"),
                vmem_limit_bytes=_vmem_limit_bytes()))

    out = None
    try:
        out = build(True)(*args)
        jax.block_until_ready(out)
    except Exception:
        out = None                  # Buffered(1) unsupported -> default buffering
    if out is None:
        out = build(False)(*args)

    out = out.reshape(N, Ho, Wo, Cout)
    return jnp.transpose(out, (0, 3, 1, 2))                          # NCHW


# --------------------------------------------------------------------------- #
# deterministic parameter init (matches the PyTorch __init__ shapes)
# --------------------------------------------------------------------------- #
def init_params(key, Cin, Cout, stride):
    ks = jax.random.split(key, 6)

    def conv_w(k, co, ci, ksz):
        bound = 1.0 / np.sqrt(ci * ksz * ksz)
        return jax.random.uniform(k, (co, ci, ksz, ksz), jnp.float32, -bound, bound)

    def bn_params(k, c):
        k1, k2, k3, k4 = jax.random.split(k, 4)
        gamma = 1.0 + 0.1 * jax.random.normal(k1, (c,), jnp.float32)
        beta = 0.1 * jax.random.normal(k2, (c,), jnp.float32)
        mean = 0.05 * jax.random.normal(k3, (c,), jnp.float32)
        var = jax.random.uniform(k4, (c,), jnp.float32, 0.5, 1.5)
        return (gamma, beta, mean, var)

    p = {
        "w1": conv_w(ks[0], Cout, Cin, 3),
        "bn1": bn_params(ks[1], Cout),
        "w2": conv_w(ks[2], Cout, Cout, 3),
        "bn2": bn_params(ks[3], Cout),
    }
    if stride != 1 or Cin != Cout:
        p["ws"] = conv_w(ks[4], Cout, Cin, 1)
        p["bns"] = bn_params(ks[5], Cout)
    return p


# --------------------------------------------------------------------------- #
# pure-JAX reference (for verification)
# --------------------------------------------------------------------------- #
def reference(x_nchw, params, stride, match_kernel_precision=False):
    """match_kernel_precision=True mirrors the kernel exactly (BN scale folded into
    bf16 weights, bf16 activations, f32 accumulation/bias).  Otherwise it is an
    independent standard conv->BN eval-mode implementation (PyTorch semantics)."""
    x = jnp.transpose(x_nchw, (0, 2, 3, 1)).astype(jnp.float32)
    eps = 1e-5

    def conv(h, w_oihw, s, scale=None):
        w = jnp.transpose(w_oihw, (2, 3, 1, 0)).astype(jnp.float32)
        if scale is not None:
            w = w * scale
        if match_kernel_precision:
            h = h.astype(jnp.bfloat16).astype(jnp.float32)
            w = w.astype(jnp.bfloat16).astype(jnp.float32)
        pad = [(w_oihw.shape[2] // 2,) * 2, (w_oihw.shape[3] // 2,) * 2]
        return jax.lax.conv_general_dilated(
            h, w, (s, s), pad, dimension_numbers=("NHWC", "HWIO", "NHWC"))

    def fold(bnp):
        g, b, m, v = bnp
        sc = g / jnp.sqrt(v + eps)
        return sc, b - m * sc

    if match_kernel_precision:
        a1, b1 = fold(params["bn1"])
        a2, b2 = fold(params["bn2"])
        h = jax.nn.relu(conv(x, params["w1"], stride, a1) + b1)
        y = conv(h, params["w2"], 1, a2) + b2
        if "ws" in params:
            as_, bs = fold(params["bns"])
            r = conv(x, params["ws"], stride, as_) + bs
        else:
            r = x.astype(jnp.bfloat16).astype(jnp.float32)
    else:
        def bn(h, bnp):
            g, b, m, v = bnp
            return (h - m) * (g / jnp.sqrt(v + eps)) + b
        h = jax.nn.relu(bn(conv(x, params["w1"], stride), params["bn1"]))
        y = bn(conv(h, params["w2"], 1), params["bn2"])
        r = bn(conv(x, params["ws"], stride), params["bns"]) if "ws" in params else x
    return jnp.transpose(jax.nn.relu(y + r), (0, 3, 1, 2))


# --------------------------------------------------------------------------- #
if __name__ == "__main__":
    key = jax.random.PRNGKey(0)
    kx, kp1, kp2 = jax.random.split(key, 3)

    x = jax.random.normal(kx, (2, 4, 16, 16), jnp.float32)   # NCHW, like PyTorch

    # Case 1: identity shortcut (stride=1, Cin == Cout) — exercise BOTH MXU forms
    # and both tilings (explicit 2 tiles and auto single tile).
    p1 = init_params(kp1, 4, 4, 1)
    y1_fused = basic_block_forward(x, p1, stride=1, row_tile=8, split_taps=False)
    y1_split = basic_block_forward(x, p1, stride=1, row_tile=8, split_taps=True)
    y1_auto = basic_block_forward(x, p1, stride=1)            # auto TR, auto form

    # Case 2: projection shortcut (stride=2, Cin != Cout), both MXU forms
    p2 = init_params(kp2, 4, 8, 2)
    y2_fused = basic_block_forward(x, p2, stride=2, row_tile=4, split_taps=False)
    y2_split = basic_block_forward(x, p2, stride=2, row_tile=4, split_taps=True)

    jax.block_until_ready((y1_fused, y1_split, y1_auto, y2_fused, y2_split))

    assert y1_fused.shape == (2, 4, 16, 16)
    assert y1_auto.shape == (2, 4, 16, 16)
    assert y2_fused.shape == (2, 8, 8, 8)

    # fused vs split MXU form and different tilings must agree (f32-accum reorder only)
    np.testing.assert_allclose(np.asarray(y1_fused), np.asarray(y1_split),
                               rtol=5e-3, atol=5e-3)
    np.testing.assert_allclose(np.asarray(y1_fused), np.asarray(y1_auto),
                               rtol=5e-3, atol=5e-3)
    np.testing.assert_allclose(np.asarray(y2_fused), np.asarray(y2_split),
                               rtol=5e-3, atol=5e-3)

    # tight check vs a precision-matched (folded bf16 weight) reference
    r1m = reference(x, p1, 1, match_kernel_precision=True)
    r2m = reference(x, p2, 2, match_kernel_precision=True)
    np.testing.assert_allclose(np.asarray(y1_fused), np.asarray(r1m),
                               rtol=5e-3, atol=5e-3)
    np.testing.assert_allclose(np.asarray(y2_fused), np.asarray(r2m),
                               rtol=5e-3, atol=5e-3)

    # sanity check vs the independent pure-f32 reference (bf16 rounding tolerance)
    r1 = reference(x, p1, 1)
    r2 = reference(x, p2, 2)
    np.testing.assert_allclose(np.asarray(y1_fused), np.asarray(r1),
                               rtol=5e-2, atol=5e-2)
    np.testing.assert_allclose(np.asarray(y1_split), np.asarray(r1),
                               rtol=5e-2, atol=5e-2)
    np.testing.assert_allclose(np.asarray(y2_fused), np.asarray(r2),
                               rtol=5e-2, atol=5e-2)
    np.testing.assert_allclose(np.asarray(y2_split), np.asarray(r2),
                               rtol=5e-2, atol=5e-2)

    print("KERNEL_OK")
</pallas_src>

<mosaic_0001>
module attributes {stable_mosaic.version = 11 : i64} {
  func.func @kernel(%arg0: i32, %arg1: i32, %arg2: memref<1x1x20x18x4xbf16, #tpu.memory_space<vmem>>, %arg3: memref<36x4xbf16, #tpu.memory_space<vmem>>, %arg4: memref<1x4xf32, #tpu.memory_space<vmem>>, %arg5: memref<36x4xbf16, #tpu.memory_space<vmem>>, %arg6: memref<1x4xf32, #tpu.memory_space<vmem>>, %arg7: memref<1x128x4xf32, #tpu.memory_space<vmem>>) attributes {dimension_semantics = [#tpu.dimension_semantics<parallel>, #tpu.dimension_semantics<arbitrary>], iteration_bounds = array<i64: 2, 2>, scalar_prefetch = 0 : i64, scratch_operands = 0 : i64, tpu.core_type = #tpu.core_type<tc>, window_params = [{transform_indices = @transform_0, window_bounds = array<i64: 1, 1, 20, 18, 4>}, {pipeline_mode = #tpu.pipeline_mode<synchronous>, transform_indices = @transform_1, window_bounds = array<i64: 36, 4>}, {pipeline_mode = #tpu.pipeline_mode<synchronous>, transform_indices = @transform_2, window_bounds = array<i64: 1, 4>}, {pipeline_mode = #tpu.pipeline_mode<synchronous>, transform_indices = @transform_3, window_bounds = array<i64: 36, 4>}, {pipeline_mode = #tpu.pipeline_mode<synchronous>, transform_indices = @transform_4, window_bounds = array<i64: 1, 4>}, {transform_indices = @transform_5, window_bounds = array<i64: 1, 128, 4>}]} {
    %c8_i32 = arith.constant 8 : i32
    %0 = arith.muli %arg1, %c8_i32 : i32
    %c0_i32 = arith.constant 0 : i32
    %1 = arith.addi %0, %c0_i32 : i32
    %c0 = arith.constant 0 : index
    %c0_0 = arith.constant 0 : index
    %2 = arith.index_cast %1 : i32 to index
    %c0_1 = arith.constant 0 : index
    %c0_2 = arith.constant 0 : index
    %3 = vector.load %arg2[%c0, %c0_0, %2, %c0_1, %c0_2] : memref<1x1x20x18x4xbf16, #tpu.memory_space<vmem>>, vector<1x1x10x16x4xbf16>
    %4 = vector.shape_cast %3 : vector<1x1x10x16x4xbf16> to vector<10x16x4xbf16>
    %c0_i32_3 = arith.constant 0 : i32
    %5 = arith.addi %0, %c0_i32_3 : i32
    %c0_4 = arith.constant 0 : index
    %c0_5 = arith.constant 0 : index
    %6 = arith.index_cast %5 : i32 to index
    %c1 = arith.constant 1 : index
    %c0_6 = arith.constant 0 : index
    %7 = vector.load %arg2[%c0_4, %c0_5, %6, %c1, %c0_6] : memref<1x1x20x18x4xbf16, #tpu.memory_space<vmem>>, vector<1x1x10x16x4xbf16>
    %8 = vector.shape_cast %7 : vector<1x1x10x16x4xbf16> to vector<10x16x4xbf16>
    %c0_i32_7 = arith.constant 0 : i32
    %9 = arith.addi %0, %c0_i32_7 : i32
    %c0_8 = arith.constant 0 : index
    %c0_9 = arith.constant 0 : index
    %10 = arith.index_cast %9 : i32 to index
    %c2 = arith.constant 2 : index
    %c0_10 = arith.constant 0 : index
    %11 = vector.load %arg2[%c0_8, %c0_9, %10, %c2, %c0_10] : memref<1x1x20x18x4xbf16, #tpu.memory_space<vmem>>, vector<1x1x10x16x4xbf16>
    %12 = vector.shape_cast %11 : vector<1x1x10x16x4xbf16> to vector<10x16x4xbf16>
    %c1_i32 = arith.constant 1 : i32
    %13 = arith.addi %0, %c1_i32 : i32
    %c0_11 = arith.constant 0 : index
    %c0_12 = arith.constant 0 : index
    %14 = arith.index_cast %13 : i32 to index
    %c0_13 = arith.constant 0 : index
    %c0_14 = arith.constant 0 : index
    %15 = vector.load %arg2[%c0_11, %c0_12, %14, %c0_13, %c0_14] : memref<1x1x20x18x4xbf16, #tpu.memory_space<vmem>>, vector<1x1x10x16x4xbf16>
    %16 = vector.shape_cast %15 : vector<1x1x10x16x4xbf16> to vector<10x16x4xbf16>
    %c1_i32_15 = arith.constant 1 : i32
    %17 = arith.addi %0, %c1_i32_15 : i32
    %c0_16 = arith.constant 0 : index
    %c0_17 = arith.constant 0 : index
    %18 = arith.index_cast %17 : i32 to index
    %c1_18 = arith.constant 1 : index
    %c0_19 = arith.constant 0 : index
    %19 = vector.load %arg2[%c0_16, %c0_17, %18, %c1_18, %c0_19] : memref<1x1x20x18x4xbf16, #tpu.memory_space<vmem>>, vector<1x1x10x16x4xbf16>
    %20 = vector.shape_cast %19 : vector<1x1x10x16x4xbf16> to vector<10x16x4xbf16>
    %c1_i32_20 = arith.constant 1 : i32
    %21 = arith.addi %0, %c1_i32_20 : i32
    %c0_21 = arith.constant 0 : index
    %c0_22 = arith.constant 0 : index
    %22 = arith.index_cast %21 : i32 to index
    %c2_23 = arith.constant 2 : index
    %c0_24 = arith.constant 0 : index
    %23 = vector.load %arg2[%c0_21, %c0_22, %22, %c2_23, %c0_24] : memref<1x1x20x18x4xbf16, #tpu.memory_space<vmem>>, vector<1x1x10x16x4xbf16>
    %24 = vector.shape_cast %23 : vector<1x1x10x16x4xbf16> to vector<10x16x4xbf16>
    %c2_i32 = arith.constant 2 : i32
    %25 = arith.addi %0, %c2_i32 : i32
    %c0_25 = arith.constant 0 : index
    %c0_26 = arith.constant 0 : index
    %26 = arith.index_cast %25 : i32 to index
    %c0_27 = arith.constant 0 : index
    %c0_28 = arith.constant 0 : index
    %27 = vector.load %arg2[%c0_25, %c0_26, %26, %c0_27, %c0_28] : memref<1x1x20x18x4xbf16, #tpu.memory_space<vmem>>, vector<1x1x10x16x4xbf16>
    %28 = vector.shape_cast %27 : vector<1x1x10x16x4xbf16> to vector<10x16x4xbf16>
    %c2_i32_29 = arith.constant 2 : i32
    %29 = arith.addi %0, %c2_i32_29 : i32
    %c0_30 = arith.constant 0 : index
    %c0_31 = arith.constant 0 : index
    %30 = arith.index_cast %29 : i32 to index
    %c1_32 = arith.constant 1 : index
    %c0_33 = arith.constant 0 : index
    %31 = vector.load %arg2[%c0_30, %c0_31, %30, %c1_32, %c0_33] : memref<1x1x20x18x4xbf16, #tpu.memory_space<vmem>>, vector<1x1x10x16x4xbf16>
    %32 = vector.shape_cast %31 : vector<1x1x10x16x4xbf16> to vector<10x16x4xbf16>
    %c2_i32_34 = arith.constant 2 : i32
    %33 = arith.addi %0, %c2_i32_34 : i32
    %c0_35 = arith.constant 0 : index
    %c0_36 = arith.constant 0 : index
    %34 = arith.index_cast %33 : i32 to index
    %c2_37 = arith.constant 2 : index
    %c0_38 = arith.constant 0 : index
    %35 = vector.load %arg2[%c0_35, %c0_36, %34, %c2_37, %c0_38] : memref<1x1x20x18x4xbf16, #tpu.memory_space<vmem>>, vector<1x1x10x16x4xbf16>
    %36 = vector.shape_cast %35 : vector<1x1x10x16x4xbf16> to vector<10x16x4xbf16>
    %37 = tpu.concatenate %4, %8, %12, %16, %20, %24, %28, %32, %36 in 2 : vector<10x16x4xbf16>, vector<10x16x4xbf16>, vector<10x16x4xbf16>, vector<10x16x4xbf16>, vector<10x16x4xbf16>, vector<10x16x4xbf16>, vector<10x16x4xbf16>, vector<10x16x4xbf16>, vector<10x16x4xbf16> -> vector<10x16x36xbf16>
    %38 = vector.shape_cast %37 : vector<10x16x36xbf16> to vector<160x36xbf16>
    %c0_39 = arith.constant 0 : index
    %c0_40 = arith.constant 0 : index
    %39 = vector.load %arg3[%c0_39, %c0_40] : memref<36x4xbf16, #tpu.memory_space<vmem>>, vector<36x4xbf16>
    %cst = arith.constant dense<0.000000e+00> : vector<160x4xf32>
    %40 = tpu.matmul %38, %39, %cst {dimension_numbers = #tpu.dot_dimension_numbers<[1], [0], [0], [1], [0, 0, 1, 1], [], []>} : vector<160x36xbf16>, vector<36x4xbf16>, vector<160x4xf32> -> vector<160x4xf32>
    %c0_41 = arith.constant 0 : index
    %c0_42 = arith.constant 0 : index
    %41 = vector.load %arg4[%c0_41, %c0_42] : memref<1x4xf32, #tpu.memory_space<vmem>>, vector<1x4xf32>
    %42 = vector.broadcast %41 : vector<1x4xf32> to vector<160x4xf32>
    %43 = arith.addf %40, %42 : vector<160x4xf32>
    %cst_43 = arith.constant 0.000000e+00 : f32
    %44 = vector.broadcast %cst_43 : f32 to vector<160x4xf32>
    %45 = arith.maximumf %43, %44 : vector<160x4xf32>
    %46 = vector.shape_cast %45 : vector<160x4xf32> to vector<10x16x4xf32>
    %c0_i32_44 = arith.constant 0 : i32
    %47 = arith.cmpi sgt, %arg1, %c0_i32_44 : i32
    %48 = arith.extui %47 : i1 to i32
    %49 = arith.sitofp %48 : i32 to f32
    %c1_i32_45 = arith.constant 1 : i32
    %50 = arith.cmpi slt, %arg1, %c1_i32_45 : i32
    %51 = arith.extui %50 : i1 to i32
    %52 = arith.sitofp %51 : i32 to f32
    %53 = vector.extract_strided_slice %46 {offsets = [0, 0, 0], sizes = [1, 16, 4], strides = [1, 1, 1]} : vector<10x16x4xf32> to vector<1x16x4xf32>
    %54 = vector.broadcast %49 : f32 to vector<1x16x4xf32>
    %55 = arith.mulf %53, %54 : vector<1x16x4xf32>
    %56 = vector.extract_strided_slice %46 {offsets = [1, 0, 0], sizes = [8, 16, 4], strides = [1, 1, 1]} : vector<10x16x4xf32> to vector<8x16x4xf32>
    %57 = vector.extract_strided_slice %46 {offsets = [9, 0, 0], sizes = [1, 16, 4], strides = [1, 1, 1]} : vector<10x16x4xf32> to vector<1x16x4xf32>
    %58 = vector.broadcast %52 : f32 to vector<1x16x4xf32>
    %59 = arith.mulf %57, %58 : vector<1x16x4xf32>
    %60 = tpu.concatenate %55, %56, %59 in 0 : vector<1x16x4xf32>, vector<8x16x4xf32>, vector<1x16x4xf32> -> vector<10x16x4xf32>
    %61 = arith.truncf %60 : vector<10x16x4xf32> to vector<10x16x4xbf16>
    %cst_46 = arith.constant 0.000000e+00 : bf16
    %62 = vector.broadcast %cst_46 : bf16 to vector<10x1x4xbf16>
    %63 = tpu.concatenate %62, %61, %62 in 1 : vector<10x1x4xbf16>, vector<10x16x4xbf16>, vector<10x1x4xbf16> -> vector<10x18x4xbf16>
    %64 = vector.extract_strided_slice %20 {offsets = [1, 0, 0], sizes = [8, 16, 4], strides = [1, 1, 1]} : vector<10x16x4xbf16> to vector<8x16x4xbf16>
    %65 = vector.extract_strided_slice %63 {offsets = [0, 0, 0], sizes = [8, 16, 4], strides = [1, 1, 1]} : vector<10x18x4xbf16> to vector<8x16x4xbf16>
    %66 = vector.extract_strided_slice %63 {offsets = [0, 1, 0], sizes = [8, 16, 4], strides = [1, 1, 1]} : vector<10x18x4xbf16> to vector<8x16x4xbf16>
    %67 = vector.extract_strided_slice %63 {offsets = [0, 2, 0], sizes = [8, 16, 4], strides = [1, 1, 1]} : vector<10x18x4xbf16> to vector<8x16x4xbf16>
    %68 = vector.extract_strided_slice %63 {offsets = [1, 0, 0], sizes = [8, 16, 4], strides = [1, 1, 1]} : vector<10x18x4xbf16> to vector<8x16x4xbf16>
    %69 = vector.extract_strided_slice %63 {offsets = [1, 1, 0], sizes = [8, 16, 4], strides = [1, 1, 1]} : vector<10x18x4xbf16> to vector<8x16x4xbf16>
    %70 = vector.extract_strided_slice %63 {offsets = [1, 2, 0], sizes = [8, 16, 4], strides = [1, 1, 1]} : vector<10x18x4xbf16> to vector<8x16x4xbf16>
    %71 = vector.extract_strided_slice %63 {offsets = [2, 0, 0], sizes = [8, 16, 4], strides = [1, 1, 1]} : vector<10x18x4xbf16> to vector<8x16x4xbf16>
    %72 = vector.extract_strided_slice %63 {offsets = [2, 1, 0], sizes = [8, 16, 4], strides = [1, 1, 1]} : vector<10x18x4xbf16> to vector<8x16x4xbf16>
    %73 = vector.extract_strided_slice %63 {offsets = [2, 2, 0], sizes = [8, 16, 4], strides = [1, 1, 1]} : vector<10x18x4xbf16> to vector<8x16x4xbf16>
    %74 = tpu.concatenate %65, %66, %67, %68, %69, %70, %71, %72, %73 in 2 : vector<8x16x4xbf16>, vector<8x16x4xbf16>, vector<8x16x4xbf16>, vector<8x16x4xbf16>, vector<8x16x4xbf16>, vector<8x16x4xbf16>, vector<8x16x4xbf16>, vector<8x16x4xbf16>, vector<8x16x4xbf16> -> vector<8x16x36xbf16>
    %75 = vector.shape_cast %74 : vector<8x16x36xbf16> to vector<128x36xbf16>
    %c0_47 = arith.constant 0 : index
    %c0_48 = arith.constant 0 : index
    %76 = vector.load %arg5[%c0_47, %c0_48] : memref<36x4xbf16, #tpu.memory_space<vmem>>, vector<36x4xbf16>
    %cst_49 = arith.constant dense<0.000000e+00> : vector<128x4xf32>
    %77 = tpu.matmul %75, %76, %cst_49 {dimension_numbers = #tpu.dot_dimension_numbers<[1], [0], [0], [1], [0, 0, 1, 1], [], []>} : vector<128x36xbf16>, vector<36x4xbf16>, vector<128x4xf32> -> vector<128x4xf32>
    %c0_50 = arith.constant 0 : index
    %c0_51 = arith.constant 0 : index
    %78 = vector.load %arg6[%c0_50, %c0_51] : memref<1x4xf32, #tpu.memory_space<vmem>>, vector<1x4xf32>
    %79 = vector.broadcast %78 : vector<1x4xf32> to vector<128x4xf32>
    %80 = arith.addf %77, %79 : vector<128x4xf32>
    %81 = vector.shape_cast %64 : vector<8x16x4xbf16> to vector<128x4xbf16>
    %82 = arith.extf %81 : vector<128x4xbf16> to vector<128x4xf32>
    %83 = arith.addf %80, %82 : vector<128x4xf32>
    %cst_52 = arith.constant 0.000000e+00 : f32
    %84 = vector.broadcast %cst_52 : f32 to vector<128x4xf32>
    %85 = arith.maximumf %83, %84 : vector<128x4xf32>
    %c0_53 = arith.constant 0 : index
    %c0_54 = arith.constant 0 : index
    %c0_55 = arith.constant 0 : index
    %86 = vector.load %arg7[%c0_53, %c0_54, %c0_55] : memref<1x128x4xf32, #tpu.memory_space<vmem>>, vector<1x128x4xf32>
    %87 = vector.shape_cast %86 : vector<1x128x4xf32> to vector<128x4xf32>
    %88 = vector.shape_cast %85 : vector<128x4xf32> to vector<1x128x4xf32>
    tpu.vector_store %arg7[%c0_53, %c0_54, %c0_55], %88 {strides = array<i32>} : memref<1x128x4xf32, #tpu.memory_space<vmem>>, vector<1x128x4xf32>,
    return
  }
  func.func @transform_0(%arg0: i32, %arg1: i32) -> (i32, i32, i32, i32, i32) {
    %c0_i32 = arith.constant 0 : i32
    %c0_i32_0 = arith.constant 0 : i32
    %c0_i32_1 = arith.constant 0 : i32
    %c0_i32_2 = arith.constant 0 : i32
    %c0_i32_3 = arith.constant 0 : i32
    return %arg0, %c0_i32, %c0_i32_0, %c0_i32_1, %c0_i32_2 : i32, i32, i32, i32, i32
  }
  func.func @transform_1(%arg0: i32, %arg1: i32) -> (i32, i32) {
    %c0_i32 = arith.constant 0 : i32
    %c0_i32_0 = arith.constant 0 : i32
    %c0_i32_1 = arith.constant 0 : i32
    return %c0_i32, %c0_i32_0 : i32, i32
  }
  func.func @transform_2(%arg0: i32, %arg1: i32) -> (i32, i32) {
    %c0_i32 = arith.constant 0 : i32
    %c0_i32_0 = arith.constant 0 : i32
    %c0_i32_1 = arith.constant 0 : i32
    return %c0_i32, %c0_i32_0 : i32, i32
  }
  func.func @transform_3(%arg0: i32, %arg1: i32) -> (i32, i32) {
    %c0_i32 = arith.constant 0 : i32
    %c0_i32_0 = arith.constant 0 : i32
    %c0_i32_1 = arith.constant 0 : i32
    return %c0_i32, %c0_i32_0 : i32, i32
  }
  func.func @transform_4(%arg0: i32, %arg1: i32) -> (i32, i32) {
    %c0_i32 = arith.constant 0 : i32
    %c0_i32_0 = arith.constant 0 : i32
    %c0_i32_1 = arith.constant 0 : i32
    return %c0_i32, %c0_i32_0 : i32, i32
  }
  func.func @transform_5(%arg0: i32, %arg1: i32) -> (i32, i32, i32) {
    %c0_i32 = arith.constant 0 : i32
    %c0_i32_0 = arith.constant 0 : i32
    return %arg0, %arg1, %c0_i32 : i32, i32, i32
  }
}

module attributes {stable_mosaic.version = 11 : i64} {
  func.func @kernel(%arg0: i32, %arg1: i32, %arg2: memref<1x1x20x18x4xbf16, #tpu.memory_space<vmem>>, %arg3: memref<36x4xbf16, #tpu.memory_space<vmem>>, %arg4: memref<1x4xf32, #tpu.memory_space<vmem>>, %arg5: memref<36x4xbf16, #tpu.memory_space<vmem>>, %arg6: memref<1x4xf32, #tpu.memory_space<vmem>>, %arg7: memref<1x128x4xf32, #tpu.memory_space<vmem>>) attributes {dimension_semantics = [#tpu.dimension_semantics<parallel>, #tpu.dimension_semantics<arbitrary>], iteration_bounds = array<i64: 2, 2>, scalar_prefetch = 0 : i64, scratch_operands = 0 : i64, tpu.core_type = #tpu.core_type<tc>, window_params = [{transform_indices = @transform_0, window_bounds = array<i64: 1, 1, 20, 18, 4>}, {pipeline_mode = #tpu.pipeline_mode<synchronous>, transform_indices = @transform_1, window_bounds = array<i64: 36, 4>}, {pipeline_mode = #tpu.pipeline_mode<synchronous>, transform_indices = @transform_2, window_bounds = array<i64: 1, 4>}, {pipeline_mode = #tpu.pipeline_mode<synchronous>, transform_indices = @transform_3, window_bounds = array<i64: 36, 4>}, {pipeline_mode = #tpu.pipeline_mode<synchronous>, transform_indices = @transform_4, window_bounds = array<i64: 1, 4>}, {transform_indices = @transform_5, window_bounds = array<i64: 1, 128, 4>}]} {
    %c8_i32 = arith.constant 8 : i32
    %0 = arith.muli %arg1, %c8_i32 : i32
    %c0_i32 = arith.constant 0 : i32
    %1 = arith.addi %0, %c0_i32 : i32
    %c0 = arith.constant 0 : index
    %c0_0 = arith.constant 0 : index
    %2 = arith.index_cast %1 : i32 to index
    %c0_1 = arith.constant 0 : index
    %c0_2 = arith.constant 0 : index
    %3 = vector.load %arg2[%c0, %c0_0, %2, %c0_1, %c0_2] : memref<1x1x20x18x4xbf16, #tpu.memory_space<vmem>>, vector<1x1x10x16x4xbf16>
    %4 = vector.shape_cast %3 : vector<1x1x10x16x4xbf16> to vector<10x16x4xbf16>
    %c0_i32_3 = arith.constant 0 : i32
    %5 = arith.addi %0, %c0_i32_3 : i32
    %c0_4 = arith.constant 0 : index
    %c0_5 = arith.constant 0 : index
    %6 = arith.index_cast %5 : i32 to index
    %c1 = arith.constant 1 : index
    %c0_6 = arith.constant 0 : index
    %7 = vector.load %arg2[%c0_4, %c0_5, %6, %c1, %c0_6] : memref<1x1x20x18x4xbf16, #tpu.memory_space<vmem>>, vector<1x1x10x16x4xbf16>
    %8 = vector.shape_cast %7 : vector<1x1x10x16x4xbf16> to vector<10x16x4xbf16>
    %c0_i32_7 = arith.constant 0 : i32
    %9 = arith.addi %0, %c0_i32_7 : i32
    %c0_8 = arith.constant 0 : index
    %c0_9 = arith.constant 0 : index
    %10 = arith.index_cast %9 : i32 to index
    %c2 = arith.constant 2 : index
    %c0_10 = arith.constant 0 : index
    %11 = vector.load %arg2[%c0_8, %c0_9, %10, %c2, %c0_10] : memref<1x1x20x18x4xbf16, #tpu.memory_space<vmem>>, vector<1x1x10x16x4xbf16>
    %12 = vector.shape_cast %11 : vector<1x1x10x16x4xbf16> to vector<10x16x4xbf16>
    %c1_i32 = arith.constant 1 : i32
    %13 = arith.addi %0, %c1_i32 : i32
    %c0_11 = arith.constant 0 : index
    %c0_12 = arith.constant 0 : index
    %14 = arith.index_cast %13 : i32 to index
    %c0_13 = arith.constant 0 : index
    %c0_14 = arith.constant 0 : index
    %15 = vector.load %arg2[%c0_11, %c0_12, %14, %c0_13, %c0_14] : memref<1x1x20x18x4xbf16, #tpu.memory_space<vmem>>, vector<1x1x10x16x4xbf16>
    %16 = vector.shape_cast %15 : vector<1x1x10x16x4xbf16> to vector<10x16x4xbf16>
    %c1_i32_15 = arith.constant 1 : i32
    %17 = arith.addi %0, %c1_i32_15 : i32
    %c0_16 = arith.constant 0 : index
    %c0_17 = arith.constant 0 : index
    %18 = arith.index_cast %17 : i32 to index
    %c1_18 = arith.constant 1 : index
    %c0_19 = arith.constant 0 : index
    %19 = vector.load %arg2[%c0_16, %c0_17, %18, %c1_18, %c0_19] : memref<1x1x20x18x4xbf16, #tpu.memory_space<vmem>>, vector<1x1x10x16x4xbf16>
    %20 = vector.shape_cast %19 : vector<1x1x10x16x4xbf16> to vector<10x16x4xbf16>
    %c1_i32_20 = arith.constant 1 : i32
    %21 = arith.addi %0, %c1_i32_20 : i32
    %c0_21 = arith.constant 0 : index
    %c0_22 = arith.constant 0 : index
    %22 = arith.index_cast %21 : i32 to index
    %c2_23 = arith.constant 2 : index
    %c0_24 = arith.constant 0 : index
    %23 = vector.load %arg2[%c0_21, %c0_22, %22, %c2_23, %c0_24] : memref<1x1x20x18x4xbf16, #tpu.memory_space<vmem>>, vector<1x1x10x16x4xbf16>
    %24 = vector.shape_cast %23 : vector<1x1x10x16x4xbf16> to vector<10x16x4xbf16>
    %c2_i32 = arith.constant 2 : i32
    %25 = arith.addi %0, %c2_i32 : i32
    %c0_25 = arith.constant 0 : index
    %c0_26 = arith.constant 0 : index
    %26 = arith.index_cast %25 : i32 to index
    %c0_27 = arith.constant 0 : index
    %c0_28 = arith.constant 0 : index
    %27 = vector.load %arg2[%c0_25, %c0_26, %26, %c0_27, %c0_28] : memref<1x1x20x18x4xbf16, #tpu.memory_space<vmem>>, vector<1x1x10x16x4xbf16>
    %28 = vector.shape_cast %27 : vector<1x1x10x16x4xbf16> to vector<10x16x4xbf16>
    %c2_i32_29 = arith.constant 2 : i32
    %29 = arith.addi %0, %c2_i32_29 : i32
    %c0_30 = arith.constant 0 : index
    %c0_31 = arith.constant 0 : index
    %30 = arith.index_cast %29 : i32 to index
    %c1_32 = arith.constant 1 : index
    %c0_33 = arith.constant 0 : index
    %31 = vector.load %arg2[%c0_30, %c0_31, %30, %c1_32, %c0_33] : memref<1x1x20x18x4xbf16, #tpu.memory_space<vmem>>, vector<1x1x10x16x4xbf16>
    %32 = vector.shape_cast %31 : vector<1x1x10x16x4xbf16> to vector<10x16x4xbf16>
    %c2_i32_34 = arith.constant 2 : i32
    %33 = arith.addi %0, %c2_i32_34 : i32
    %c0_35 = arith.constant 0 : index
    %c0_36 = arith.constant 0 : index
    %34 = arith.index_cast %33 : i32 to index
    %c2_37 = arith.constant 2 : index
    %c0_38 = arith.constant 0 : index
    %35 = vector.load %arg2[%c0_35, %c0_36, %34, %c2_37, %c0_38] : memref<1x1x20x18x4xbf16, #tpu.memory_space<vmem>>, vector<1x1x10x16x4xbf16>
    %36 = vector.shape_cast %35 : vector<1x1x10x16x4xbf16> to vector<10x16x4xbf16>
    %37 = tpu.concatenate %4, %8, %12, %16, %20, %24, %28, %32, %36 in 2 : vector<10x16x4xbf16>, vector<10x16x4xbf16>, vector<10x16x4xbf16>, vector<10x16x4xbf16>, vector<10x16x4xbf16>, vector<10x16x4xbf16>, vector<10x16x4xbf16>, vector<10x16x4xbf16>, vector<10x16x4xbf16> -> vector<10x16x36xbf16>
    %38 = vector.shape_cast %37 : vector<10x16x36xbf16> to vector<160x36xbf16>
    %c0_39 = arith.constant 0 : index
    %c0_40 = arith.constant 0 : index
    %39 = vector.load %arg3[%c0_39, %c0_40] : memref<36x4xbf16, #tpu.memory_space<vmem>>, vector<36x4xbf16>
    %cst = arith.constant dense<0.000000e+00> : vector<160x4xf32>
    %40 = tpu.matmul %38, %39, %cst {dimension_numbers = #tpu.dot_dimension_numbers<[1], [0], [0], [1], [0, 0, 1, 1], [], []>} : vector<160x36xbf16>, vector<36x4xbf16>, vector<160x4xf32> -> vector<160x4xf32>
    %c0_41 = arith.constant 0 : index
    %c0_42 = arith.constant 0 : index
    %41 = vector.load %arg4[%c0_41, %c0_42] : memref<1x4xf32, #tpu.memory_space<vmem>>, vector<1x4xf32>
    %42 = vector.broadcast %41 : vector<1x4xf32> to vector<160x4xf32>
    %43 = arith.addf %40, %42 : vector<160x4xf32>
    %cst_43 = arith.constant 0.000000e+00 : f32
    %44 = vector.broadcast %cst_43 : f32 to vector<160x4xf32>
    %45 = arith.maximumf %43, %44 : vector<160x4xf32>
    %46 = vector.shape_cast %45 : vector<160x4xf32> to vector<10x16x4xf32>
    %c0_i32_44 = arith.constant 0 : i32
    %47 = arith.cmpi sgt, %arg1, %c0_i32_44 : i32
    %48 = arith.extui %47 : i1 to i32
    %49 = arith.sitofp %48 : i32 to f32
    %c1_i32_45 = arith.constant 1 : i32
    %50 = arith.cmpi slt, %arg1, %c1_i32_45 : i32
    %51 = arith.extui %50 : i1 to i32
    %52 = arith.sitofp %51 : i32 to f32
    %53 = vector.extract_strided_slice %46 {offsets = [0, 0, 0], sizes = [1, 16, 4], strides = [1, 1, 1]} : vector<10x16x4xf32> to vector<1x16x4xf32>
    %54 = vector.broadcast %49 : f32 to vector<1x16x4xf32>
    %55 = arith.mulf %53, %54 : vector<1x16x4xf32>
    %56 = vector.extract_strided_slice %46 {offsets = [1, 0, 0], sizes = [8, 16, 4], strides = [1, 1, 1]} : vector<10x16x4xf32> to vector<8x16x4xf32>
    %57 = vector.extract_strided_slice %46 {offsets = [9, 0, 0], sizes = [1, 16, 4], strides = [1, 1, 1]} : vector<10x16x4xf32> to vector<1x16x4xf32>
    %58 = vector.broadcast %52 : f32 to vector<1x16x4xf32>
    %59 = arith.mulf %57, %58 : vector<1x16x4xf32>
    %60 = tpu.concatenate %55, %56, %59 in 0 : vector<1x16x4xf32>, vector<8x16x4xf32>, vector<1x16x4xf32> -> vector<10x16x4xf32>
    %61 = arith.truncf %60 : vector<10x16x4xf32> to vector<10x16x4xbf16>
    %cst_46 = arith.constant 0.000000e+00 : bf16
    %62 = vector.broadcast %cst_46 : bf16 to vector<10x1x4xbf16>
    %63 = tpu.concatenate %62, %61, %62 in 1 : vector<10x1x4xbf16>, vector<10x16x4xbf16>, vector<10x1x4xbf16> -> vector<10x18x4xbf16>
    %64 = vector.extract_strided_slice %20 {offsets = [1, 0, 0], sizes = [8, 16, 4], strides = [1, 1, 1]} : vector<10x16x4xbf16> to vector<8x16x4xbf16>
    %65 = vector.extract_strided_slice %63 {offsets = [0, 0, 0], sizes = [8, 16, 4], strides = [1, 1, 1]} : vector<10x18x4xbf16> to vector<8x16x4xbf16>
    %66 = vector.extract_strided_slice %63 {offsets = [0, 1, 0], sizes = [8, 16, 4], strides = [1, 1, 1]} : vector<10x18x4xbf16> to vector<8x16x4xbf16>
    %67 = vector.extract_strided_slice %63 {offsets = [0, 2, 0], sizes = [8, 16, 4], strides = [1, 1, 1]} : vector<10x18x4xbf16> to vector<8x16x4xbf16>
    %68 = vector.extract_strided_slice %63 {offsets = [1, 0, 0], sizes = [8, 16, 4], strides = [1, 1, 1]} : vector<10x18x4xbf16> to vector<8x16x4xbf16>
    %69 = vector.extract_strided_slice %63 {offsets = [1, 1, 0], sizes = [8, 16, 4], strides = [1, 1, 1]} : vector<10x18x4xbf16> to vector<8x16x4xbf16>
    %70 = vector.extract_strided_slice %63 {offsets = [1, 2, 0], sizes = [8, 16, 4], strides = [1, 1, 1]} : vector<10x18x4xbf16> to vector<8x16x4xbf16>
    %71 = vector.extract_strided_slice %63 {offsets = [2, 0, 0], sizes = [8, 16, 4], strides = [1, 1, 1]} : vector<10x18x4xbf16> to vector<8x16x4xbf16>
    %72 = vector.extract_strided_slice %63 {offsets = [2, 1, 0], sizes = [8, 16, 4], strides = [1, 1, 1]} : vector<10x18x4xbf16> to vector<8x16x4xbf16>
    %73 = vector.extract_strided_slice %63 {offsets = [2, 2, 0], sizes = [8, 16, 4], strides = [1, 1, 1]} : vector<10x18x4xbf16> to vector<8x16x4xbf16>
    %74 = tpu.concatenate %65, %66, %67, %68, %69, %70, %71, %72, %73 in 2 : vector<8x16x4xbf16>, vector<8x16x4xbf16>, vector<8x16x4xbf16>, vector<8x16x4xbf16>, vector<8x16x4xbf16>, vector<8x16x4xbf16>, vector<8x16x4xbf16>, vector<8x16x4xbf16>, vector<8x16x4xbf16> -> vector<8x16x36xbf16>
    %75 = vector.shape_cast %74 : vector<8x16x36xbf16> to vector<128x36xbf16>
    %c0_47 = arith.constant 0 : index
    %c0_48 = arith.constant 0 : index
    %76 = vector.load %arg5[%c0_47, %c0_48] : memref<36x4xbf16, #tpu.memory_space<vmem>>, vector<36x4xbf16>
    %cst_49 = arith.constant dense<0.000000e+00> : vector<128x4xf32>
    %77 = tpu.matmul %75, %76, %cst_49 {dimension_numbers = #tpu.dot_dimension_numbers<[1], [0], [0], [1], [0, 0, 1, 1], [], []>} : vector<128x36xbf16>, vector<36x4xbf16>, vector<128x4xf32> -> vector<128x4xf32>
    %c0_50 = arith.constant 0 : index
    %c0_51 = arith.constant 0 : index
    %78 = vector.load %arg6[%c0_50, %c0_51] : memref<1x4xf32, #tpu.memory_space<vmem>>, vector<1x4xf32>
    %79 = vector.broadcast %78 : vector<1x4xf32> to vector<128x4xf32>
    %80 = arith.addf %77, %79 : vector<128x4xf32>
    %81 = vector.shape_cast %64 : vector<8x16x4xbf16> to vector<128x4xbf16>
    %82 = arith.extf %81 : vector<128x4xbf16> to vector<128x4xf32>
    %83 = arith.addf %80, %82 : vector<128x4xf32>
    %cst_52 = arith.constant 0.000000e+00 : f32
    %84 = vector.broadcast %cst_52 : f32 to vector<128x4xf32>
    %85 = arith.maximumf %83, %84 : vector<128x4xf32>
    %c0_53 = arith.constant 0 : index
    %c0_54 = arith.constant 0 : index
    %c0_55 = arith.constant 0 : index
    %86 = vector.load %arg7[%c0_53, %c0_54, %c0_55] : memref<1x128x4xf32, #tpu.memory_space<vmem>>, vector<1x128x4xf32>
    %87 = vector.shape_cast %86 : vector<1x128x4xf32> to vector<128x4xf32>
    %88 = vector.shape_cast %85 : vector<128x4xf32> to vector<1x128x4xf32>
    tpu.vector_store %arg7[%c0_53, %c0_54, %c0_55], %88 {strides = array<i32>} : memref<1x128x4xf32, #tpu.memory_space<vmem>>, vector<1x128x4xf32>,
    return
  }
  func.func @transform_0(%arg0: i32, %arg1: i32) -> (i32, i32, i32, i32, i32) {
    %c0_i32 = arith.constant 0 : i32
    %c0_i32_0 = arith.constant 0 : i32
    %c0_i32_1 = arith.constant 0 : i32
    %c0_i32_2 = arith.constant 0 : i32
    %c0_i32_3 = arith.constant 0 : i32
    return %arg0, %c0_i32, %c0_i32_0, %c0_i32_1, %c0_i32_2 : i32, i32, i32, i32, i32
  }
  func.func @transform_1(%arg0: i32, %arg1: i32) -> (i32, i32) {
    %c0_i32 = arith.constant 0 : i32
    %c0_i32_0 = arith.constant 0 : i32
    %c0_i32_1 = arith.constant 0 : i32
    return %c0_i32, %c0_i32_0 : i32, i32
  }
  func.func @transform_2(%arg0: i32, %arg1: i32) -> (i32, i32) {
    %c0_i32 = arith.constant 0 : i32
    %c0_i32_0 = arith.constant 0 : i32
    %c0_i32_1 = arith.constant 0 : i32
    return %c0_i32, %c0_i32_0 : i32, i32
  }
  func.func @transform_3(%arg0: i32, %arg1: i32) -> (i32, i32) {
    %c0_i32 = arith.constant 0 : i32
    %c0_i32_0 = arith.constant 0 : i32
    %c0_i32_1 = arith.constant 0 : i32
    return %c0_i32, %c0_i32_0 : i32, i32
  }
  func.func @transform_4(%arg0: i32, %arg1: i32) -> (i32, i32) {
    %c0_i32 = arith.constant 0 : i32
    %c0_i32_0 = arith.constant 0 : i32
    %c0_i32_1 = arith.constant 0 : i32
    return %c0_i32, %c0_i32_0 : i32, i32
  }
  func.func @transform_5(%arg0: i32, %arg1: i32) -> (i32, i32, i32) {
    %c0_i32 = arith.constant 0 : i32
    %c0_i32_0 = arith.constant 0 : i32
    return %arg0, %arg1, %c0_i32 : i32, i32, i32
  }
}

</mosaic_0001>

<bundles_post_ra>
// kernel: tpu_custom_call.1
= control target key start
LH: loop header
LB: loop body
LE: loop exit
PB: predicated region body
PF: predicated region fallthrough
CT: control target
= control target key end

     0   :  { %s3285_s18 = smov 0   ;;  %s3287_s19 = smov 0   ;;  %s4365_s0 = inlined_call_operand.vmem [shape: bf16[2,1,20,18,4], index: 0, kind: input, shape index: {}]   ;;  %s4366_s1 = inlined_call_operand.vmem [shape: bf16[36,4], index: 1, kind: input, shape index: {}]   ;;  %s4367_s2 = inlined_call_operand.vmem [shape: f32[1,4], index: 2, kind: input, shape index: {}]   ;;  %s4368_s3 = inlined_call_operand.vmem [shape: bf16[36,4], index: 3, kind: input, shape index: {}]   ;;  %s4369_s4 = inlined_call_operand.vmem [shape: f32[1,4], index: 4, kind: input, shape index: {}]   ;;  %s4370_s5 = inlined_call_operand.vmem [shape: f32[2,256,4], index: 5, kind: output, shape index: {}]  }
   0x1   :  { %s3289_s20 = smov 0   ;;  %s3291_s21 = smov 0  }
   0x2   :  { %s3293_s22 = smov 0  }
   0x3 LB: > { %s24_s23 = sadd.s32 1, %s3237_s20  ;;  %s27_s24 = sadd.s32 1, %s3241_s21  ;;  %s3245_s22 = sphi %s3293_s22, %s15_s22   ;;  %s3241_s21 = sphi %s3291_s21, %s4378_s21   ;;  %s3237_s20 = sphi %s3289_s20, %s4377_s20   ;;  %s3233_s19 = sphi %s3287_s19, %s4376_s19   ;;  %s3229_s18 = sphi %s3285_s18, %s4375_s18  }
   0x4   : > { %p25_p0 = scmp.ge.s32.totalorder %s24_s23, 2  ;;  %p2753_p1 = scmp.ge.s32.totalorder %s3245_s22, 1 }
   0x5   : > { %p201_p2 = scmp.lt.s32.totalorder %s3245_s22, 5 }
   0x6   : > { %s4380_s23 = smov (%p25_p0, %s24_s23), 0  ;;  %s4382_s24 = smov (!%p25_p0, %s27_s24), %s3241_s21 }
   0x7   : > { %p202_p3 = pnand %p2753_p1, %p201_p2  ;;  %p29_p4 = scmp.ge.s32.totalorder %s4382_s24, 2 }
   0x8   : > { %p233_p5 = scmp.lt.s32.totalorder (!%p202_p3), %s3233_s19, 1  ;;  %s2963_s25 = smul.u32 (!%p202_p3), 96, %s3229_s18  ;;  %vm632_vm0 = vcmask (!%p202_p3), 1046528   ;;  %vm461_vm1 = vsmask.f32 (!%p202_p3), 7424  ;;  %v3165_v61 = vld [vmem:[%s4366_s1] sm:$0xff] (!%p202_p3)  }
   0x9   : > { %s4384_s24 = smov (%p29_p4, %s4382_s24), 0  ;;  %205 = sbr.rel (%p202_p3) target bundleno = 888 (0x378), region = 40 }
   0xa   : > { %s3247_s6 = smov (!%p202_p3), 12   ;;  %s3248_s7 = smov (!%p202_p3), 20   ;;  %2988 = vmatprep.subr.bf16.mxu0 (!%p202_p3), %v3165_v61  ;;  %vm1539_vm2 = vcmask (!%p202_p3), 1041408   ;;  %vm1323_vm3 = vcmask (!%p202_p3), 31744   ;;  %vm1344_vm4 = vcmask (!%p202_p3), 64512   ;;  %vm1365_vm5 = vcmask (!%p202_p3), 97280  }
   0xb   : > { %s3249_s8 = smov (!%p202_p3), 8   ;;  %s3250_s11 = smov (!%p202_p3), 4   ;;  %2989 = vmatpush3.bf16.msra.mxu0 (!%p202_p3), %v3165_v61  ;;  %vm1386_vm6 = vcmask (!%p202_p3), 130048   ;;  %vm1407_vm7 = vcmask (!%p202_p3), 162816   ;;  %vm1428_vm8 = vcmask (!%p202_p3), 195584   ;;  %vm1449_vm9 = vcmask (!%p202_p3), 228352  }
   0xc   : > { %s3251_s14 = smov (!%p202_p3), 16   ;;  %s3252_s15 = smov (!%p202_p3), 24   ;;  %vm1470_vm10 = vcmask (!%p202_p3), 261120   ;;  %vm1518_vm11 = vcmask (!%p202_p3), 293888   ;;  %vm1788_vm12 = vcmask (!%p202_p3), 1040384  }
   0xd   : > { %s3253_s16 = smov (!%p202_p3), 28   ;;  %s3254_s17 = smov (!%p202_p3), 32   ;;  %vm1789_vm13 = vsmask.f32 (!%p202_p3), 256  ;;  %vm2380_vm15 = vsmask.f32 (!%p202_p3), 3328 }
   0xe   : > { %p1676_p6 = scmp.gt.s32.totalorder (!%p202_p3), %s3229_s18, 0  ;;  %vm3941_vm14 = vmand (!%p202_p3), %vm1788_vm12, %vm1789_vm13  ;;  %p1679_p7 = scmp.lt.s32.totalorder (!%p202_p3), %s3229_s18, 1 }
  0x10   : > { %s4386_s19 = smov (!%p233_p5, %s3233_s19), 1 }
  0x11   : > { %s3038_s26 = smul.u32 240, %s4386_s19 }
  0x12   : > { %s1677_s27 = scalar_select %p1676_p6, 1, 0 }
  0x13   : > { %s237_s29 = scalar_lea.vmem %s4365_s0, %s3038_s26 }
  0x14   : > { %s3324_s30 = scalar_lea.vmem %s237_s29, %s2963_s25  ;;  %s1678_s9 = scvt.s32.f32 %s1677_s27 }
  0x15   : > { %v2765_v0 = vld [vmem:[%s3324_s30 + $0x18] sm:$0xf]  ;;  %v2766_v1 = vld [vmem:[%s3324_s30 + $0x1c] sm:$0xf]  ;;  %v2763_v2 = vld [vmem:[%s3324_s30 + $0xc] sm:$0xf] }
  0x16   : > { %v3329_v3 = vcombine.low %v2765_v0, %v2766_v1  ;;  %v2764_v4 = vld [vmem:[%s3324_s30 + $0x10] sm:$0xf]  ;;  %v2793_v5 = vld [vmem:[%s3324_s30 + $0xc] sm:$0xe]  ;;  %v254_v7 = vld [vmem:[%s3324_s30 + $0x4] sm:$0xf] }
  0x17   : > { %v3333_v6 = vcombine.low %v2763_v2, %v2764_v4  ;;  %v2895_v9 = vcombine.low %v2793_v5, %v2764_v4  ;;  %v3340_v10 = vld [vmem:[%s3324_s30 + $0x14] ss:$0 sps:$4 sm:$0x11]   ;;  %v283_v12 = vld [vmem:[%s3324_s30] sm:$0xe] }
  0x18   : > { %735 = vrot.lane.b32.xlu1 %v3329_v3, %s3247_s6  ;;  %v798_v8 = vshll.u32 %v3329_v3, 16  ;;  %v796_v13 = vshrl.u32 %v3329_v3, 16  ;;  %v954_v15 = vrot.slane %v3340_v10, 1  ;;  %v3091_v16 = vld [vmem:[%s3324_s30 + $0x8] ss:$0 sps:$4 sm:$0x11]   ;;  %v2865_v17 = vcombine.low %v283_v12, %v254_v7 }
  0x19   : > { %733 = vrot.lane.b32.xlu0 %v3333_v6, %s3247_s6  ;;  %v786_v11 = vshll.u32 %v3333_v6, 16  ;;  %v953_v14 = vrot.slane %v2895_v9, 1  ;;  %v253_v19 = vld [vmem:[%s3324_s30] sm:$0xf]  ;;  %v255_v20 = vld [vmem:[%s3324_s30 + $0xc] sm:$0xf] }
  0x1a   : > { %v800_v18 = vrot.slane %v798_v8, 1  ;;  %v256_v21 = vld [vmem:[%s3324_s30 + $0x10] sm:$0xf]  ;;  %v633_v23 = vrot.slane %v2865_v17, 1  ;;  %v634_v24 = vrot.slane %v3091_v16, 1  ;;  %v3353_v25 = vcombine.low %v253_v19, %v254_v7 }
  0x1b   : > { %v955_v22 = vsel %vm632_vm0, %v953_v14, %v954_v15  ;;  %v284_v26 = vld [vmem:[%s3324_s30 + $0xc] sm:$0xe]  ;;  %v3357_v27 = vcombine.low %v255_v20, %v256_v21  ;;  %v3095_v28 = vld [vmem:[%s3324_s30 + $0x14] ss:$0 sps:$4 sm:$0x11]   ;;  %v470_v30 = vshll.u32 %v3091_v16, 16 }
  0x1c   : > { %v2866_v29 = vcombine.low %v284_v26, %v256_v21  ;;  %v2784_v31 = vld [vmem:[%s3324_s30 + $0x20] sm:$0x1]  ;;  %v635_v32 = vsel %vm632_vm0, %v633_v23, %v634_v24  ;;  %v463_v33 = vshrl.u32 %v3353_v25, 16  ;;  %v465_v34 = vshll.u32 %v3353_v25, 16  ;;  %v2794_v35 = vld [vmem:[%s3324_s30 + $0x18] sm:$0xe] }
  0x1d   : > { %983 = vrot.lane.b32.xlu0 %v955_v22, %s3248_s7  ;;  %v2886_v36 = vcombine.low %v2784_v31, %v2784_v31  ;;  %663 = vrot.lane.b32.xlu1 %v635_v32, %s3249_s8  ;;  %v637_v38 = vrot.slane %v3095_v28, 1  ;;  %v472_v39 = vrot.slane %v470_v30, 1  ;;  %v2896_v40 = vcombine.low %v2794_v35, %v2766_v1  ;;  %v2807_v41 = vld [vmem:[%s3324_s30 + $0x24] sm:$0xf]  ;;  %v3370_v46 = vld [vmem:[%s3324_s30 + $0x28] sm:$0xf] }
  0x1e   : > { %v636_v37 = vrot.slane %v2866_v29, 1  ;;  %v467_v42 = vrot.slane %v465_v34, 1  ;;  %v475_v44 = vshrl.u32 %v3357_v27, 16  ;;  %v477_v45 = vshll.u32 %v3357_v27, 16  ;;  %v2805_v51 = vld [vmem:[%s3324_s30 + $0x18] sm:$0xf] }
  0x1f   : > { %v957_v43 = vrot.slane %v2886_v36, 1  ;;  %v956_v48 = vrot.slane %v2896_v40, 1  ;;  %v482_v49 = vshll.u32 %v3095_v28, 16  ;;  %v803_v50 = vshll.u32 %v2886_v36, 16  ;;  %v3376_v56 = vld [vmem:[%s3324_s30 + $0x1c] sm:$0xf] }
  0x20   : > { %v638_v47 = vsel %vm632_vm0, %v636_v37, %v637_v38  ;;  %v468_v52 = vor.u32 %v467_v42, %v463_v33  ;;  %v479_v53 = vrot.slane %v477_v45, 1  ;;  %v784_v54 = vshrl.u32 %v3333_v6, 16  ;;  %v3387_v2 = vld [vmem:[%s3324_s30 + $0x2c] ss:$0 sps:$4 sm:$0x11]  }
  0x21   : > { %v788_v55 = vrot.slane %v786_v11, 1  ;;  %665 = vrot.lane.b32.xlu1 %v638_v47, %s3249_s8  ;;  %v958_v57 = vsel %vm632_vm0, %v956_v48, %v957_v43  ;;  %v484_v58 = vrot.slane %v482_v49, 1  ;;  %v801_v59 = vor.u32 %v800_v18, %v796_v13  ;;  %v3392_v6 = vld [vmem:[%s3324_s30 + $0x20] ss:$0 sps:$4 sm:$0x11]   ;;  %v3169_v14 = vld [vmem:[%s4366_s1 + $0x8] sm:$0xff]  }
  0x22   : > { %v791_v60 = vshll.u32 %v3340_v10, 16  ;;  %v473_v62 = vsel %vm461_vm1, %v468_v52, %v472_v39  ;;  %v480_v63 = vor.u32 %v479_v53, %v475_v44  ;;  %v805_v0 = vrot.slane %v803_v50, 1  ;;  %v257_v9 = vld [vmem:[%s3324_s30 + $0x18] sm:$0xf]  ;;  %v3397_v10 = vld [vmem:[%s3324_s30 + $0x1c] sm:$0xf]  ;;  %2990 = vmatprep.subr.bf16.mxu0 %v3169_v14 }
  0x23   : > { %v2906_v1 = vcombine.low %v2807_v41, %v3370_v46  ;;  %582 = vrot.lane.b32.xlu0 %v473_v62, %s3250_s11  ;;  %v789_v3 = vor.u32 %v788_v55, %v784_v54  ;;  %v2905_v5 = vcombine.low %v2805_v51, %v3376_v56  ;;  %v1123_v13 = vshll.u32 %v3387_v2, 16  ;;  %v3409_v18 = vld [vmem:[%s3324_s30 + $0x20] ss:$0 sps:$4 sm:$0x11]   ;;  %v259_v20 = vld [vmem:[%s3324_s30 + $0x24] sm:$0xf]  ;;  %2991 = vmatpush3.bf16.msra.mxu0 %v3169_v14 }
  0x24   : > { %v793_v4 = vrot.slane %v791_v60, 1  ;;  %v485_v7 = vsel %vm461_vm1, %v480_v63, %v484_v58  ;;  %v806_v15 = vsel %vm461_vm1, %v801_v59, %v805_v0  ;;  %v3406_v17 = vcombine.low %v257_v9, %v3397_v10  ;;  %v260_v26 = vld [vmem:[%s3324_s30 + $0x28] sm:$0xf]  ;;  %v2835_v28 = vld [vmem:[%s3324_s30 + $0x18] sm:$0xe] }
  0x25   : > { %v1118_v8 = vshll.u32 %v2906_v1, 16  ;;  %985 = vrot.lane.b32.xlu1 %v958_v57, %s3248_s7  ;;  %v1106_v11 = vshll.u32 %v2905_v5, 16  ;;  %v1116_v12 = vshrl.u32 %v2906_v1, 16  ;;  %v1104_v21 = vshrl.u32 %v2905_v5, 16  ;;  %v2836_v37 = vld [vmem:[%s3324_s30 + $0x24] sm:$0xe] }
  0x26   : > { %v794_v19 = vsel %vm461_vm1, %v789_v3, %v793_v4  ;;  %v1111_v23 = vshll.u32 %v3392_v6, 16  ;;  %v489_v24 = vshll.u32 %v3406_v17, 16  ;;  %v1125_v30 = vrot.slane %v1123_v13, 1  ;;  %v3108_v35 = vld [vmem:[%s3324_s30 + $0x2c] ss:$0 sps:$4 sm:$0x11]  }
  0x27   : > { %v1120_v16 = vrot.slane %v1118_v8, 1  ;;  %584 = vrot.lane.b32.xlu0 %v485_v7, %s3250_s11  ;;  %v1108_v22 = vrot.slane %v1106_v11, 1  ;;  %v494_v31 = vshll.u32 %v3409_v18, 16  ;;  %v3420_v32 = vcombine.low %v259_v20, %v260_v26  ;;  %v286_v48 = vld [vmem:[%s3324_s30 + $0x24] sm:$0xe] }
  0x28   : > { %v487_v33 = vshrl.u32 %v3406_v17, 16  ;;  %v491_v34 = vrot.slane %v489_v24, 1  ;;  %v2925_v38 = vcombine.low %v2835_v28, %v3376_v56  ;;  %v1113_v40 = vrot.slane %v1111_v23, 1  ;;  %v2769_v50 = vld [vmem:[%s3324_s30 + $0x30] sm:$0xf] }
  0x29   : > { %905 = vrot.lane.b32.xlu1 %v806_v15, %s3251_s14  ;;  %v1121_v29 = vor.u32 %v1120_v16, %v1116_v12  ;;  %v501_v36 = vshll.u32 %v3420_v32, 16  ;;  %v1109_v39 = vor.u32 %v1108_v22, %v1104_v21  ;;  %v496_v42 = vrot.slane %v494_v31, 1  ;;  %v3436_v51 = vld [vmem:[%s3324_s30 + $0x34] sm:$0xf]  ;;  %v285_v56 = vld [vmem:[%s3324_s30 + $0x18] sm:$0xe] }
  0x2a   : > { %v492_v43 = vor.u32 %v491_v34, %v487_v33  ;;  %v499_v44 = vshrl.u32 %v3420_v32, 16  ;;  %v506_v47 = vshll.u32 %v3108_v35, 16  ;;  %v2926_v49 = vcombine.low %v2836_v37, %v3370_v46  ;;  %v2767_v57 = vld [vmem:[%s3324_s30 + $0x24] sm:$0xf]  ;;  %v2768_v58 = vld [vmem:[%s3324_s30 + $0x28] sm:$0xf] }
  0x2b   : > { %903 = vrot.lane.b32.xlu0 %v794_v19, %s3251_s14  ;;  %v1126_v41 = vsel %vm461_vm1, %v1121_v29, %v1125_v30  ;;  %v503_v45 = vrot.slane %v501_v36, 1  ;;  %v1114_v52 = vsel %vm461_vm1, %v1109_v39, %v1113_v40  ;;  %v1273_v53 = vrot.slane %v2925_v38, 1  ;;  %v2786_v0 = vld [vmem:[%s3324_s30 + $0x38] sm:$0x1]  ;;  %v2796_v21 = vld [vmem:[%s3324_s30 + $0x30] sm:$0xe] }
  0x2c   : > { %v1274_v54 = vrot.slane %v3392_v6, 1  ;;  %v2868_v55 = vcombine.low %v286_v48, %v260_v26  ;;  %v497_v46 = vsel %vm461_vm1, %v492_v43, %v496_v42  ;;  %v508_v60 = vrot.slane %v506_v47, 1  ;;  %v2785_v6 = vld [vmem:[%s3324_s30 + $0x2c] sm:$0x1]  ;;  %v2811_v22 = vld [vmem:[%s3324_s30 + $0x3c] sm:$0xf] }
  0x2d   : > { %1055 = vrot.lane.b32.xlu1 %v2906_v1, %s3252_s15  ;;  %v504_v59 = vor.u32 %v503_v45, %v499_v44  ;;  %v2878_v61 = vcombine.low %v2769_v50, %v3436_v51  ;;  %v1276_v62 = vrot.slane %v2926_v49, 1  ;;  %v1277_v63 = vrot.slane %v3387_v2, 1  ;;  %v3463_v23 = vld [vmem:[%s3324_s30 + $0x40] sm:$0xf]  ;;  %v2795_v29 = vld [vmem:[%s3324_s30 + $0x24] sm:$0xe] }
  0x2e   : > { %v1275_v1 = vsel %vm632_vm0, %v1273_v53, %v1274_v54  ;;  %v2867_v3 = vcombine.low %v285_v56, %v3397_v10  ;;  %v2877_v4 = vcombine.low %v2767_v57, %v2768_v58  ;;  %v642_v8 = vrot.slane %v2868_v55, 1  ;;  %v2809_v31 = vld [vmem:[%s3324_s30 + $0x30] sm:$0xf]  ;;  %v3471_v33 = vld [vmem:[%s3324_s30 + $0x34] sm:$0xf] }
  0x2f   : > { %1053 = vrot.lane.b32.xlu0 %v2905_v5, %s3252_s15  ;;  %v643_v5 = vrot.slane %v3108_v35, 1  ;;  %v509_v7 = vsel %vm461_vm1, %v504_v59, %v508_v60  ;;  %v822_v9 = vshll.u32 %v2878_v61, 16  ;;  %v2888_v11 = vcombine.low %v2786_v0, %v2786_v0  ;;  %v261_v38 = vld [vmem:[%s3324_s30 + $0x30] sm:$0xf]  ;;  %v3477_v39 = vld [vmem:[%s3324_s30 + $0x34] sm:$0xf] }
  0x30   : > { %v1278_v2 = vsel %vm632_vm0, %v1276_v62, %v1277_v63  ;;  %v639_v12 = vrot.slane %v2867_v3, 1  ;;  %v640_v10 = vrot.slane %v3409_v18, 1  ;;  %v810_v13 = vshll.u32 %v2877_v4, 16  ;;  %v3481_v43 = vld [vmem:[%s3324_s30 + $0x44] ss:$0 sps:$4 sm:$0x11]  }
  0x31   : > { %1225 = vrot.lane.b32.xlu1 %v1126_v41, %s3253_s16  ;;  %v2887_v14 = vcombine.low %v2785_v6, %v2785_v6  ;;  %v644_v15 = vsel %vm632_vm0, %v642_v8, %v643_v5  ;;  %v820_v16 = vshrl.u32 %v2878_v61, 16  ;;  %v824_v19 = vrot.slane %v822_v9, 1  ;;  %v3491_v53 = vld [vmem:[%s3324_s30 + $0x40] sm:$0xf]  ;;  %v2837_v0 = vld [vmem:[%s3324_s30 + $0x30] sm:$0xe] }
  0x32   : > { %v827_v20 = vshll.u32 %v2888_v11, 16  ;;  %v641_v18 = vsel %vm632_vm0, %v639_v12, %v640_v10  ;;  %v808_v24 = vshrl.u32 %v2877_v4, 16  ;;  %v812_v26 = vrot.slane %v810_v13, 1  ;;  %v3122_v57 = vld [vmem:[%s3324_s30 + $0x38] ss:$0 sps:$4 sm:$0x11]  }
  0x33   : > { %1223 = vrot.lane.b32.xlu0 %v1114_v52, %s3253_s16  ;;  %v815_v28 = vshll.u32 %v2887_v14, 16  ;;  %v2898_v30 = vcombine.low %v2796_v21, %v3436_v51  ;;  %v825_v34 = vor.u32 %v824_v19, %v820_v16  ;;  %v2908_v36 = vcombine.low %v2811_v22, %v3463_v23  ;;  %v263_v52 = vld [vmem:[%s3324_s30 + $0x3c] sm:$0xf]  ;;  %s1680_s28 = scalar_select %p1679_p7, 1, 0 }
  0x34   : > { %v829_v35 = vrot.slane %v827_v20, 1  ;;  %v2897_v37 = vcombine.low %v2795_v29, %v2768_v58  ;;  %v813_v40 = vor.u32 %v812_v26, %v808_v24  ;;  %v2907_v42 = vcombine.low %v2809_v31, %v3471_v33  ;;  %v2838_v12 = vld [vmem:[%s3324_s30 + $0x3c] sm:$0xe]  ;;  %v2773_v26 = vld [vmem:[%s3324_s30 + $0x48] sm:$0xf] }
  0x35   : > { %586 = vrot.lane.b32.xlu1 %v497_v46, %s3250_s11  ;;  %v817_v41 = vrot.slane %v815_v28, 1  ;;  %v962_v44 = vrot.slane %v2898_v30, 1  ;;  %v963_v45 = vrot.slane %v2888_v11, 1  ;;  %v1142_v48 = vshll.u32 %v2908_v36, 16  ;;  %v288_v24 = vld [vmem:[%s3324_s30 + $0x3c] sm:$0xe]  ;;  %s1681_s29 = scvt.s32.f32 %s1680_s28 }
  0x36   : > { %v830_v47 = vsel %vm461_vm1, %v825_v34, %v829_v35  ;;  %v3486_v49 = vcombine.low %v261_v38, %v3477_v39  ;;  %v959_v50 = vrot.slane %v2897_v37, 1  ;;  %v960_v51 = vrot.slane %v2887_v14, 1  ;;  %v3499_v46 = vld [vmem:[%s3324_s30 + $0x38] ss:$0 sps:$4 sm:$0x11]  }
  0x37   : > { %1303 = vrot.lane.b32.xlu0 %v1275_v1, %s3254_s17  ;;  %v818_v54 = vsel %vm461_vm1, %v813_v40, %v817_v41  ;;  %v1130_v55 = vshll.u32 %v2907_v42, 16  ;;  %v1147_v56 = vshll.u32 %v3481_v43, 16  ;;  %v964_v58 = vsel %vm632_vm0, %v962_v44, %v963_v45  ;;  %v2774_v28 = vld [vmem:[%s3324_s30 + $0x4c] sm:$0xf]  ;;  %v2771_v35 = vld [vmem:[%s3324_s30 + $0x3c] sm:$0xf] }
  0x38   : > { %v1140_v59 = vshrl.u32 %v2908_v36, 16  ;;  %v1144_v60 = vrot.slane %v1142_v48, 1  ;;  %v3503_v62 = vcombine.low %v263_v52, %v3491_v53  ;;  %v961_v63 = vsel %vm632_vm0, %v959_v50, %v960_v51  ;;  %v2787_v51 = vld [vmem:[%s3324_s30 + $0x44] sm:$0x1] }
  0x39   : > { %588 = vrot.lane.b32.xlu1 %v509_v7, %s3250_s11  ;;  %v1149_v1 = vrot.slane %v1147_v56, 1  ;;  %v1128_v3 = vshrl.u32 %v2907_v42, 16  ;;  %v1135_v5 = vshll.u32 %v3122_v57, 16  ;;  %v518_v6 = vshll.u32 %v3499_v46, 16 }
  0x3a   : > { %v3126_v7 = vld [vmem:[%s3324_s30 + $0x44] ss:$0 sps:$4 sm:$0x11]   ;;  %v1145_v8 = vor.u32 %v1144_v60, %v1140_v59  ;;  %v511_v9 = vshrl.u32 %v3486_v49, 16  ;;  %v2927_v10 = vcombine.low %v2837_v0, %v3471_v33  ;;  %v523_v21 = vshrl.u32 %v3503_v62, 16 }
  0x3b   : > { %1305 = vrot.lane.b32.xlu0 %v1278_v2, %s3254_s17  ;;  %v525_v2 = vshll.u32 %v3503_v62, 16  ;;  %v1137_v14 = vrot.slane %v1135_v5, 1  ;;  %v530_v16 = vshll.u32 %v3126_v7, 16  ;;  %v1280_v31 = vrot.slane %v3122_v57, 1  ;;  %v287_v33 = vld [vmem:[%s3324_s30 + $0x30] sm:$0xe] }
  0x3c   : > { %v1150_v19 = vsel %vm461_vm1, %v1145_v8, %v1149_v1  ;;  %v1279_v30 = vrot.slane %v2927_v10, 1  ;;  %v2870_v38 = vcombine.low %v288_v24, %v3491_v53  ;;  %v2880_v40 = vcombine.low %v2773_v26, %v2774_v28  ;;  %v2798_v59 = vld [vmem:[%s3324_s30 + $0x48] sm:$0xe]  ;;  %v2815_v1 = vld [vmem:[%s3324_s30 + $0x54] sm:$0xf] }
  0x3d   : > { %669 = vrot.lane.b32.xlu1 %v644_v15, %s3249_s8  ;;  %v520_v15 = vrot.slane %v518_v6, 1  ;;  %v527_v22 = vrot.slane %v525_v2, 1  ;;  %v532_v34 = vrot.slane %v530_v16, 1  ;;  %v1283_v45 = vrot.slane %v3481_v43, 1  ;;  %v2797_v8 = vld [vmem:[%s3324_s30 + $0x3c] sm:$0xe] }
  0x3e   : > { %v1281_v44 = vsel %vm632_vm0, %v1279_v30, %v1280_v31  ;;  %v649_v50 = vrot.slane %v3126_v7, 1  ;;  %v648_v53 = vrot.slane %v2870_v38, 1  ;;  %v646_v43 = vrot.slane %v3499_v46, 1  ;;  %v3551_v46 = vld [vmem:[%s3324_s30 + $0x58] sm:$0xf] }
  0x3f   : > { %667 = vrot.lane.b32.xlu0 %v641_v18, %s3249_s8  ;;  %v2928_v18 = vcombine.low %v2838_v12, %v3463_v23  ;;  %v528_v37 = vor.u32 %v527_v22, %v523_v21  ;;  %v2900_v7 = vcombine.low %v2798_v59, %v2774_v28  ;;  %v2910_v10 = vcombine.low %v2815_v1, %v3551_v46  ;;  %v3576_v30 = vld [vmem:[%s3324_s30 + $0x58] sm:$0xf]  ;;  %v3584_v38 = vld [vmem:[%s3324_s30 + $0x50] ss:$0 sps:$4 sm:$0x11]  }
  0x40   : > { %v650_v60 = vsel %vm632_vm0, %v648_v53, %v649_v50 }
  0x41   : > { %739 = vrot.lane.b32.xlu1 %v2878_v61, %s3247_s6  ;;  %v513_v61 = vshll.u32 %v3486_v49, 16  ;;  %v1282_v41 = vrot.slane %v2928_v18, 1  ;;  %v533_v52 = vsel %vm461_vm1, %v528_v37, %v532_v34  ;;  %v968_v21 = vrot.slane %v2900_v7, 1  ;;  %v3567_v18 = vld [vmem:[%s3324_s30 + $0x5c] ss:$0 sps:$4 sm:$0x11]  }
  0x42   : > { %v1166_v26 = vshll.u32 %v2910_v10, 16  ;;  %v1171_v37 = vshll.u32 %v3567_v18, 16 }
  0x43   : > { %737 = vrot.lane.b32.xlu0 %v2877_v4, %s3247_s6  ;;  %v1132_v4 = vrot.slane %v1130_v55, 1  ;;  %v515_v11 = vrot.slane %v513_v61, 1  ;;  %v844_v61 = vshrl.u32 %v2880_v40, 16 }
  0x45   : > { %909 = vrot.lane.b32.xlu1 %v830_v47, %s3251_s14  ;;  %v1133_v13 = vor.u32 %v1132_v4, %v1128_v3  ;;  %v516_v20 = vor.u32 %v515_v11, %v511_v9  ;;  %v2869_v47 = vcombine.low %v287_v33, %v3477_v39  ;;  %v1284_v39 = vsel %vm632_vm0, %v1282_v41, %v1283_v45  ;;  %v2813_v9 = vld [vmem:[%s3324_s30 + $0x48] sm:$0xf]  ;;  %v2814_v11 = vld [vmem:[%s3324_s30 + $0x4c] sm:$0xf] }
  0x46   : > { %v1164_v41 = vshrl.u32 %v2910_v10, 16 }
  0x47   : > { %907 = vrot.lane.b32.xlu0 %v818_v54, %s3251_s14  ;;  %v1138_v29 = vsel %vm461_vm1, %v1133_v13, %v1137_v14  ;;  %v521_v23 = vsel %vm461_vm1, %v516_v20, %v520_v15  ;;  %v846_v54 = vshll.u32 %v2880_v40, 16  ;;  %v645_v56 = vrot.slane %v2869_v47, 1  ;;  %v265_v13 = vld [vmem:[%s3324_s30 + $0x48] sm:$0xf]  ;;  %v3562_v14 = vld [vmem:[%s3324_s30 + $0x4c] sm:$0xf] }
  0x48   : > { %v2909_v20 = vcombine.low %v2813_v9, %v2814_v11  ;;  %v3571_v28 = vcombine.low %v265_v13, %v3562_v14  ;;  %v2777_v9 = vld [vmem:[%s3324_s30 + $0x60] sm:$0xf]  ;;  %v3617_v13 = vld [vmem:[%s3324_s30 + $0x58] sm:$0xf] }
  0x49   : > { %989 = vrot.lane.b32.xlu1 %v964_v58, %s3248_s7  ;;  %v2889_v58 = vcombine.low %v2787_v51, %v2787_v51  ;;  %v647_v3 = vsel %vm632_vm0, %v645_v56, %v646_v43 }
  0x4b   : > { %987 = vrot.lane.b32.xlu0 %v961_v63, %s3248_s7  ;;  %v848_v63 = vrot.slane %v846_v54, 1  ;;  %v839_v6 = vshll.u32 %v2889_v58, 16  ;;  %v966_v34 = vrot.slane %v2889_v58, 1  ;;  %v1173_v54 = vrot.slane %v1171_v37, 1  ;;  %v2840_v58 = vld [vmem:[%s3324_s30 + $0x54] sm:$0xe] }
  0x4c   : > { %v2930_v7 = vcombine.low %v2840_v58, %v3551_v46  ;;  %v652_v37 = vrot.slane %v3584_v38, 1  ;;  %v2817_v58 = vld [vmem:[%s3324_s30 + $0x60] sm:$0xf] }
  0x4d   : > { %1059 = vrot.lane.b32.xlu1 %v2908_v36, %s3252_s15  ;;  %v3529_v36 = vld [vmem:[%s3324_s30 + $0x40] sm:$0xf]  ;;  %v849_v2 = vor.u32 %v848_v63, %v844_v61  ;;  %v841_v16 = vrot.slane %v839_v6, 1  ;;  %v290_v6 = vld [vmem:[%s3324_s30 + $0x54] sm:$0xe] }
  0x4e   : > { %v2879_v48 = vcombine.low %v2771_v35, %v3529_v36  ;;  %v1154_v35 = vshll.u32 %v2909_v20, 16 }
  0x4f   : > { %1057 = vrot.lane.b32.xlu0 %v2907_v42, %s3252_s15  ;;  %v2788_v42 = vld [vmem:[%s3324_s30 + $0x50] sm:$0x1] }
  0x50   : > { %v2890_v55 = vcombine.low %v2788_v42, %v2788_v42  ;;  %v834_v57 = vshll.u32 %v2879_v48, 16  ;;  %v832_v4 = vshrl.u32 %v2879_v48, 16  ;;  %v1168_v42 = vrot.slane %v1166_v26, 1  ;;  %v2790_v26 = vld [vmem:[%s3324_s30 + $0x68] sm:$0x1] }
  0x51   : > { %1229 = vrot.lane.b32.xlu1 %v1150_v19, %s3253_s16  ;;  %v2899_v19 = vcombine.low %v2797_v8, %v3529_v36  ;;  %v3140_v36 = vld [vmem:[%s3324_s30 + $0x50] ss:$0 sps:$4 sm:$0x11]   ;;  %v1156_v50 = vrot.slane %v1154_v35, 1  ;;  %v289_v8 = vld [vmem:[%s3324_s30 + $0x48] sm:$0xe] }
  0x52   : > { %v851_v0 = vshll.u32 %v2890_v55, 16  ;;  %v836_v5 = vrot.slane %v834_v57, 1  ;;  %v969_v22 = vrot.slane %v2890_v55, 1  ;;  %v1159_v51 = vshll.u32 %v3140_v36, 16 }
  0x53   : > { %1227 = vrot.lane.b32.xlu0 %v1138_v29, %s3253_s16  ;;  %v267_v29 = vld [vmem:[%s3324_s30 + $0x54] sm:$0xf]  ;;  %v965_v33 = vrot.slane %v2899_v19, 1  ;;  %v542_v55 = vshll.u32 %v3584_v38, 16  ;;  %v1169_v43 = vor.u32 %v1168_v42, %v1164_v41  ;;  %v2800_v38 = vld [vmem:[%s3324_s30 + $0x60] sm:$0xe] }
  0x54   : > { %v853_v12 = vrot.slane %v851_v0, 1  ;;  %v837_v15 = vor.u32 %v836_v5, %v832_v4  ;;  %v3589_v45 = vcombine.low %v267_v29, %v3576_v30 }
  0x55   : > { %590 = vrot.lane.b32.xlu1 %v521_v23, %s3250_s11  ;;  %v970_v23 = vsel %vm632_vm0, %v968_v21, %v969_v22  ;;  %v967_v47 = vsel %vm632_vm0, %v965_v33, %v966_v34  ;;  %v544_v61 = vrot.slane %v542_v55, 1  ;;  %v1174_v1 = vsel %vm461_vm1, %v1169_v43, %v1173_v54  ;;  %v2789_v34 = vld [vmem:[%s3324_s30 + $0x5c] sm:$0x1] }
  0x56   : > { %v854_v24 = vsel %vm461_vm1, %v849_v2, %v853_v12  ;;  %v842_v31 = vsel %vm461_vm1, %v837_v15, %v841_v16  ;;  %v549_v57 = vshll.u32 %v3589_v45, 16  ;;  %v547_v4 = vshrl.u32 %v3589_v45, 16  ;;  %v2775_v2 = vld [vmem:[%s3324_s30 + $0x54] sm:$0xf] }
  0x57   : > { %1307 = vrot.lane.b32.xlu0 %v1281_v44, %s3254_s17  ;;  %v537_v44 = vshll.u32 %v3571_v28, 16  ;;  %v3172_v15 = vld [vmem:[%s4366_s1 + $0x10] ss:$0 sps:$4 sm:$0x33]   ;;  %v1288_v22 = vrot.slane %v2930_v7, 1  ;;  %v2881_v33 = vcombine.low %v2775_v2, %v3617_v13  ;;  %v2891_v42 = vcombine.low %v2789_v34, %v2789_v34 }
  0x58   : > { %v551_v5 = vrot.slane %v549_v57, 1  ;;  %3036 = vmatprep.subr.msk.bf16.mxu0 %vm1539_vm2, %v3172_v15 }
  0x59   : > { %592 = vrot.lane.b32.xlu1 %v533_v52, %s3250_s11  ;;  %v3594_v52 = vld [vmem:[%s3324_s30 + $0x5c] ss:$0 sps:$4 sm:$0x11]   ;;  %v539_v56 = vrot.slane %v537_v44, 1  ;;  %v858_v41 = vshll.u32 %v2881_v33, 16  ;;  %v1541_v44 = vsel %vm1539_vm2, %v3172_v15, 0 }
  0x5a   : > { %v554_v0 = vshll.u32 %v3594_v52, 16  ;;  %v552_v19 = vor.u32 %v551_v5, %v547_v4  ;;  %2993 = vmatpush3.bf16.msra.mxu0 %v1541_v44  ;;  %v856_v55 = vshrl.u32 %v2881_v33, 16 }
  0x5b   : > { %1309 = vrot.lane.b32.xlu0 %v1284_v39, %s3254_s17  ;;  %v535_v39 = vshrl.u32 %v3571_v28, 16  ;;  %v860_v43 = vrot.slane %v858_v41, 1  ;;  %v3699_v41 = vld [vmem:[%s3324_s30 + $0x74] ss:$0 sps:$4 sm:$0x11]  }
  0x5c   : > { %v556_v46 = vrot.slane %v554_v0, 1  ;;  %v269_v0 = vld [vmem:[%s3324_s30 + $0x60] sm:$0xf] }
  0x5d   : > { %673 = vrot.lane.b32.xlu1 %v650_v60, %s3249_s8  ;;  %v1161_v60 = vrot.slane %v1159_v51, 1 }
  0x5e   : > { %v557_v35 = vsel %vm461_vm1, %v552_v19, %v556_v46 }
  0x5f   : > { %671 = vrot.lane.b32.xlu0 %v647_v3, %s3249_s8  ;;  %v540_v3 = vor.u32 %v539_v56, %v535_v39  ;;  %v863_v39 = vshll.u32 %v2891_v42, 16  ;;  %v2799_v56 = vld [vmem:[%s3324_s30 + $0x54] sm:$0xe] }
  0x60   : > { %v2901_v5 = vcombine.low %v2799_v56, %v3617_v13  ;;  %v3676_v13 = vld [vmem:[%s3324_s30 + $0x70] sm:$0xf] }
  0x61   : > { %743 = vrot.lane.b32.xlu1 %v2880_v40, %s3247_s6  ;;  %v2839_v40 = vld [vmem:[%s3324_s30 + $0x48] sm:$0xe]  ;;  %v545_v16 = vsel %vm461_vm1, %v540_v3, %v544_v61  ;;  %v861_v3 = vor.u32 %v860_v43, %v856_v55  ;;  %v865_v4 = vrot.slane %v863_v39, 1  ;;  %v578_v55 = vshll.u32 %v3699_v41, 16 }
  0x62   : > { %v2929_v53 = vcombine.low %v2839_v40, %v2814_v11  ;;  %v3612_v11 = vld [vmem:[%s3324_s30 + $0x64] sm:$0xf]  ;;  %v971_v46 = vrot.slane %v2901_v5, 1 }
  0x63   : > { %741 = vrot.lane.b32.xlu0 %v2879_v48, %s3247_s6  ;;  %v1152_v48 = vshrl.u32 %v2909_v20, 16  ;;  %v2882_v21 = vcombine.low %v2777_v9, %v3612_v11  ;;  %v866_v15 = vsel %vm461_vm1, %v861_v3, %v865_v4 }
  0x64   : > { %v1285_v63 = vrot.slane %v2929_v53, 1  ;;  %v3645_v53 = vld [vmem:[%s3324_s30 + $0x70] sm:$0xf] }
  0x65   : > { %913 = vrot.lane.b32.xlu1 %v854_v24, %s3251_s14  ;;  %v1157_v59 = vor.u32 %v1156_v50, %v1152_v48  ;;  %v1289_v24 = vrot.slane %v3567_v18, 1  ;;  %v870_v18 = vshll.u32 %v2882_v21, 16  ;;  %v868_v50 = vshrl.u32 %v2882_v21, 16 }
  0x67   : > { %911 = vrot.lane.b32.xlu0 %v842_v31, %s3251_s14  ;;  %v1162_v12 = vsel %vm461_vm1, %v1157_v59, %v1161_v60  ;;  %v2871_v31 = vcombine.low %v289_v8, %v3562_v14  ;;  %v1290_v14 = vsel %vm632_vm0, %v1288_v22, %v1289_v24  ;;  %v872_v51 = vrot.slane %v870_v18, 1  ;;  %v3655_v59 = vld [vmem:[%s3324_s30 + $0x64] sm:$0xf]  ;;  %v3667_v8 = vld [vmem:[%s3324_s30 + $0x74] ss:$0 sps:$4 sm:$0x11]  }
  0x68   : > { %v1195_v24 = vshll.u32 %v3667_v8, 16 }
  0x69   : > { %993 = vrot.lane.b32.xlu1 %v970_v23, %s3248_s7  ;;  %v2892_v23 = vcombine.low %v2790_v26, %v2790_v26  ;;  %v651_v40 = vrot.slane %v2871_v31, 1  ;;  %v873_v60 = vor.u32 %v872_v51, %v868_v50  ;;  %v2842_v50 = vld [vmem:[%s3324_s30 + $0x6c] sm:$0xe] }
  0x6b   : > { %991 = vrot.lane.b32.xlu0 %v967_v47, %s3248_s7  ;;  %v2819_v47 = vld [vmem:[%s3324_s30 + $0x6c] sm:$0xf]  ;;  %v653_v54 = vsel %vm632_vm0, %v651_v40, %v652_v37  ;;  %v975_v2 = vrot.slane %v2892_v23, 1  ;;  %v1197_v40 = vrot.slane %v1195_v24, 1 }
  0x6c   : > { %v2912_v57 = vcombine.low %v2819_v47, %v3645_v53 }
  0x6d   : > { %1063 = vrot.lane.b32.xlu1 %v2910_v10, %s3252_s15  ;;  %v1286_v10 = vrot.slane %v3140_v36, 1 }
  0x6e   : > { %v1190_v7 = vshll.u32 %v2912_v57, 16 }
  0x6f   : > { %1061 = vrot.lane.b32.xlu0 %v2909_v20, %s3252_s15  ;;  %v2872_v20 = vcombine.low %v290_v6, %v3576_v30  ;;  %v1287_v29 = vsel %vm632_vm0, %v1285_v63, %v1286_v10  ;;  %v655_v30 = vrot.slane %v3594_v52, 1  ;;  %v875_v52 = vshll.u32 %v2892_v23, 16  ;;  %v271_v10 = vld [vmem:[%s3324_s30 + $0x6c] sm:$0xf] }
  0x70   : > { %v2902_v63 = vcombine.low %v2800_v38, %v3612_v11  ;;  %v2911_v6 = vcombine.low %v2817_v58, %v3655_v59  ;;  %v1192_v22 = vrot.slane %v1190_v7, 1  ;;  %v291_v7 = vld [vmem:[%s3324_s30 + $0x60] sm:$0xe] }
  0x71   : > { %1233 = vrot.lane.b32.xlu1 %v1174_v1, %s3253_s16  ;;  %v654_v36 = vrot.slane %v2872_v20, 1  ;;  %v877_v61 = vrot.slane %v875_v52, 1  ;;  %v3661_v1 = vld [vmem:[%s3324_s30 + $0x64] sm:$0xf] }
  0x72   : > { %v974_v11 = vrot.slane %v2902_v63, 1  ;;  %v1178_v19 = vshll.u32 %v2911_v6, 16  ;;  %v3158_v20 = vld [vmem:[%s3324_s30 + $0x68] ss:$0 sps:$4 sm:$0x11]   ;;  %v1176_v34 = vshrl.u32 %v2911_v6, 16 }
  0x73   : > { %1231 = vrot.lane.b32.xlu0 %v1162_v12, %s3253_s16  ;;  %v656_v48 = vsel %vm632_vm0, %v654_v36, %v655_v30  ;;  %v878_v9 = vsel %vm461_vm1, %v873_v60, %v877_v61  ;;  %v3671_v12 = vcombine.low %v269_v0, %v3661_v1  ;;  %v1183_v36 = vshll.u32 %v3158_v20, 16  ;;  %v2781_v63 = vld [vmem:[%s3324_s30 + $0x78] sm:$0xf]  ;;  %v3720_v0 = vld [vmem:[%s3324_s30 + $0x7c] sm:$0xf] }
  0x74   : > { %v976_v26 = vsel %vm632_vm0, %v974_v11, %v975_v2  ;;  %v2932_v60 = vcombine.low %v2842_v50, %v3645_v53  ;;  %v1292_v5 = vrot.slane %v3158_v20, 1  ;;  %v2779_v53 = vld [vmem:[%s3324_s30 + $0x6c] sm:$0xf]  ;;  %v3727_v11 = vld [vmem:[%s3324_s30 + $0x70] sm:$0xf] }
  0x75   : > { %594 = vrot.lane.b32.xlu1 %v545_v16, %s3250_s11  ;;  %v972_v16 = vrot.slane %v2891_v42, 1  ;;  %v561_v31 = vshll.u32 %v3671_v12, 16  ;;  %v559_v42 = vshrl.u32 %v3671_v12, 16  ;;  %v1185_v38 = vrot.slane %v1183_v36, 1 }
  0x77   : > { %1311 = vrot.lane.b32.xlu0 %v1287_v29, %s3254_s17  ;;  %v3684_v29 = vld [vmem:[%s3324_s30 + $0x68] ss:$0 sps:$4 sm:$0x11]   ;;  %v973_v30 = vsel %vm632_vm0, %v971_v46, %v972_v16  ;;  %v563_v44 = vrot.slane %v561_v31, 1  ;;  %v1294_v16 = vrot.slane %v2932_v60, 1 }
  0x78   : > { %v566_v47 = vshll.u32 %v3684_v29, 16 }
  0x79   : > { %596 = vrot.lane.b32.xlu1 %v557_v35, %s3250_s11  ;;  %v1180_v35 = vrot.slane %v1178_v19, 1  ;;  %v564_v43 = vor.u32 %v563_v44, %v559_v42  ;;  %v1295_v19 = vrot.slane %v3667_v8, 1  ;;  %v2802_v44 = vld [vmem:[%s3324_s30 + $0x78] sm:$0xe] }
  0x7a   : > { %v568_v39 = vrot.slane %v566_v47, 1  ;;  %v2904_v60 = vcombine.low %v2802_v44, %v3720_v0 }
  0x7b   : > { %1313 = vrot.lane.b32.xlu0 %v1290_v14, %s3254_s17  ;;  %v2841_v14 = vld [vmem:[%s3324_s30 + $0x60] sm:$0xe]  ;;  %v1181_v52 = vor.u32 %v1180_v35, %v1176_v34  ;;  %v3746_v35 = vld [vmem:[%s3324_s30 + $0x80] ss:$0 sps:$4 sm:$0x11]  }
  0x7c   : > { %v2931_v51 = vcombine.low %v2841_v14, %v3655_v59  ;;  %v658_v14 = vrot.slane %v3684_v29, 1  ;;  %v899_v50 = vshll.u32 %v3746_v35, 16 }
  0x7d   : > { %677 = vrot.lane.b32.xlu1 %v656_v48, %s3249_s8  ;;  %v1186_v3 = vsel %vm461_vm1, %v1181_v52, %v1185_v38  ;;  %v3765_v52 = vld [vmem:[%s3324_s30 + $0x88] sm:$0xf] }
  0x7e   : > { %v1291_v4 = vrot.slane %v2931_v51, 1  ;;  %v2823_v51 = vld [vmem:[%s3324_s30 + $0x84] sm:$0xf] }
  0x7f   : > { %675 = vrot.lane.b32.xlu0 %v653_v54, %s3249_s8 }
  0x80   : > { %v1293_v20 = vsel %vm632_vm0, %v1291_v4, %v1292_v5  ;;  %v901_v4 = vrot.slane %v899_v50, 1  ;;  %v3780_v5 = vcombine.low %v2823_v51, %v3765_v52 }
  0x81   : > { %747 = vrot.lane.b32.xlu1 %v2882_v21, %s3247_s6  ;;  %v1188_v21 = vshrl.u32 %v2912_v57, 16 }
  0x83   : > { %745 = vrot.lane.b32.xlu0 %v2881_v33, %s3247_s6  ;;  %v3688_v33 = vcombine.low %v271_v10, %v3676_v13  ;;  %v1193_v37 = vor.u32 %v1192_v22, %v1188_v21  ;;  %v2873_v21 = vcombine.low %v291_v7, %v3661_v1  ;;  %v3739_v22 = vcombine.low %v2779_v53, %v3727_v11 }
  0x84   : > { %v1296_v1 = vsel %vm632_vm0, %v1294_v16, %v1295_v19  ;;  %v981_v16 = vrot.slane %v3746_v35, 1  ;;  %v1212_v35 = vshrl.u32 %v3780_v5, 16 }
  0x85   : > { %917 = vrot.lane.b32.xlu1 %v878_v9, %s3251_s14  ;;  %v573_v48 = vshll.u32 %v3688_v33, 16  ;;  %v1198_v54 = vsel %vm461_vm1, %v1193_v37, %v1197_v40  ;;  %v571_v56 = vshrl.u32 %v3688_v33, 16  ;;  %v580_v9 = vrot.slane %v578_v55, 1 }
  0x86   : > { %v657_v36 = vrot.slane %v2873_v21, 1  ;;  %v882_v37 = vshll.u32 %v3739_v22, 16 }
  0x87   : > { %915 = vrot.lane.b32.xlu0 %v866_v15, %s3251_s14  ;;  %v575_v58 = vrot.slane %v573_v48, 1  ;;  %v2884_v15 = vcombine.low %v2781_v63, %v3720_v0  ;;  %v3777_v63 = vld [vmem:[%s3324_s30 + $0x7c] sm:$0xf] }
  0x88   : > { %v659_v38 = vsel %vm632_vm0, %v657_v36, %v658_v14  ;;  %v884_v55 = vrot.slane %v882_v37, 1 }
  0x89   : > { %997 = vrot.lane.b32.xlu1 %v976_v26, %s3248_s7  ;;  %v576_v2 = vor.u32 %v575_v58, %v571_v56  ;;  %v894_v34 = vshll.u32 %v2884_v15, 16  ;;  %v892_v47 = vshrl.u32 %v2884_v15, 16 }
  0x8a   : > { %v3693_v18 = vpop.permute.xlu1 %735 }
  0x8b   : > { %v3695_v23 = vpop.permute.xlu0 %733  ;;  %995 = vrot.lane.b32.xlu0 %v973_v30, %s3248_s7  ;;  %v581_v26 = vsel %vm461_vm1, %v576_v2, %v580_v9  ;;  %v661_v30 = vrot.slane %v3699_v41, 1  ;;  %v896_v48 = vrot.slane %v894_v34, 1 }
  0x8d   : > { %1067 = vrot.lane.b32.xlu1 %v2912_v57, %s3252_s15  ;;  %v292_v57 = vld [vmem:[%s3324_s30 + $0x6c] sm:$0xe] }
  0x8e   : > { %v2874_v10 = vcombine.low %v292_v57, %v3676_v13  ;;  %v2791_v13 = vld [vmem:[%s3324_s30 + $0x74] sm:$0x1]  ;;  %v2821_v57 = vld [vmem:[%s3324_s30 + $0x78] sm:$0xf] }
  0x8f   : > { %1065 = vrot.lane.b32.xlu0 %v2911_v6, %s3252_s15  ;;  %v3713_v59 = vpop.permute.xlu0 %983  ;;  %v3715_v61 = vpop.permute.xlu1 %663  ;;  %v569_v6 = vsel %vm461_vm1, %v564_v43, %v568_v39  ;;  %v3754_v40 = vcombine.low %v2791_v13, %v2791_v13  ;;  %v2801_v39 = vld [vmem:[%s3324_s30 + $0x6c] sm:$0xe]  ;;  %v3789_v2 = vcombine.low %v2821_v57, %v3777_v63 }
  0x90   : > { %v660_v31 = vrot.slane %v2874_v10, 1  ;;  %v2903_v9 = vcombine.low %v2801_v39, %v3727_v11 }
  0x91   : > { %1237 = vrot.lane.b32.xlu1 %v1198_v54, %s3253_s16  ;;  %v880_v54 = vshrl.u32 %v3739_v22, 16  ;;  %v887_v43 = vshll.u32 %v3754_v40, 16  ;;  %v978_v13 = vrot.slane %v3754_v40, 1  ;;  %v2844_v40 = vld [vmem:[%s3324_s30 + $0x84] sm:$0xe] }
  0x92   : > { %v662_v42 = vsel %vm632_vm0, %v660_v31, %v661_v30  ;;  %v1202_v31 = vshll.u32 %v3789_v2, 16  ;;  %v3179_v30 = vld [vmem:[%s3324_s30 + $0x80] ss:$0 sps:$4 sm:$0x11]  }
  0x93   : > { %1235 = vrot.lane.b32.xlu0 %v1186_v3, %s3253_s16  ;;  %v3733_v46 = vpop.permute.xlu1 %665  ;;  %v897_v3 = vor.u32 %v896_v48, %v892_v47  ;;  %v885_v53 = vor.u32 %v884_v55, %v880_v54  ;;  %v1207_v48 = vshll.u32 %v3179_v30, 16  ;;  %v2934_v54 = vcombine.low %v2844_v40, %v3765_v52 }
  0x94   : > { %v1204_v47 = vrot.slane %v1202_v31, 1 }
  0x95   : > { %v583_v24 = vpop.permute.xlu0 %582  ;;  %598 = vrot.lane.b32.xlu1 %v569_v6, %s3250_s11  ;;  %v889_v6 = vrot.slane %v887_v43, 1  ;;  %v902_v11 = vsel %vm461_vm1, %v897_v3, %v901_v4  ;;  %v1209_v57 = vrot.slane %v1207_v48, 1 }
  0x96   : > { %v1325_v56 = vsel %vm1323_vm3, %v3353_v25, %v583_v24  ;;  %v977_v24 = vrot.slane %v2903_v9, 1 }
  0x97   : > { %1315 = vrot.lane.b32.xlu0 %v1293_v20, %s3254_s17  ;;  %v3749_v8 = vpop.permute.xlu1 %985  ;;  %v1346_v0 = vsel %vm1344_vm4, %v1325_v56, %v3715_v61  ;;  %v1214_v61 = vshll.u32 %v3780_v5, 16  ;;  %v3798_v20 = vld [vmem:[%s3324_s30 + $0x8c] ss:$0 sps:$4 sm:$0x11]  }
  0x98   : > { %v1367_v21 = vsel %vm1365_vm5, %v1346_v0, %v3695_v23  ;;  %v1219_v36 = vshll.u32 %v3798_v20, 16  ;;  %v979_v37 = vsel %vm632_vm0, %v977_v24, %v978_v13  ;;  %v1301_v9 = vrot.slane %v3798_v20, 1 }
  0x99   : > { %v585_v41 = vpop.permute.xlu0 %584  ;;  %600 = vrot.lane.b32.xlu1 %v581_v26, %s3250_s11 }
  0x9a   : > { %v1327_v7 = vsel %vm1323_vm3, %v3357_v27, %v585_v41  ;;  %v980_v27 = vrot.slane %v2904_v60, 1  ;;  %v1200_v41 = vshrl.u32 %v3789_v2, 16  ;;  %v1221_v43 = vrot.slane %v1219_v36, 1 }
  0x9b   : > { %1317 = vrot.lane.b32.xlu0 %v1296_v1, %s3254_s17  ;;  %v3761_v29 = vpop.permute.xlu1 %905  ;;  %v1348_v19 = vsel %vm1344_vm4, %v1327_v7, %v3733_v46  ;;  %v890_v46 = vsel %vm461_vm1, %v885_v53, %v889_v6  ;;  %v1216_v1 = vrot.slane %v1214_v61, 1  ;;  %v1300_v7 = vrot.slane %v2934_v54, 1 }
  0x9c   : > { %v1369_v34 = vsel %vm1365_vm5, %v1348_v19, %v3693_v18  ;;  %v1205_v60 = vor.u32 %v1204_v47, %v1200_v41  ;;  %v1298_v53 = vrot.slane %v3179_v30, 1 }
  0x9d   : > { %v904_v58 = vpop.permute.xlu0 %903  ;;  %681 = vrot.lane.b32.xlu1 %v662_v42, %s3249_s8  ;;  %v1390_v42 = vsel %vm1386_vm6, %v1369_v34, %v3761_v29  ;;  %v1217_v55 = vor.u32 %v1216_v1, %v1212_v35 }
  0x9e   : > { %v1388_v26 = vsel %vm1386_vm6, %v1367_v21, %v904_v58  ;;  %v1411_v39 = vsel %vm1407_vm7, %v1390_v42, %v3749_v8 }
  0x9f   : > { %679 = vrot.lane.b32.xlu0 %v659_v38, %s3249_s8  ;;  %v1056_v25 = vpop.permute.xlu1 %1055  ;;  %v1409_v14 = vsel %vm1407_vm7, %v1388_v26, %v3713_v59  ;;  %v2843_v59 = vld [vmem:[%s3324_s30 + $0x78] sm:$0xe]  ;;  %v1222_v8 = vsel %vm461_vm1, %v1217_v55, %v1221_v43 }
  0xa0   : > { %v1432_v56 = vsel %vm1428_vm8, %v1411_v39, %v1056_v25  ;;  %v2933_v58 = vcombine.low %v2843_v59, %v3777_v63  ;;  %v1210_v25 = vsel %vm461_vm1, %v1205_v60, %v1209_v57 }
  0xa1   : > { %v1054_v10 = vpop.permute.xlu0 %1053  ;;  %751 = vrot.lane.b32.xlu1 %v2884_v15, %s3247_s6 }
  0xa2   : > { %v1430_v44 = vsel %vm1428_vm8, %v1409_v14, %v1054_v10  ;;  %v1297_v0 = vrot.slane %v2933_v58, 1 }
  0xa3   : > { %749 = vrot.lane.b32.xlu0 %v3739_v22, %s3247_s6  ;;  %v1226_v15 = vpop.permute.xlu1 %1225  ;;  %v982_v22 = vsel %vm632_vm0, %v980_v27, %v981_v16 }
  0xa4   : > { %v1453_v3 = vsel %vm1449_vm9, %v1432_v56, %v1226_v15  ;;  %v1299_v27 = vsel %vm632_vm0, %v1297_v0, %v1298_v53 }
  0xa5   : > { %v1224_v23 = vpop.permute.xlu0 %1223  ;;  %921 = vrot.lane.b32.xlu1 %v902_v11, %s3251_s14 }
  0xa6   : > { %v1451_v50 = vsel %vm1449_vm9, %v1430_v44, %v1224_v23 }
  0xa7   : > { %919 = vrot.lane.b32.xlu0 %v890_v46, %s3251_s14  ;;  %v587_v18 = vpop.permute.xlu1 %586 }
  0xa8   : > { %v1329_v15 = vsel %vm1323_vm3, %v3406_v17, %v587_v18 }
  0xa9   : > { %v1304_v51 = vpop.permute.xlu0 %1303  ;;  %1001 = vrot.lane.b32.xlu1 %v982_v22, %s3248_s7 }
  0xaa   : > { %v1472_v38 = vsel %vm1470_vm10, %v1451_v50, %v1304_v51 }
  0xab   : > { %999 = vrot.lane.b32.xlu0 %v979_v37, %s3248_s7  ;;  %2994 = vmatprep.mubr.msk.bf16.mxu0 %vm1518_vm11, %v1472_v38  ;;  %v589_v29 = vpop.permute.xlu1 %588 }
  0xac   : > { %v1331_v26 = vsel %vm1323_vm3, %v3420_v32, %v589_v29 }
  0xad   : > { %v1306_v4 = vpop.permute.xlu0 %1305  ;;  %1071 = vrot.lane.b32.xlu1 %v3780_v5, %s3252_s15  ;;  %v1302_v5 = vsel %vm632_vm0, %v1300_v7, %v1301_v9 }
  0xae   : > { %v1474_v52 = vsel %vm1470_vm10, %v1453_v3, %v1306_v4 }
  0xaf   : > { %1069 = vrot.lane.b32.xlu0 %v3789_v2, %s3252_s15  ;;  %2995 = vmatmul.mubr.msk.bf16.vlgmr.msra.gmra.mrb[0].mxu0 %vm1518_vm11, %v1474_v52  ;;  %v670_v63 = vpop.permute.xlu1 %669 }
  0xb0   : > { %v1352_v22 = vsel %vm1344_vm4, %v1331_v26, %v670_v63 }
  0xb1   : > { %v668_v6 = vpop.permute.xlu0 %667  ;;  %1241 = vrot.lane.b32.xlu1 %v1222_v8, %s3253_s16 }
  0xb2   : > { %v1350_v13 = vsel %vm1344_vm4, %v1329_v15, %v668_v6 }
  0xb3   : > { %1239 = vrot.lane.b32.xlu0 %v1210_v25, %s3253_s16  ;;  %v740_v10 = vpop.permute.xlu1 %739 }
  0xb4   : > { %v1373_v17 = vsel %vm1365_vm5, %v1352_v22, %v740_v10 }
  0xb5   : > { %v738_v16 = vpop.permute.xlu0 %737  ;;  %1321 = vrot.lane.b32.xlu1 %v1302_v5, %s3254_s17 }
  0xb6   : > { %v1371_v46 = vsel %vm1365_vm5, %v1350_v13, %v738_v16 }
  0xb7   : > { %1319 = vrot.lane.b32.xlu0 %v1299_v27, %s3254_s17  ;;  %v910_v2 = vpop.permute.xlu1 %909 }
  0xb8   : > { %v1394_v14 = vsel %vm1386_vm6, %v1373_v17, %v910_v2 }
  0xb9   : > { %v908_v19 = vpop.permute.xlu0 %907 }
  0xba   : > { %v1392_v30 = vsel %vm1386_vm6, %v1371_v46, %v908_v19 }
  0xbb   : > { %v990_v11 = vpop.permute.xlu1 %989 }
  0xbc   : > { %v1415_v18 = vsel %vm1407_vm7, %v1394_v14, %v990_v11 }
  0xbd   : > { %v988_v61 = vpop.permute.xlu0 %987 }
  0xbe   : > { %v1413_v34 = vsel %vm1407_vm7, %v1392_v30, %v988_v61 }
  0xbf   : > { %v1060_v20 = vpop.permute.xlu1 %1059 }
  0xc0   : > { %v1436_v40 = vsel %vm1428_vm8, %v1415_v18, %v1060_v20 }
  0xc1   : > { %v1058_v21 = vpop.permute.xlu0 %1057 }
  0xc2   : > { %v1434_v35 = vsel %vm1428_vm8, %v1413_v34, %v1058_v21 }
  0xc3   : > { %v1230_v24 = vpop.permute.xlu1 %1229 }
  0xc4   : > { %v1457_v41 = vsel %vm1449_vm9, %v1436_v40, %v1230_v24 }
  0xc5   : > { %v1228_v31 = vpop.permute.xlu0 %1227 }
  0xc6   : > { %v1455_v1 = vsel %vm1449_vm9, %v1434_v35, %v1228_v31 }
  0xc7   : > { %v591_v23 = vpop.permute.xlu1 %590 }
  0xc8   : > { %v1333_v29 = vsel %vm1323_vm3, %v3486_v49, %v591_v23 }
  0xc9   : > { %v1308_v36 = vpop.permute.xlu0 %1307 }
  0xca   : > { %v1476_v32 = vsel %vm1470_vm10, %v1455_v1, %v1308_v36 }
  0xcb   : > { %2998 = vmatprep.mubr.msk.bf16.mxu0 %vm1518_vm11, %v1476_v32  ;;  %v593_v37 = vpop.permute.xlu1 %592 }
  0xcc   : > { %v1335_v60 = vsel %vm1323_vm3, %v3503_v62, %v593_v37 }
  0xcd   : > { %v1310_v42 = vpop.permute.xlu0 %1309 }
  0xce   : > { %v1478_v44 = vsel %vm1470_vm10, %v1457_v41, %v1310_v42 }
  0xcf   : > { %2999 = vmatmul.mubr.msk.bf16.gmra.mrb[4].mxu0 %vm1518_vm11, %v1478_v44  ;;  %v674_v47 = vpop.permute.xlu1 %673 }
  0xd0   : > { %v1356_v7 = vsel %vm1344_vm4, %v1335_v60, %v674_v47 }
  0xd1   : > { %v672_v48 = vpop.permute.xlu0 %671 }
  0xd2   : > { %v1354_v58 = vsel %vm1344_vm4, %v1333_v29, %v672_v48 }
  0xd3   : > { %v744_v50 = vpop.permute.xlu1 %743 }
  0xd4   : > { %v1377_v49 = vsel %vm1365_vm5, %v1356_v7, %v744_v50 }
  0xd5   : > { %v742_v51 = vpop.permute.xlu0 %741 }
  0xd6   : > { %v1375_v57 = vsel %vm1365_vm5, %v1354_v58, %v742_v51 }
  0xd7   : > { %v914_v59 = vpop.permute.xlu1 %913 }
  0xd8   : > { %v1398_v0 = vsel %vm1386_vm6, %v1377_v49, %v914_v59 }
  0xd9   : > { %v912_v38 = vpop.permute.xlu0 %911 }
  0xda   : > { %v1396_v4 = vsel %vm1386_vm6, %v1375_v57, %v912_v38 }
  0xdb   : > { %v994_v54 = vpop.permute.xlu1 %993 }
  0xdc   : > { %v1419_v53 = vsel %vm1407_vm7, %v1398_v0, %v994_v54 }
  0xdd   : > { %v992_v55 = vpop.permute.xlu0 %991 }
  0xde   : > { %v1417_v52 = vsel %vm1407_vm7, %v1396_v4, %v992_v55 }
  0xdf   : > { %v1064_v43 = vpop.permute.xlu1 %1063 }
  0xe0   : > { %v1440_v5 = vsel %vm1428_vm8, %v1419_v53, %v1064_v43 }
  0xe1   : > { %v1062_v39 = vpop.permute.xlu0 %1061 }
  0xe2   : > { %v1438_v9 = vsel %vm1428_vm8, %v1417_v52, %v1062_v39 }
  0xe3   : > { %v1234_v56 = vpop.permute.xlu1 %1233 }
  0xe4   : > { %v1461_v10 = vsel %vm1449_vm9, %v1440_v5, %v1234_v56 }
  0xe5   : > { %v1232_v3 = vpop.permute.xlu0 %1231 }
  0xe6   : > { %v1459_v63 = vsel %vm1449_vm9, %v1438_v9, %v1232_v3 }
  0xe7   : > { %v595_v8 = vpop.permute.xlu1 %594 }
  0xe8   : > { %v1337_v46 = vsel %vm1323_vm3, %v3571_v28, %v595_v8 }
  0xe9   : > { %v1312_v25 = vpop.permute.xlu0 %1311 }
  0xea   : > { %v1480_v62 = vsel %vm1470_vm10, %v1459_v63, %v1312_v25 }
  0xeb   : > { %3002 = vmatprep.mubr.msk.bf16.mxu0 %vm1518_vm11, %v1480_v62  ;;  %v597_v6 = vpop.permute.xlu1 %596 }
  0xec   : > { %v1339_v34 = vsel %vm1323_vm3, %v3589_v45, %v597_v6 }
  0xed   : > { %v1314_v27 = vpop.permute.xlu0 %1313 }
  0xee   : > { %v1482_v16 = vsel %vm1470_vm10, %v1461_v10, %v1314_v27  ;;  %v3935_v27 = vld [vmem:[%s4367_s2] ss:$0 sm:$0xff] }
  0xef   : > { %3003 = vmatmul.mubr.msk.bf16.gmra.mrb[8].mxu0 %vm1518_vm11, %v1482_v16  ;;  %v678_v2 = vpop.permute.xlu1 %677 }
  0xf0   : > { %v1360_v36 = vsel %vm1344_vm4, %v1339_v34, %v678_v2 }
  0xf1   : > { %v676_v19 = vpop.permute.xlu0 %675 }
  0xf2   : > { %v1358_v30 = vsel %vm1344_vm4, %v1337_v46, %v676_v19 }
  0xf3   : > { %v748_v11 = vpop.permute.xlu1 %747 }
  0xf4   : > { %v1381_v28 = vsel %vm1365_vm5, %v1360_v36, %v748_v11 }
  0xf5   : > { %v746_v61 = vpop.permute.xlu0 %745 }
  0xf6   : > { %v1379_v23 = vsel %vm1365_vm5, %v1358_v30, %v746_v61 }
  0xf7   : > { %v918_v20 = vpop.permute.xlu1 %917 }
  0xf8   : > { %v1402_v37 = vsel %vm1386_vm6, %v1381_v28, %v918_v20 }
  0xf9   : > { %v916_v21 = vpop.permute.xlu0 %915 }
  0xfa   : > { %v1400_v35 = vsel %vm1386_vm6, %v1379_v23, %v916_v21 }
  0xfb   : > { %v998_v15 = vpop.permute.xlu1 %997 }
  0xfc   : > { %v1423_v40 = vsel %vm1407_vm7, %v1402_v37, %v998_v15 }
  0xfd   : > { %v996_v24 = vpop.permute.xlu0 %995 }
  0xfe   : > { %v1421_v17 = vsel %vm1407_vm7, %v1400_v35, %v996_v24 }
  0xff   : > { %v1068_v13 = vpop.permute.xlu1 %1067 }
 0x100   : > { %v1444_v42 = vsel %vm1428_vm8, %v1423_v40, %v1068_v13 }
 0x101   : > { %v1066_v26 = vpop.permute.xlu0 %1065 }
 0x102   : > { %v1442_v14 = vsel %vm1428_vm8, %v1421_v17, %v1066_v26  ;;  %v1682_v26 = vstv %s1678_s9 }
 0x103   : > { %v1238_v31 = vpop.permute.xlu1 %1237 }
 0x104   : > { %v1465_v44 = vsel %vm1449_vm9, %v1444_v42, %v1238_v31 }
 0x105   : > { %v1236_v22 = vpop.permute.xlu0 %1235 }
 0x106   : > { %v1463_v32 = vsel %vm1449_vm9, %v1442_v14, %v1236_v22 }
 0x107   : > { %v599_v1 = vpop.permute.xlu1 %598 }
 0x108   : > { %v1341_v60 = vsel %vm1323_vm3, %v3671_v12, %v599_v1 }
 0x109   : > { %v1316_v18 = vpop.permute.xlu0 %1315 }
 0x10a   : > { %v1484_v45 = vsel %vm1470_vm10, %v1463_v32, %v1316_v18 }
 0x10b   : > { %3006 = vmatprep.mubr.msk.bf16.mxu0 %vm1518_vm11, %v1484_v45  ;;  %v601_v41 = vpop.permute.xlu1 %600 }
 0x10c   : > { %v1343_v56 = vsel %vm1323_vm3, %v3688_v33, %v601_v41 }
 0x10d   : > { %v1318_v47 = vpop.permute.xlu0 %1317 }
 0x10e   : > { %v1486_v48 = vsel %vm1470_vm10, %v1465_v44, %v1318_v47 }
 0x10f   : > { %3007 = vmatmul.mubr.msk.bf16.gmra.mrb[12].mxu0 %vm1518_vm11, %v1486_v48  ;;  %v682_v50 = vpop.permute.xlu1 %681 }
 0x110   : > { %v1364_v57 = vsel %vm1344_vm4, %v1343_v56, %v682_v50 }
 0x111   : > { %v680_v51 = vpop.permute.xlu0 %679 }
 0x112   : > { %v1362_v4 = vsel %vm1344_vm4, %v1341_v60, %v680_v51 }
 0x113   : > { %v752_v59 = vpop.permute.xlu1 %751 }
 0x114   : > { %v1385_v52 = vsel %vm1365_vm5, %v1364_v57, %v752_v59 }
 0x115   : > { %v750_v38 = vpop.permute.xlu0 %749 }
 0x116   : > { %v1383_v8 = vsel %vm1365_vm5, %v1362_v4, %v750_v38 }
 0x117   : > { %v922_v54 = vpop.permute.xlu1 %921 }
 0x118   : > { %v1406_v7 = vsel %vm1386_vm6, %v1385_v52, %v922_v54 }
 0x119   : > { %v920_v55 = vpop.permute.xlu0 %919 }
 0x11a   : > { %v1404_v49 = vsel %vm1386_vm6, %v1383_v8, %v920_v55 }
 0x11b   : > { %v1002_v43 = vpop.permute.xlu1 %1001 }
 0x11c   : > { %v1427_v33 = vsel %vm1407_vm7, %v1406_v7, %v1002_v43 }
 0x11d   : > { %v1000_v39 = vpop.permute.xlu0 %999 }
 0x11e   : > { %v1425_v63 = vsel %vm1407_vm7, %v1404_v49, %v1000_v39 }
 0x11f   : > { %v1072_v29 = vpop.permute.xlu1 %1071 }
 0x120   : > { %v1448_v12 = vsel %vm1428_vm8, %v1427_v33, %v1072_v29 }
 0x121   : > { %v1070_v58 = vpop.permute.xlu0 %1069 }
 0x122   : > { %v1446_v0 = vsel %vm1428_vm8, %v1425_v63, %v1070_v58 }
 0x123   : > { %v1242_v3 = vpop.permute.xlu1 %1241 }
 0x124   : > { %v1469_v62 = vsel %vm1449_vm9, %v1448_v12, %v1242_v3 }
 0x125   : > { %v1240_v9 = vpop.permute.xlu0 %1239 }
 0x126   : > { %v1467_v53 = vsel %vm1449_vm9, %v1446_v0, %v1240_v9 }
 0x127   : > { %v1322_v25 = vpop.permute.xlu1 %1321 }
 0x128   : > { %v1490_v6 = vsel %vm1470_vm10, %v1469_v62, %v1322_v25 }
 0x129   : > { %v1320_v5 = vpop.permute.xlu0 %1319 }
 0x12a   : > { %v1488_v10 = vsel %vm1470_vm10, %v1467_v53, %v1320_v5 }
 0x12b   : > { %3010 = vmatprep.mubr.msk.bf16.mxu0 %vm1518_vm11, %v1488_v10 }
 0x12c   : > { %3011 = vmatmul.mubr.msk.bf16.gmra.mrb[16].mxu0 %vm1518_vm11, %v1490_v6 }
 0x182   : > { %v2996_v16 = vpop.f32.mrb[0].mxu0 }
 0x183   : > { %v1586_v2 = vadd.f32 %v2996_v16, %v3935_v27  ;;  %v1577_v19 = vpop.f32.mrb[1].mxu0 }
 0x184   : > { %v1578_v11 = vadd.f32 %v3935_v27, %v1577_v19  ;;  %v2997_v61 = vpop.f32.mrb[2].mxu0 }
 0x185   : > { %v1589_v20 = vadd.f32 %v2997_v61, %v3935_v27  ;;  %v1580_v21 = vpop.f32.mrb[3].mxu0  ;;  %v1658_v13 = vmax.f32 %v1586_v2, 0.0 }
 0x186   : > { %v1656_v15 = vmax.f32 %v1578_v11, 0.0  ;;  %v1581_v24 = vadd.f32 %v3935_v27, %v1580_v21 }
 0x187   : > { %v1659_v46 = vmax.f32 %v1589_v20, 0.0 }
 0x188   : > { %v1657_v31 = vmax.f32 %v1581_v24, 0.0  ;;  %v1683_v34 = vmul.f32 %v1682_v26, %v1656_v15 }
 0x189   : > { %v1689_v30 = vpack.c.bf16 %v1659_v46, %v1658_v13 }
 0x18a   : > { %v1684_v23 = vmul.f32 %v1682_v26, %v1657_v31 }
 0x18b   : > { %v1706_v22 = vshrl.u32 %v1689_v30, 16  ;;  %v1709_v36 = vshll.u32 %v1689_v30, 16 }
 0x18c   : > { %v1688_v35 = vpack.c.bf16 %v1684_v23, %v1683_v34 }
 0x18d   : > { %v1708_v1 = vrot.slane %v1706_v22, 7 }
 0x18e   : > { %v1699_v14 = vshrl.u32 %v1688_v35, 16  ;;  %v1702_v37 = vshll.u32 %v1688_v35, 16 }
 0x18f   : > { %v1711_v28 = vor.u32 %v1709_v36, %v1708_v1  ;;  %v1802_v32 = vsel %vm3941_vm14, %v1708_v1, 0  ;;  %v3180_v36 = vld [vmem:[%s4368_s3] sm:$0xff]  }
 0x190   : > { %v1701_v18 = vrot.slane %v1699_v14, 7  ;;  %v1943_v40 = vrot.slane %v1802_v32, 1  ;;  %v1831_v47 = vshll.u32 %v1802_v32, 16  ;;  %3014 = vmatprep.subr.bf16.mxu1 %v3180_v36 }
 0x191   : > { %v3949_v45 = vsel %vm3941_vm14, 0, %v1711_v28  ;;  %3015 = vmatpush3.bf16.msra.mxu1 %v3180_v36 }
 0x192   : > { %v1704_v41 = vor.u32 %v1702_v37, %v1701_v18  ;;  %1980 = vrot.lane.b32.xlu0 %v3949_v45, %s3247_s6  ;;  %v1942_v42 = vrot.slane %v3949_v45, 1  ;;  %v1826_v44 = vshll.u32 %v3949_v45, 16  ;;  %v1824_v48 = vshrl.u32 %v3949_v45, 16 }
 0x193   : > { %v1801_v38 = vsel %vm3941_vm14, %v1701_v18, 0  ;;  %v1833_v43 = vrot.slane %v1831_v47, 1 }
 0x194   : > { %v1944_v50 = vsel %vm632_vm0, %v1942_v42, %v1943_v40  ;;  %v1828_v51 = vrot.slane %v1826_v44, 1  ;;  %v3959_v59 = vsel %vm3941_vm14, 0, %v1704_v41  ;;  %v1940_v39 = vrot.slane %v1801_v38, 1  ;;  %v3181_v42 = vld [vmem:[%s4368_s3 + $0x8] sm:$0xff]  }
 0x195   : > { %1965 = vrot.lane.b32.xlu1 %v1944_v50, %s3249_s8  ;;  %v1939_v54 = vrot.slane %v3959_v59, 1  ;;  %v1814_v5 = vshll.u32 %v3959_v59, 16  ;;  %v1812_v20 = vshrl.u32 %v3959_v59, 16  ;;  %v1819_v21 = vshll.u32 %v1801_v38, 16  ;;  %3016 = vmatprep.subr.bf16.mxu1 %v3181_v42 }
 0x196   : > { %2028 = vrot.lane.b32.xlu0 %v1944_v50, %s3248_s7  ;;  %v1829_v55 = vor.u32 %v1828_v51, %v1824_v48  ;;  %3017 = vmatpush3.bf16.msra.mxu1 %v3181_v42 }
 0x197   : > { %v1941_v56 = vsel %vm632_vm0, %v1939_v54, %v1940_v39  ;;  %v1816_v61 = vrot.slane %v1814_v5, 1  ;;  %v1821_v31 = vrot.slane %v1819_v21, 1  ;;  %v3182_v39 = vld [vmem:[%s4368_s3 + $0x10] ss:$0 sps:$4 sm:$0x33]  }
 0x198   : > { %v1834_v29 = vsel %vm461_vm1, %v1829_v55, %v1833_v43  ;;  %3037 = vmatprep.subr.msk.bf16.mxu1 %vm1539_vm2, %v3182_v39 }
 0x199   : > { %1909 = vrot.lane.b32.xlu1 %v1834_v29, %s3250_s11  ;;  %v1817_v13 = vor.u32 %v1816_v61, %v1812_v20 }
 0x19a   : > { %1963 = vrot.lane.b32.xlu0 %v1941_v56, %s3249_s8 }
 0x19b   : > { %v1822_v23 = vsel %vm461_vm1, %v1817_v13, %v1821_v31 }
 0x19e   : > { %2008 = vrot.lane.b32.xlu0 %v1834_v29, %s3251_s14 }
 0x1a2   : > { %v3000_v58 = vpop.f32.mrb[4].mxu0 }
 0x1a3   : > { %v1602_v60 = vadd.f32 %v3000_v58, %v3935_v27  ;;  %v1593_v57 = vpop.f32.mrb[5].mxu0 }
 0x1a4   : > { %v1594_v3 = vadd.f32 %v3935_v27, %v1593_v57  ;;  %v3001_v4 = vpop.f32.mrb[6].mxu0  ;;  %v2281_v57 = vsel %vm1539_vm2, %v3182_v39, 0 }
 0x1a5   : > { %v1605_v52 = vadd.f32 %v3001_v4, %v3935_v27  ;;  %v1596_v8 = vpop.f32.mrb[7].mxu0  ;;  %v1662_v9 = vmax.f32 %v1602_v60, 0.0  ;;  %3019 = vmatpush3.bf16.msra.mxu1 %v2281_v57 }
 0x1a6   : > { %v1597_v7 = vadd.f32 %v3935_v27, %v1596_v8  ;;  %v1660_v33 = vmax.f32 %v1594_v3, 0.0 }
 0x1a7   : > { %v1663_v49 = vmax.f32 %v1605_v52, 0.0 }
 0x1a8   : > { %v1661_v63 = vmax.f32 %v1597_v7, 0.0 }
 0x1a9   : > { %v1691_v12 = vpack.c.bf16 %v1663_v49, %v1662_v9 }
 0x1aa   : > { %v1690_v25 = vpack.c.bf16 %v1661_v63, %v1660_v33 }
 0x1ab   : > { %v1720_v0 = vshrl.u32 %v1691_v12, 16  ;;  %v1723_v6 = vshll.u32 %v1691_v12, 16 }
 0x1ac   : > { %v1713_v62 = vshrl.u32 %v1690_v25, 16  ;;  %v1716_v2 = vshll.u32 %v1690_v25, 16 }
 0x1ad   : > { %v1722_v53 = vrot.slane %v1720_v0, 7 }
 0x1ae   : > { %v1715_v10 = vrot.slane %v1713_v62, 7 }
 0x1af   : > { %v1725_v16 = vor.u32 %v1723_v6, %v1722_v53  ;;  %v1804_v15 = vsel %vm3941_vm14, %v1722_v53, 0 }
 0x1b0   : > { %v1718_v19 = vor.u32 %v1716_v2, %v1715_v10  ;;  %v1949_v30 = vrot.slane %v1804_v15, 1  ;;  %v1803_v34 = vsel %vm3941_vm14, %v1715_v10, 0  ;;  %v1855_v32 = vshll.u32 %v1804_v15, 16 }
 0x1b1   : > { %v3978_v11 = vsel %vm3941_vm14, 0, %v1725_v16  ;;  %v1946_v14 = vrot.slane %v1803_v34, 1  ;;  %v1843_v54 = vshll.u32 %v1803_v34, 16 }
 0x1b2   : > { %1984 = vrot.lane.b32.xlu0 %v3978_v11, %s3247_s6  ;;  %2047 = vrot.lane.b32.xlu1 %v3978_v11, %s3252_s15  ;;  %v3989_v24 = vsel %vm3941_vm14, 0, %v1718_v19  ;;  %v1948_v26 = vrot.slane %v3978_v11, 1  ;;  %v1850_v46 = vshll.u32 %v3978_v11, 16  ;;  %v1848_v28 = vshrl.u32 %v3978_v11, 16 }
 0x1b3   : > { %v1945_v35 = vrot.slane %v3989_v24, 1  ;;  %v1838_v40 = vshll.u32 %v3989_v24, 16  ;;  %v1857_v41 = vrot.slane %v1855_v32, 1  ;;  %v1836_v38 = vshrl.u32 %v3989_v24, 16 }
 0x1b4   : > { %v1950_v22 = vsel %vm632_vm0, %v1948_v26, %v1949_v30  ;;  %v1852_v1 = vrot.slane %v1850_v46, 1  ;;  %v1845_v52 = vrot.slane %v1843_v54, 1 }
 0x1b5   : > { %v1947_v18 = vsel %vm632_vm0, %v1945_v35, %v1946_v14  ;;  %v1840_v47 = vrot.slane %v1838_v40, 1 }
 0x1b6   : > { %2045 = vrot.lane.b32.xlu0 %v3989_v24, %s3252_s15  ;;  %1982 = vrot.lane.b32.xlu1 %v3989_v24, %s3247_s6  ;;  %v1853_v37 = vor.u32 %v1852_v1, %v1848_v28 }
 0x1b7   : > { %v1841_v58 = vor.u32 %v1840_v47, %v1836_v38 }
 0x1b8   : > { %v1858_v44 = vsel %vm461_vm1, %v1853_v37, %v1857_v41 }
 0x1b9   : > { %v1846_v49 = vsel %vm461_vm1, %v1841_v58, %v1845_v52 }
 0x1ba   : > { %1907 = vrot.lane.b32.xlu0 %v1822_v23, %s3250_s11  ;;  %1969 = vrot.lane.b32.xlu1 %v1950_v22, %s3249_s8 }
 0x1be   : > { %2095 = vrot.lane.b32.xlu0 %v1950_v22, %s3254_s17  ;;  %2030 = vrot.lane.b32.xlu1 %v1947_v18, %s3248_s7 }
 0x1c2   : > { %2032 = vrot.lane.b32.xlu0 %v1950_v22, %s3248_s7  ;;  %2075 = vrot.lane.b32.xlu1 %v1858_v44, %s3253_s16  ;;  %v3004_v48 = vpop.f32.mrb[8].mxu0 }
 0x1c3   : > { %v1618_v50 = vadd.f32 %v3004_v48, %v3935_v27  ;;  %v1609_v51 = vpop.f32.mrb[9].mxu0 }
 0x1c4   : > { %v1610_v55 = vadd.f32 %v3935_v27, %v1609_v51  ;;  %v3005_v43 = vpop.f32.mrb[10].mxu0 }
 0x1c5   : > { %v1621_v29 = vadd.f32 %v3005_v43, %v3935_v27  ;;  %v1612_v56 = vpop.f32.mrb[11].mxu0  ;;  %v1666_v3 = vmax.f32 %v1618_v50, 0.0 }
 0x1c6   : > { %v1613_v60 = vadd.f32 %v3935_v27, %v1612_v56  ;;  %2093 = vrot.lane.b32.xlu0 %v1947_v18, %s3254_s17  ;;  %1913 = vrot.lane.b32.xlu1 %v1858_v44, %s3250_s11  ;;  %v1664_v8 = vmax.f32 %v1610_v55, 0.0 }
 0x1c7   : > { %v1667_v4 = vmax.f32 %v1621_v29, 0.0 }
 0x1c8   : > { %v1665_v7 = vmax.f32 %v1613_v60, 0.0 }
 0x1c9   : > { %v1693_v9 = vpack.c.bf16 %v1667_v4, %v1666_v3 }
 0x1ca   : > { %v1692_v33 = vpack.c.bf16 %v1665_v7, %v1664_v8  ;;  %1967 = vrot.lane.b32.xlu0 %v1947_v18, %s3249_s8  ;;  %2010 = vrot.lane.b32.xlu1 %v1846_v49, %s3251_s14 }
 0x1cb   : > { %v1734_v63 = vshrl.u32 %v1693_v9, 16  ;;  %v1737_v0 = vshll.u32 %v1693_v9, 16 }
 0x1cc   : > { %v1727_v12 = vshrl.u32 %v1692_v33, 16  ;;  %v1730_v6 = vshll.u32 %v1692_v33, 16 }
 0x1cd   : > { %v1736_v25 = vrot.slane %v1734_v63, 7 }
 0x1ce   : > { %v1729_v62 = vrot.slane %v1727_v12, 7  ;;  %2012 = vrot.lane.b32.xlu0 %v1858_v44, %s3251_s14  ;;  %1911 = vrot.lane.b32.xlu1 %v1846_v49, %s3250_s11 }
 0x1cf   : > { %v1739_v53 = vor.u32 %v1737_v0, %v1736_v25  ;;  %v1806_v16 = vsel %vm3941_vm14, %v1736_v25, 0 }
 0x1d0   : > { %v1732_v5 = vor.u32 %v1730_v6, %v1729_v62  ;;  %v1955_v20 = vrot.slane %v1806_v16, 1  ;;  %v1805_v21 = vsel %vm3941_vm14, %v1729_v62, 0  ;;  %v1879_v30 = vshll.u32 %v1806_v16, 16 }
 0x1d1   : > { %v4037_v10 = vsel %vm3941_vm14, 0, %v1739_v53  ;;  %v1952_v46 = vrot.slane %v1805_v21, 1  ;;  %v1867_v37 = vshll.u32 %v1805_v21, 16 }
 0x1d2   : > { %2073 = vrot.lane.b32.xlu0 %v1846_v49, %s3253_s16  ;;  %2051 = vrot.lane.b32.xlu1 %v4037_v10, %s3252_s15  ;;  %v4046_v2 = vsel %vm3941_vm14, 0, %v1732_v5  ;;  %v1954_v19 = vrot.slane %v4037_v10, 1  ;;  %v1874_v61 = vshll.u32 %v4037_v10, 16  ;;  %v1872_v31 = vshrl.u32 %v4037_v10, 16 }
 0x1d3   : > { %v1951_v13 = vrot.slane %v4046_v2, 1  ;;  %v1862_v22 = vshll.u32 %v4046_v2, 16  ;;  %v1881_v35 = vrot.slane %v1879_v30, 1  ;;  %v1860_v18 = vshrl.u32 %v4046_v2, 16 }
 0x1d4   : > { %v1956_v15 = vsel %vm632_vm0, %v1954_v19, %v1955_v20  ;;  %v1876_v26 = vrot.slane %v1874_v61, 1  ;;  %v1869_v38 = vrot.slane %v1867_v37, 1 }
 0x1d5   : > { %v1953_v34 = vsel %vm632_vm0, %v1951_v13, %v1952_v46  ;;  %v1864_v36 = vrot.slane %v1862_v22, 1 }
 0x1d6   : > { %1988 = vrot.lane.b32.xlu0 %v4037_v10, %s3247_s6  ;;  %1986 = vrot.lane.b32.xlu1 %v4046_v2, %s3247_s6  ;;  %v1877_v23 = vor.u32 %v1876_v26, %v1872_v31 }
 0x1d7   : > { %v1865_v47 = vor.u32 %v1864_v36, %v1860_v18 }
 0x1d8   : > { %v1882_v1 = vsel %vm461_vm1, %v1877_v23, %v1881_v35 }
 0x1d9   : > { %v1870_v39 = vsel %vm461_vm1, %v1865_v47, %v1869_v38 }
 0x1da   : > { %2049 = vrot.lane.b32.xlu0 %v4046_v2, %s3252_s15  ;;  %1973 = vrot.lane.b32.xlu1 %v1956_v15, %s3249_s8 }
 0x1de   : > { %2099 = vrot.lane.b32.xlu0 %v1956_v15, %s3254_s17  ;;  %2034 = vrot.lane.b32.xlu1 %v1953_v34, %s3248_s7 }
 0x1e2   : > { %2036 = vrot.lane.b32.xlu0 %v1956_v15, %s3248_s7  ;;  %2079 = vrot.lane.b32.xlu1 %v1882_v1, %s3253_s16  ;;  %v3008_v14 = vpop.f32.mrb[12].mxu0 }
 0x1e3   : > { %v1634_v28 = vadd.f32 %v3008_v14, %v3935_v27  ;;  %v1625_v32 = vpop.f32.mrb[13].mxu0 }
 0x1e4   : > { %v1626_v40 = vadd.f32 %v3935_v27, %v1625_v32  ;;  %v3009_v41 = vpop.f32.mrb[14].mxu0 }
 0x1e5   : > { %v1637_v42 = vadd.f32 %v3009_v41, %v3935_v27  ;;  %v1628_v44 = vpop.f32.mrb[15].mxu0  ;;  %v1670_v50 = vmax.f32 %v1634_v28, 0.0 }
 0x1e6   : > { %v1629_v48 = vadd.f32 %v3935_v27, %v1628_v44  ;;  %2097 = vrot.lane.b32.xlu0 %v1953_v34, %s3254_s17  ;;  %1917 = vrot.lane.b32.xlu1 %v1882_v1, %s3250_s11  ;;  %v1668_v54 = vmax.f32 %v1626_v40, 0.0 }
 0x1e7   : > { %v1671_v51 = vmax.f32 %v1637_v42, 0.0 }
 0x1e8   : > { %v1669_v55 = vmax.f32 %v1629_v48, 0.0 }
 0x1e9   : > { %v1695_v43 = vpack.c.bf16 %v1671_v51, %v1670_v50 }
 0x1ea   : > { %v1694_v29 = vpack.c.bf16 %v1669_v55, %v1668_v54  ;;  %1971 = vrot.lane.b32.xlu0 %v1953_v34, %s3249_s8  ;;  %2014 = vrot.lane.b32.xlu1 %v1870_v39, %s3251_s14 }
 0x1eb   : > { %v1748_v56 = vshrl.u32 %v1695_v43, 16  ;;  %v1751_v57 = vshll.u32 %v1695_v43, 16 }
 0x1ec   : > { %v1741_v58 = vshrl.u32 %v1694_v29, 16  ;;  %v1744_v52 = vshll.u32 %v1694_v29, 16 }
 0x1ed   : > { %v1750_v60 = vrot.slane %v1748_v56, 7 }
 0x1ee   : > { %v1743_v3 = vrot.slane %v1741_v58, 7  ;;  %2016 = vrot.lane.b32.xlu0 %v1882_v1, %s3251_s14  ;;  %1915 = vrot.lane.b32.xlu1 %v1870_v39, %s3250_s11  ;;  %v1685_v1 = vstv %s1681_s29 }
 0x1ef   : > { %v1753_v4 = vor.u32 %v1751_v57, %v1750_v60  ;;  %v1808_v9 = vsel %vm3941_vm14, %v1750_v60, 0 }
 0x1f0   : > { %v1746_v8 = vor.u32 %v1744_v52, %v1743_v3  ;;  %v1961_v12 = vrot.slane %v1808_v9, 1  ;;  %v1807_v25 = vsel %vm3941_vm14, %v1743_v3, 0  ;;  %v1903_v16 = vshll.u32 %v1808_v9, 16 }
 0x1f1   : > { %v4083_v7 = vsel %vm3941_vm14, 0, %v1753_v4  ;;  %v1958_v6 = vrot.slane %v1807_v25, 1  ;;  %v1891_v28 = vshll.u32 %v1807_v25, 16 }
 0x1f2   : > { %2077 = vrot.lane.b32.xlu0 %v1870_v39, %s3253_s16  ;;  %2055 = vrot.lane.b32.xlu1 %v4083_v7, %s3252_s15  ;;  %v4092_v49 = vsel %vm3941_vm14, 0, %v1746_v8  ;;  %v1960_v33 = vrot.slane %v4083_v7, 1  ;;  %v1898_v63 = vshll.u32 %v4083_v7, 16  ;;  %v1896_v5 = vshrl.u32 %v4083_v7, 16 }
 0x1f3   : > { %v1957_v62 = vrot.slane %v4092_v49, 1  ;;  %v1886_v20 = vshll.u32 %v4092_v49, 16  ;;  %v1905_v15 = vrot.slane %v1903_v16, 1  ;;  %v1884_v14 = vshrl.u32 %v4092_v49, 16 }
 0x1f4   : > { %v1962_v0 = vsel %vm632_vm0, %v1960_v33, %v1961_v12  ;;  %v1900_v53 = vrot.slane %v1898_v63, 1  ;;  %v1893_v47 = vrot.slane %v1891_v28, 1 }
 0x1f5   : > { %v1959_v19 = vsel %vm632_vm0, %v1957_v62, %v1958_v6  ;;  %v1888_v34 = vrot.slane %v1886_v20, 1 }
 0x1f6   : > { %1992 = vrot.lane.b32.xlu0 %v4083_v7, %s3247_s6  ;;  %1990 = vrot.lane.b32.xlu1 %v4092_v49, %s3247_s6  ;;  %v1901_v61 = vor.u32 %v1900_v53, %v1896_v5 }
 0x1f7   : > { %v1889_v40 = vor.u32 %v1888_v34, %v1884_v14 }
 0x1f8   : > { %v1906_v30 = vsel %vm461_vm1, %v1901_v61, %v1905_v15 }
 0x1f9   : > { %v1894_v51 = vsel %vm461_vm1, %v1889_v40, %v1893_v47 }
 0x1fa   : > { %2053 = vrot.lane.b32.xlu0 %v4092_v49, %s3252_s15  ;;  %1977 = vrot.lane.b32.xlu1 %v1962_v0, %s3249_s8 }
 0x1fe   : > { %2103 = vrot.lane.b32.xlu0 %v1962_v0, %s3254_s17  ;;  %2038 = vrot.lane.b32.xlu1 %v1959_v19, %s3248_s7 }
 0x1ff   : > { %v3012_v21 = vpop.f32.mrb[16].mxu0 }
 0x200   : > { %v1650_v13 = vadd.f32 %v3012_v21, %v3935_v27  ;;  %v1641_v26 = vpop.f32.mrb[17].mxu0 }
 0x201   : > { %v1642_v46 = vadd.f32 %v3935_v27, %v1641_v26  ;;  %v3013_v31 = vpop.f32.mrb[18].mxu0 }
 0x202   : > { %v1674_v23 = vmax.f32 %v1650_v13, 0.0  ;;  %v1653_v22 = vadd.f32 %v3013_v31, %v3935_v27  ;;  %2040 = vrot.lane.b32.xlu0 %v1962_v0, %s3248_s7  ;;  %2083 = vrot.lane.b32.xlu1 %v1906_v30, %s3253_s16  ;;  %v1644_v35 = vpop.f32.mrb[19].mxu0 }
 0x203   : > { %v1645_v36 = vadd.f32 %v3935_v27, %v1644_v35  ;;  %v1672_v18 = vmax.f32 %v1642_v46, 0.0 }
 0x204   : > { %v1675_v32 = vmax.f32 %v1653_v22, 0.0  ;;  %v1686_v41 = vmul.f32 %v1685_v1, %v1674_v23  ;;  %v1981_v29 = vpop.permute.xlu0 %1980 }
 0x205   : > { %v1673_v37 = vmax.f32 %v1645_v36, 0.0 }
 0x206   : > { %v1687_v42 = vmul.f32 %v1685_v1, %v1675_v32  ;;  %2101 = vrot.lane.b32.xlu0 %v1959_v19, %s3254_s17  ;;  %1921 = vrot.lane.b32.xlu1 %v1906_v30, %s3250_s11 }
 0x207   : > { %v1696_v44 = vpack.c.bf16 %v1673_v37, %v1672_v18  ;;  %v1966_v16 = vpop.permute.xlu1 %1965 }
 0x208   : > { %v1697_v48 = vpack.c.bf16 %v1687_v42, %v1686_v41  ;;  %v2029_v9 = vpop.permute.xlu0 %2028 }
 0x209   : > { %v1755_v50 = vshrl.u32 %v1696_v44, 16  ;;  %v1758_v54 = vshll.u32 %v1696_v44, 16 }
 0x20a   : > { %v1762_v27 = vshrl.u32 %v1697_v48, 16  ;;  %1975 = vrot.lane.b32.xlu0 %v1959_v19, %s3249_s8  ;;  %2018 = vrot.lane.b32.xlu1 %v1894_v51, %s3251_s14  ;;  %v1765_v55 = vshll.u32 %v1697_v48, 16 }
 0x20b   : > { %v1757_v38 = vrot.slane %v1755_v50, 7  ;;  %v1910_v15 = vpop.permute.xlu1 %1909 }
 0x20c   : > { %v1764_v43 = vrot.slane %v1762_v27, 7  ;;  %v1964_v19 = vpop.permute.xlu0 %1963  ;;  %v2112_v40 = vsel %vm1323_vm3, %v3949_v45, %v1910_v15 }
 0x20d   : > { %v1760_v39 = vor.u32 %v1758_v54, %v1757_v38  ;;  %v1809_v60 = vsel %vm3941_vm14, %v1757_v38, 0  ;;  %v2128_v47 = vsel %vm1344_vm4, %v2112_v40, %v1966_v16 }
 0x20e   : > { %2020 = vrot.lane.b32.xlu0 %v1906_v30, %s3251_s14  ;;  %1919 = vrot.lane.b32.xlu1 %v1894_v51, %s3250_s11  ;;  %v1767_v56 = vor.u32 %v1765_v55, %v1764_v43  ;;  %v2004_v8 = vshll.u32 %v1809_v60, 16  ;;  %v2026_v25 = vrot.slane %v1809_v60, 1  ;;  %v1810_v62 = vsel %vm3941_vm14, %v1764_v43, 0 }
 0x20f   : > { %v1799_v58 = vsel %vm3941_vm14, 0, %v1760_v39  ;;  %v2069_v20 = vshll.u32 %v1810_v62, 16  ;;  %v2091_v31 = vrot.slane %v1810_v62, 1 }
 0x210   : > { %v1999_v57 = vshll.u32 %v1799_v58, 16  ;;  %v1800_v3 = vsel %vm3941_vm14, 0, %v1767_v56  ;;  %v1997_v52 = vshrl.u32 %v1799_v58, 16  ;;  %v2025_v63 = vrot.slane %v1799_v58, 1  ;;  %v2009_v13 = vpop.permute.xlu0 %2008 }
 0x211   : > { %v2064_v33 = vshll.u32 %v1800_v3, 16  ;;  %v2006_v0 = vrot.slane %v2004_v8, 1  ;;  %v2062_v61 = vshrl.u32 %v1800_v3, 16  ;;  %v2071_v17 = vrot.slane %v2069_v20, 1 }
 0x212   : > { %2081 = vrot.lane.b32.xlu0 %v1894_v51, %s3253_s16  ;;  %1994 = vrot.lane.b32.xlu1 %v1799_v58, %s3247_s6  ;;  %v2001_v4 = vrot.slane %v1999_v57, 1  ;;  %v2027_v6 = vsel %vm632_vm0, %v2025_v63, %v2026_v25  ;;  %v2090_v26 = vrot.slane %v1800_v3, 1  ;;  %s2755_s6 = sshll.u32 %s3229_s18, 4  ;;  %s2756_s18 = sshll.u32 %s4386_s19, 5 }
 0x213   : > { %v2066_v53 = vrot.slane %v2064_v33, 1  ;;  %p241_p8 = scmp.lt.s32.totalorder %s2755_s6, 31 }
 0x214   : > { %v2002_v12 = vor.u32 %v2001_v4, %v1997_v52  ;;  %v2092_v23 = vsel %vm632_vm0, %v2090_v26, %v2091_v31  ;;  %vm2381_vm0 = vsmask.f32 7440 }
 0x215   : > { %v2067_v21 = vor.u32 %v2066_v53, %v2062_v61  ;;  %s4388_s6 = smov (!%p241_p8, %s2755_s6), 31 }
 0x216   : > { %2057 = vrot.lane.b32.xlu0 %v1799_v58, %s3252_s15  ;;  %2059 = vrot.lane.b32.xlu1 %v1800_v3, %s3252_s15  ;;  %v2007_v5 = vsel %vm461_vm1, %v2002_v12, %v2006_v0 }
 0x217   : > { %v2072_v46 = vsel %vm461_vm1, %v2067_v21, %v2071_v17  ;;  %vm4237_vm1 = vmor %vm2380_vm15, %vm2381_vm0 }
 0x21a   : > { %2042 = vrot.lane.b32.xlu1 %v2027_v6, %s3248_s7  ;;  %2085 = vrot.lane.b32.xlu0 %v2007_v5, %s3253_s16  ;;  %s244_s7 = sadd.s32 %s2756_s18, %s4388_s6 }
 0x21b   : > { %s2757_s19 = sshll.u32 %s244_s7, 3 }
 0x21e   : > { %2105 = vrot.lane.b32.xlu0 %v2027_v6, %s3254_s17  ;;  %2022 = vrot.lane.b32.xlu1 %v2007_v5, %s3251_s14 }
 0x222   : > { %2087 = vrot.lane.b32.xlu1 %v2072_v46, %s3253_s16  ;;  %s4261_s16 = scalar_lea.vmem %s4370_s5, %s2757_s19 }
 0x224   : > { %v2048_v30 = vpop.permute.xlu1 %2047  ;;  %v1985_v34 = vpop.permute.xlu0 %1984 }
 0x226   : > { %2107 = vrot.lane.b32.xlu1 %v2092_v23, %s3254_s17 }
 0x228   : > { %v1983_v22 = vpop.permute.xlu1 %1982  ;;  %v2046_v35 = vpop.permute.xlu0 %2045 }
 0x229   : > { %v2144_v50 = vsel %vm1365_vm5, %v2128_v47, %v1983_v22 }
 0x22c   : > { %v1970_v1 = vpop.permute.xlu1 %1969  ;;  %v1908_v36 = vpop.permute.xlu0 %1907 }
 0x22d   : > { %v2110_v37 = vsel %vm1323_vm3, %v3959_v59, %v1908_v36 }
 0x22e   : > { %v2126_v41 = vsel %vm1344_vm4, %v2110_v37, %v1964_v19 }
 0x22f   : > { %v2142_v48 = vsel %vm1365_vm5, %v2126_v41, %v1981_v29 }
 0x230   : > { %v2031_v14 = vpop.permute.xlu1 %2030  ;;  %v2096_v28 = vpop.permute.xlu0 %2095  ;;  %v2158_v59 = vsel %vm1386_vm6, %v2142_v48, %v2009_v13 }
 0x231   : > { %v2174_v39 = vsel %vm1407_vm7, %v2158_v59, %v2029_v9 }
 0x232   : > { %v2190_v58 = vsel %vm1428_vm8, %v2174_v39, %v2046_v35 }
 0x234   : > { %v2076_v32 = vpop.permute.xlu1 %2075  ;;  %v2033_v18 = vpop.permute.xlu0 %2032 }
 0x238   : > { %v1914_v42 = vpop.permute.xlu1 %1913  ;;  %v2094_v44 = vpop.permute.xlu0 %2093 }
 0x239   : > { %v2116_v53 = vsel %vm1323_vm3, %v3978_v11, %v1914_v42 }
 0x23a   : > { %v2132_v19 = vsel %vm1344_vm4, %v2116_v53, %v1970_v1 }
 0x23c   : > { %v2011_v51 = vpop.permute.xlu1 %2010  ;;  %v1968_v27 = vpop.permute.xlu0 %1967 }
 0x23d   : > { %v2160_v38 = vsel %vm1386_vm6, %v2144_v50, %v2011_v51 }
 0x23e   : > { %v2176_v54 = vsel %vm1407_vm7, %v2160_v38, %v2031_v14 }
 0x23f   : > { %v2192_v43 = vsel %vm1428_vm8, %v2176_v54, %v2048_v30 }
 0x240   : > { %v1912_v55 = vpop.permute.xlu1 %1911  ;;  %v2013_v45 = vpop.permute.xlu0 %2012  ;;  %v2208_v60 = vsel %vm1449_vm9, %v2192_v43, %v2076_v32 }
 0x241   : > { %v2224_v4 = vsel %vm1470_vm10, %v2208_v60, %v2096_v28  ;;  %v2114_v62 = vsel %vm1323_vm3, %v3989_v24, %v1912_v55 }
 0x242   : > { %v2130_v16 = vsel %vm1344_vm4, %v2114_v62, %v1968_v27 }
 0x243   : > { %v2146_v17 = vsel %vm1365_vm5, %v2130_v16, %v1985_v34 }
 0x244   : > { %v2052_v56 = vpop.permute.xlu1 %2051  ;;  %v2074_v29 = vpop.permute.xlu0 %2073  ;;  %v2162_v24 = vsel %vm1386_vm6, %v2146_v17, %v2013_v45 }
 0x245   : > { %v2206_v57 = vsel %vm1449_vm9, %v2190_v58, %v2074_v29  ;;  %v2178_v31 = vsel %vm1407_vm7, %v2162_v24, %v2033_v18 }
 0x246   : > { %v2222_v3 = vsel %vm1470_vm10, %v2206_v57, %v2094_v44 }
 0x247   : > { %3020 = vmatprep.mubr.msk.bf16.mxu1 %vm1518_vm11, %v2222_v3 }
 0x248   : > { %v1987_v52 = vpop.permute.xlu1 %1986  ;;  %3021 = vmatmul.mubr.msk.bf16.vlgmr.msra.gmra.mrb[0].mxu1 %vm1518_vm11, %v2224_v4  ;;  %v1989_v8 = vpop.permute.xlu0 %1988 }
 0x249   : > { %v2148_v61 = vsel %vm1365_vm5, %v2132_v19, %v1987_v52 }
 0x24c   : > { %v1974_v33 = vpop.permute.xlu1 %1973  ;;  %v2050_v9 = vpop.permute.xlu0 %2049 }
 0x24d   : > { %v2194_v30 = vsel %vm1428_vm8, %v2178_v31, %v2050_v9  ;;  %v3183_v31 = vld [vmem:[%s3324_s30 + $0x24] sm:$0xf] }
 0x250   : > { %v2035_v63 = vpop.permute.xlu1 %2034  ;;  %v2100_v12 = vpop.permute.xlu0 %2099 }
 0x254   : > { %v2080_v25 = vpop.permute.xlu1 %2079  ;;  %v2037_v0 = vpop.permute.xlu0 %2036 }
 0x258   : > { %v1918_v6 = vpop.permute.xlu1 %1917  ;;  %v2098_v5 = vpop.permute.xlu0 %2097 }
 0x259   : > { %v2120_v47 = vsel %vm1323_vm3, %v4037_v10, %v1918_v6 }
 0x25a   : > { %v2136_v27 = vsel %vm1344_vm4, %v2120_v47, %v1974_v33 }
 0x25c   : > { %v2015_v20 = vpop.permute.xlu1 %2014  ;;  %v1972_v21 = vpop.permute.xlu0 %1971 }
 0x25d   : > { %v2164_v15 = vsel %vm1386_vm6, %v2148_v61, %v2015_v20 }
 0x25e   : > { %v2180_v13 = vsel %vm1407_vm7, %v2164_v15, %v2035_v63 }
 0x25f   : > { %v2196_v46 = vsel %vm1428_vm8, %v2180_v13, %v2052_v56 }
 0x260   : > { %v1916_v26 = vpop.permute.xlu1 %1915  ;;  %v2017_v11 = vpop.permute.xlu0 %2016  ;;  %v2212_v35 = vsel %vm1449_vm9, %v2196_v46, %v2080_v25 }
 0x261   : > { %v2228_v36 = vsel %vm1470_vm10, %v2212_v35, %v2100_v12  ;;  %v2118_v44 = vsel %vm1323_vm3, %v4046_v2, %v1916_v26 }
 0x262   : > { %v2134_v51 = vsel %vm1344_vm4, %v2118_v44, %v1972_v21 }
 0x263   : > { %v2150_v55 = vsel %vm1365_vm5, %v2134_v51, %v1989_v8 }
 0x264   : > { %v2056_v23 = vpop.permute.xlu1 %2055  ;;  %v2078_v22 = vpop.permute.xlu0 %2077  ;;  %v2166_v2 = vsel %vm1386_vm6, %v2150_v55, %v2017_v11 }
 0x265   : > { %v2210_v34 = vsel %vm1449_vm9, %v2194_v30, %v2078_v22  ;;  %v2182_v29 = vsel %vm1407_vm7, %v2166_v2, %v2037_v0  ;;  %v2408_v30 = vshrl.u32 %v3183_v31, 16  ;;  %v3184_v22 = vld [vmem:[%s3324_s30 + $0x18] sm:$0xf] }
 0x266   : > { %v2226_v1 = vsel %vm1470_vm10, %v2210_v34, %v2098_v5  ;;  %v2384_v35 = vshrl.u32 %v3184_v22, 16  ;;  %v2387_v34 = vshll.u32 %v3184_v22, 16 }
 0x267   : > { %3024 = vmatprep.mubr.msk.bf16.mxu1 %vm1518_vm11, %v2226_v1  ;;  %v3185_v1 = vld [vmem:[%s3324_s30 + $0x28] sm:$0xf] }
 0x268   : > { %v1991_v14 = vpop.permute.xlu1 %1990  ;;  %3025 = vmatmul.mubr.msk.bf16.gmra.mrb[4].mxu1 %vm1518_vm11, %v2228_v36  ;;  %v1993_v28 = vpop.permute.xlu0 %1992  ;;  %v2421_v36 = vshrl.u32 %v3185_v1, 16 }
 0x269   : > { %v2152_v38 = vsel %vm1365_vm5, %v2136_v27, %v1991_v14  ;;  %v2417_v14 = vshll.u32 %v3185_v1, 16 }
 0x26a   : > { %v2423_v47 = vrot.slane %v2421_v36, 4 }
 0x26b   : > { %v2419_v44 = vrot.slane %v2417_v14, 5 }
 0x26c   : > { %v1978_v32 = vpop.permute.xlu1 %1977  ;;  %v2054_v18 = vpop.permute.xlu0 %2053 }
 0x26d   : > { %v2198_v60 = vsel %vm1428_vm8, %v2182_v29, %v2054_v18 }
 0x270   : > { %v2039_v37 = vpop.permute.xlu1 %2038  ;;  %v2104_v40 = vpop.permute.xlu0 %2103 }
 0x274   : > { %v2084_v41 = vpop.permute.xlu1 %2083  ;;  %v2041_v42 = vpop.permute.xlu0 %2040 }
 0x278   : > { %v1922_v48 = vpop.permute.xlu1 %1921  ;;  %v2102_v50 = vpop.permute.xlu0 %2101 }
 0x279   : > { %v2124_v0 = vsel %vm1323_vm3, %v4083_v7, %v1922_v48 }
 0x27a   : > { %v2140_v5 = vsel %vm1344_vm4, %v2124_v0, %v1978_v32 }
 0x27c   : > { %v2019_v54 = vpop.permute.xlu1 %2018  ;;  %v1976_v59 = vpop.permute.xlu0 %1975 }
 0x27d   : > { %v2168_v45 = vsel %vm1386_vm6, %v2152_v38, %v2019_v54  ;;  %v2424_v38 = vor.u32 %v2423_v47, %v2419_v44  ;;  %v3187_v54 = vld [vmem:[%s3324_s30 + $0x2c] sm:$0x1] }
 0x27e   : > { %v2184_v43 = vsel %vm1407_vm7, %v2168_v45, %v2039_v37  ;;  %v2410_v37 = vrot.slane %v2408_v30, 4  ;;  %v3188_v45 = vld [vmem:[%s3324_s30 + $0x20] sm:$0x1] }
 0x27f   : > { %v2200_v56 = vsel %vm1428_vm8, %v2184_v43, %v2056_v23  ;;  %v2411_v23 = vshll.u32 %v3183_v31, 16  ;;  %v2403_v43 = vshll.u32 %v3188_v45, 16 }
 0x280   : > { %v1920_v39 = vpop.permute.xlu1 %1919  ;;  %v2021_v10 = vpop.permute.xlu0 %2020  ;;  %v2216_v4 = vsel %vm1449_vm9, %v2200_v56, %v2084_v41  ;;  %v2386_v41 = vrot.slane %v2384_v35, 4  ;;  %v2425_v56 = vrot.slane %v2424_v38, 4  ;;  %v3194_v38 = vld [vmem:[%s3324_s30 + $0x38] sm:$0x1] }
 0x281   : > { %v2122_v58 = vsel %vm1323_vm3, %v4092_v49, %v1920_v39  ;;  %v2232_v9 = vsel %vm1470_vm10, %v2216_v4, %v2104_v40  ;;  %v2413_v40 = vrot.slane %v2411_v23, 5  ;;  %v4249_v4 = vld [vmem:[%s4369_s4] ss:$0 sm:$0xff] }
 0x282   : > { %v2138_v52 = vsel %vm1344_vm4, %v2122_v58, %v1976_v59  ;;  %v2427_v59 = vshll.u32 %v3187_v54, 16  ;;  %v3191_v23 = vld [vmem:[%s3324_s30 + $0x40] sm:$0xf]  ;;  %v2451_v54 = vshll.u32 %v3194_v38, 16 }
 0x283   : > { %v2154_v49 = vsel %vm1365_vm5, %v2138_v52, %v1993_v28  ;;  %v3186_v28 = vld [vmem:[%s3324_s30 + $0x1c] sm:$0xf]  ;;  %v2414_v51 = vor.u32 %v2413_v40, %v2410_v37  ;;  %v2469_v22 = vshrl.u32 %v3191_v23, 16  ;;  %v2465_v35 = vshll.u32 %v3191_v23, 16 }
 0x284   : > { %v1995_v57 = vpop.permute.xlu1 %1994  ;;  %v2082_v3 = vpop.permute.xlu0 %2081  ;;  %v2170_v25 = vsel %vm1386_vm6, %v2154_v49, %v2021_v10  ;;  %v2397_v32 = vshrl.u32 %v3186_v28, 16  ;;  %v2393_v18 = vshll.u32 %v3186_v28, 16  ;;  %v2429_v58 = vrot.slane %v2427_v59, 5 }
 0x285   : > { %v2214_v8 = vsel %vm1449_vm9, %v2198_v60, %v2082_v3  ;;  %v2186_v6 = vsel %vm1407_vm7, %v2170_v25, %v2041_v42  ;;  %v2156_v19 = vsel %vm1365_vm5, %v2140_v5, %v1995_v57  ;;  %v2389_v42 = vrot.slane %v2387_v34, 5  ;;  %v3192_v34 = vld [vmem:[%s3324_s30 + $0x34] sm:$0xf] }
 0x286   : > { %v2230_v33 = vsel %vm1470_vm10, %v2214_v8, %v2102_v50  ;;  %v2395_v48 = vrot.slane %v2393_v18, 5  ;;  %v2399_v50 = vrot.slane %v2397_v32, 4  ;;  %v2415_v2 = vrot.slane %v2414_v51, 4 }
 0x287   : > { %3028 = vmatprep.mubr.msk.bf16.mxu1 %vm1518_vm11, %v2230_v33  ;;  %v2390_v27 = vor.u32 %v2389_v42, %v2386_v41  ;;  %v2405_v60 = vrot.slane %v2403_v43, 5  ;;  %v2430_v52 = vsel %vm4237_vm1, %v2425_v56, %v2429_v58  ;;  %v2445_v1 = vshrl.u32 %v3192_v34, 16 }
 0x288   : > { %v2060_v63 = vpop.permute.xlu1 %2059  ;;  %3029 = vmatmul.mubr.msk.bf16.gmra.mrb[8].mxu1 %vm1518_vm11, %v2232_v9  ;;  %v2058_v12 = vpop.permute.xlu0 %2057  ;;  %v2400_v55 = vor.u32 %v2399_v50, %v2395_v48  ;;  %v2420_v57 = vsel %vm4237_vm1, %v2415_v2, %v2419_v44  ;;  %v2594_v25 = vunpack.c.l.bf16 %v2430_v52  ;;  %v2441_v36 = vshll.u32 %v3192_v34, 16  ;;  %v3193_v50 = vld [vmem:[%s3324_s30 + $0x44] sm:$0x1] }
 0x289   : > { %v2202_v16 = vsel %vm1428_vm8, %v2186_v6, %v2058_v12  ;;  %v2391_v10 = vrot.slane %v2390_v27, 4  ;;  %v2593_v8 = vunpack.c.l.bf16 %v2420_v57  ;;  %v2467_v37 = vrot.slane %v2465_v35, 5 }
 0x28a   : > { %v2401_v29 = vrot.slane %v2400_v55, 4  ;;  %v2471_v40 = vrot.slane %v2469_v22, 4  ;;  %v2443_v41 = vrot.slane %v2441_v36, 5  ;;  %v2447_v42 = vrot.slane %v2445_v1, 4 }
 0x28b   : > { %v2396_v3 = vsel %vm4237_vm1, %v2391_v10, %v2395_v48  ;;  %v2475_v51 = vshll.u32 %v3193_v50, 16  ;;  %v2453_v10 = vrot.slane %v2451_v54, 5 }
 0x28c   : > { %v2043_v62 = vpop.permute.xlu1 %2042  ;;  %v2086_v53 = vpop.permute.xlu0 %2085  ;;  %v2406_v33 = vsel %vm4237_vm1, %v2401_v29, %v2405_v60  ;;  %v2591_v49 = vunpack.c.l.bf16 %v2396_v3  ;;  %v2472_v48 = vor.u32 %v2471_v40, %v2467_v37  ;;  %v2448_v27 = vor.u32 %v2447_v42, %v2443_v41  ;;  %v3199_v42 = vld [vmem:[%s3324_s30 + $0x5c] sm:$0x1] }
 0x28d   : > { %v2218_v61 = vsel %vm1449_vm9, %v2202_v16, %v2086_v53  ;;  %v2592_v53 = vunpack.c.l.bf16 %v2406_v33  ;;  %v2477_v43 = vrot.slane %v2475_v51, 5 }
 0x28e   : > { %v2473_v45 = vrot.slane %v2472_v48, 4  ;;  %v2449_v2 = vrot.slane %v2448_v27, 4  ;;  %v3200_v48 = vld [vmem:[%s3324_s30 + $0x50] sm:$0x1] }
 0x28f   : > { %v2499_v50 = vshll.u32 %v3200_v48, 16 }
 0x290   : > { %v2023_v20 = vpop.permute.xlu1 %2022  ;;  %v2106_v21 = vpop.permute.xlu0 %2105  ;;  %v2478_v29 = vsel %vm4237_vm1, %v2473_v45, %v2477_v43  ;;  %v2454_v57 = vsel %vm4237_vm1, %v2449_v2, %v2453_v10  ;;  %v3201_v2 = vld [vmem:[%s3324_s30 + $0x6c] sm:$0xf] }
 0x291   : > { %v2172_v17 = vsel %vm1386_vm6, %v2156_v19, %v2023_v20  ;;  %v2234_v7 = vsel %vm1470_vm10, %v2218_v61, %v2106_v21  ;;  %v2552_v10 = vshrl.u32 %v3201_v2, 16 }
 0x292   : > { %v2188_v15 = vsel %vm1407_vm7, %v2172_v17, %v2043_v62  ;;  %3032 = vmatprep.mubr.msk.bf16.mxu1 %vm1518_vm11, %v2234_v7 }
 0x293   : > { %v2204_v24 = vsel %vm1428_vm8, %v2188_v15, %v2060_v63 }
 0x294   : > { %v2088_v13 = vpop.permute.xlu1 %2087 }
 0x295   : > { %v2220_v26 = vsel %vm1449_vm9, %v2204_v24, %v2088_v13  ;;  %v3189_v24 = vld [vmem:[%s3324_s30 + $0x3c] sm:$0xf] }
 0x298   : > { %v2108_v11 = vpop.permute.xlu1 %2107 }
 0x299   : > { %v2236_v46 = vsel %vm1470_vm10, %v2220_v26, %v2108_v11  ;;  %v2456_v26 = vshrl.u32 %v3189_v24, 16  ;;  %v2459_v11 = vshll.u32 %v3189_v24, 16 }
 0x29a   : > { %3033 = vmatmul.mubr.msk.bf16.gmra.mrb[12].mxu1 %vm1518_vm11, %v2236_v46  ;;  %v3190_v46 = vld [vmem:[%s3324_s30 + $0x30] sm:$0xf] }
 0x29b   : > { %v2432_v31 = vshrl.u32 %v3190_v46, 16  ;;  %v2435_v30 = vshll.u32 %v3190_v46, 16  ;;  %v2458_v14 = vrot.slane %v2456_v26, 4  ;;  %v2461_v28 = vrot.slane %v2459_v11, 5  ;;  %v3197_v11 = vld [vmem:[%s3324_s30 + $0x58] sm:$0xf] }
 0x29c   : > { %v2517_v46 = vshrl.u32 %v3197_v11, 16 }
 0x29d   : > { %v2434_v32 = vrot.slane %v2432_v31, 4  ;;  %v2437_v18 = vrot.slane %v2435_v30, 5  ;;  %v2462_v44 = vor.u32 %v2461_v28, %v2458_v14  ;;  %v2513_v31 = vshll.u32 %v3197_v11, 16  ;;  %v3198_v30 = vld [vmem:[%s3324_s30 + $0x4c] sm:$0xf] }
 0x29e   : > { %v2493_v23 = vshrl.u32 %v3198_v30, 16  ;;  %v2489_v22 = vshll.u32 %v3198_v30, 16  ;;  %v2519_v28 = vrot.slane %v2517_v46, 4 }
 0x29f   : > { %v2438_v47 = vor.u32 %v2437_v18, %v2434_v32  ;;  %v2463_v59 = vrot.slane %v2462_v44, 4  ;;  %v2515_v14 = vrot.slane %v2513_v31, 5  ;;  %v2523_v44 = vshll.u32 %v3199_v42, 16 }
 0x2a0   : > { %v2491_v32 = vrot.slane %v2489_v22, 5  ;;  %v2495_v18 = vrot.slane %v2493_v23, 4 }
 0x2a1   : > { %v2439_v55 = vrot.slane %v2438_v47, 4  ;;  %v2468_v56 = vsel %vm4237_vm1, %v2463_v59, %v2467_v37  ;;  %v2525_v54 = vrot.slane %v2523_v44, 5 }
 0x2a2   : > { %v2597_v60 = vunpack.c.l.bf16 %v2468_v56  ;;  %v2496_v47 = vor.u32 %v2495_v18, %v2491_v32  ;;  %v2555_v56 = vshll.u32 %v3201_v2, 16  ;;  %v3205_v18 = vld [vmem:[%s3324_s30 + $0x74] sm:$0x1] }
 0x2a3   : > { %v2444_v58 = vsel %vm4237_vm1, %v2439_v55, %v2443_v41  ;;  %v2520_v41 = vor.u32 %v2519_v28, %v2515_v14  ;;  %v2501_v55 = vrot.slane %v2499_v50, 5 }
 0x2a4   : > { %v2595_v52 = vunpack.c.l.bf16 %v2444_v58  ;;  %v2497_v59 = vrot.slane %v2496_v47, 4 }
 0x2a5   : > { %v2521_v38 = vrot.slane %v2520_v41, 4  ;;  %v3206_v41 = vld [vmem:[%s3324_s30 + $0x68] sm:$0x1] }
 0x2a6   : > { %v2547_v42 = vshll.u32 %v3206_v41, 16 }
 0x2a7   : > { %v2526_v58 = vsel %vm4237_vm1, %v2521_v38, %v2525_v54 }
 0x31b   : > { %v3022_v9 = vpop.f32.mrb[0].mxu1 }
 0x31c   : > { %v2326_v63 = vadd.f32 %v3022_v9, %v4249_v4  ;;  %v2317_v12 = vpop.f32.mrb[1].mxu1  ;;  %v2598_v9 = vunpack.c.l.bf16 %v2478_v29  ;;  %v3202_v29 = vld [vmem:[%s3324_s30 + $0x60] sm:$0xf] }
 0x31d   : > { %v2318_v0 = vadd.f32 %v4249_v4, %v2317_v12  ;;  %v3023_v62 = vpop.f32.mrb[2].mxu1  ;;  %v2596_v12 = vunpack.c.l.bf16 %v2454_v57  ;;  %v2531_v57 = vshll.u32 %v3202_v29, 16 }
 0x31e   : > { %v2609_v6 = vadd.f32 %v2593_v8, %v2326_v63  ;;  %v2329_v5 = vadd.f32 %v3023_v62, %v4249_v4  ;;  %v2320_v16 = vpop.f32.mrb[3].mxu1 }
 0x31f   : > { %v2607_v19 = vadd.f32 %v2591_v49, %v2318_v0  ;;  %v2321_v61 = vadd.f32 %v4249_v4, %v2320_v16 }
 0x320   : > { %v2625_v20 = vmax.f32 %v2609_v6, 0.0  ;;  %v2610_v21 = vadd.f32 %v2594_v25, %v2329_v5 }
 0x321   : > { %v2623_v17 = vmax.f32 %v2607_v19, 0.0  ;;  %v2608_v7 = vadd.f32 %v2592_v53, %v2321_v61 }
 0x322   : > { %2641 = vst.msk [vmem:[%s4261_s16 + $0x10] sm:$0xff] %vm1323_vm3, %v2625_v20  ;;  %v2626_v15 = vmax.f32 %v2610_v21, 0.0 }
 0x323   : > { %2639 = vst.msk [vmem:[%s4261_s16] sm:$0xff] %vm1323_vm3, %v2623_v17  ;;  %v2624_v13 = vmax.f32 %v2608_v7, 0.0  ;;  %v3195_v17 = vld [vmem:[%s3324_s30 + $0x54] sm:$0xf] }
 0x324   : > { %2642 = vst.msk [vmem:[%s4261_s16 + $0x18] sm:$0xff] %vm1323_vm3, %v2626_v15  ;;  %v2504_v7 = vshrl.u32 %v3195_v17, 16  ;;  %v2507_v15 = vshll.u32 %v3195_v17, 16  ;;  %v2533_v17 = vrot.slane %v2531_v57, 5 }
 0x325   : > { %2640 = vst.msk [vmem:[%s4261_s16 + $0x8] sm:$0xff] %vm1323_vm3, %v2624_v13  ;;  %v3196_v13 = vld [vmem:[%s3324_s30 + $0x48] sm:$0xf] }
 0x326   : > { %v2480_v24 = vshrl.u32 %v3196_v13, 16  ;;  %v2483_v26 = vshll.u32 %v3196_v13, 16  ;;  %v2506_v35 = vrot.slane %v2504_v7, 4  ;;  %v2509_v34 = vrot.slane %v2507_v15, 5 }
 0x328   : > { %v2482_v1 = vrot.slane %v2480_v24, 4  ;;  %v2485_v36 = vrot.slane %v2483_v26, 5  ;;  %v2510_v37 = vor.u32 %v2509_v34, %v2506_v35 }
 0x32a   : > { %v2486_v40 = vor.u32 %v2485_v36, %v2482_v1  ;;  %v2511_v51 = vrot.slane %v2510_v37, 4  ;;  %v2571_v37 = vshll.u32 %v3205_v18, 16 }
 0x32c   : > { %v2487_v27 = vrot.slane %v2486_v40, 4  ;;  %v2516_v45 = vsel %vm4237_vm1, %v2511_v51, %v2515_v14  ;;  %v2573_v50 = vrot.slane %v2571_v37, 5 }
 0x32e   : > { %v2492_v43 = vsel %vm4237_vm1, %v2487_v27, %v2491_v32  ;;  %v2549_v27 = vrot.slane %v2547_v42, 5 }
 0x33b   : > { %v3026_v3 = vpop.f32.mrb[4].mxu1 }
 0x33c   : > { %v2342_v8 = vadd.f32 %v3026_v3, %v4249_v4  ;;  %v2333_v33 = vpop.f32.mrb[5].mxu1  ;;  %v2601_v3 = vunpack.c.l.bf16 %v2516_v45 }
 0x33d   : > { %v2334_v49 = vadd.f32 %v4249_v4, %v2333_v33  ;;  %v3027_v63 = vpop.f32.mrb[6].mxu1 }
 0x33e   : > { %v2613_v25 = vadd.f32 %v2597_v60, %v2342_v8  ;;  %v2345_v0 = vadd.f32 %v3027_v63, %v4249_v4  ;;  %v2336_v62 = vpop.f32.mrb[7].mxu1  ;;  %v2528_v60 = vshrl.u32 %v3202_v29, 16  ;;  %v3203_v8 = vld [vmem:[%s3324_s30 + $0x70] sm:$0xf] }
 0x33f   : > { %v2611_v53 = vadd.f32 %v2595_v52, %v2334_v49  ;;  %v2337_v6 = vadd.f32 %v4249_v4, %v2336_v62  ;;  %v2502_v52 = vsel %vm4237_vm1, %v2497_v59, %v2501_v55  ;;  %v2565_v33 = vshrl.u32 %v3203_v8, 16 }
 0x340   : > { %v2629_v5 = vmax.f32 %v2613_v25, 0.0  ;;  %v2614_v16 = vadd.f32 %v2598_v9, %v2345_v0  ;;  %v2599_v49 = vunpack.c.l.bf16 %v2492_v43  ;;  %v2561_v63 = vshll.u32 %v3203_v8, 16 }
 0x341   : > { %v2627_v19 = vmax.f32 %v2611_v53, 0.0  ;;  %v2612_v61 = vadd.f32 %v2596_v12, %v2337_v6  ;;  %v3204_v12 = vld [vmem:[%s3324_s30 + $0x64] sm:$0xf]  ;;  %v2602_v53 = vunpack.c.l.bf16 %v2526_v58  ;;  %v2567_v46 = vrot.slane %v2565_v33, 4 }
 0x342   : > { %2645 = vst.msk [vmem:[%s4261_s16 + $0x30] sm:$0xff] %vm1323_vm3, %v2629_v5  ;;  %v2630_v20 = vmax.f32 %v2614_v16, 0.0  ;;  %v2541_v25 = vshrl.u32 %v3204_v12, 16  ;;  %v2537_v6 = vshll.u32 %v3204_v12, 16  ;;  %v2554_v5 = vrot.slane %v2552_v10, 4 }
 0x343   : > { %2643 = vst.msk [vmem:[%s4261_s16 + $0x20] sm:$0xff] %vm1323_vm3, %v2627_v19  ;;  %v2628_v21 = vmax.f32 %v2612_v61, 0.0  ;;  %v2557_v16 = vrot.slane %v2555_v56, 5  ;;  %v2563_v11 = vrot.slane %v2561_v63, 5 }
 0x344   : > { %2646 = vst.msk [vmem:[%s4261_s16 + $0x38] sm:$0xff] %vm1323_vm3, %v2630_v20  ;;  %v2600_v20 = vunpack.c.l.bf16 %v2502_v52  ;;  %v2539_v23 = vrot.slane %v2537_v6, 5  ;;  %v2543_v22 = vrot.slane %v2541_v25, 4 }
 0x345   : > { %2644 = vst.msk [vmem:[%s4261_s16 + $0x28] sm:$0xff] %vm1323_vm3, %v2628_v21  ;;  %v2530_v21 = vrot.slane %v2528_v60, 4  ;;  %v2558_v1 = vor.u32 %v2557_v16, %v2554_v5  ;;  %v2568_v32 = vor.u32 %v2567_v46, %v2563_v11 }
 0x346   : > { %v2544_v40 = vor.u32 %v2543_v22, %v2539_v23 }
 0x347   : > { %v2534_v14 = vor.u32 %v2533_v17, %v2530_v21  ;;  %v2559_v44 = vrot.slane %v2558_v1, 4  ;;  %v2569_v48 = vrot.slane %v2568_v32, 4 }
 0x348   : > { %v2545_v51 = vrot.slane %v2544_v40, 4 }
 0x349   : > { %v2535_v47 = vrot.slane %v2534_v14, 4  ;;  %v2564_v38 = vsel %vm4237_vm1, %v2559_v44, %v2563_v11  ;;  %v2574_v59 = vsel %vm4237_vm1, %v2569_v48, %v2573_v50 }
 0x34a   : > { %v2605_v55 = vunpack.c.l.bf16 %v2564_v38  ;;  %v2550_v45 = vsel %vm4237_vm1, %v2545_v51, %v2549_v27  ;;  %v2606_v58 = vunpack.c.l.bf16 %v2574_v59 }
 0x34b   : > { %v2540_v54 = vsel %vm4237_vm1, %v2535_v47, %v2539_v23  ;;  %v2604_v57 = vunpack.c.l.bf16 %v2550_v45 }
 0x34c   : > { %v2603_v2 = vunpack.c.l.bf16 %v2540_v54 }
 0x35b   : > { %v3030_v9 = vpop.f32.mrb[8].mxu1 }
 0x35c   : > { %v2358_v0 = vadd.f32 %v3030_v9, %v4249_v4  ;;  %v2349_v62 = vpop.f32.mrb[9].mxu1 }
 0x35d   : > { %v2350_v19 = vadd.f32 %v4249_v4, %v2349_v62  ;;  %v3031_v61 = vpop.f32.mrb[10].mxu1 }
 0x35e   : > { %v2617_v7 = vadd.f32 %v2601_v3, %v2358_v0  ;;  %v2361_v15 = vadd.f32 %v3031_v61, %v4249_v4  ;;  %v2352_v13 = vpop.f32.mrb[11].mxu1 }
 0x35f   : > { %v2615_v24 = vadd.f32 %v2599_v49, %v2350_v19  ;;  %v2353_v26 = vadd.f32 %v4249_v4, %v2352_v13 }
 0x360   : > { %v2633_v31 = vmax.f32 %v2617_v7, 0.0  ;;  %v2618_v30 = vadd.f32 %v2602_v53, %v2361_v15 }
 0x361   : > { %v2631_v35 = vmax.f32 %v2615_v24, 0.0  ;;  %v2616_v34 = vadd.f32 %v2600_v20, %v2353_v26 }
 0x362   : > { %2649 = vst.msk [vmem:[%s4261_s16 + $0x50] sm:$0xff] %vm1323_vm3, %v2633_v31  ;;  %v2634_v36 = vmax.f32 %v2618_v30, 0.0 }
 0x363   : > { %2647 = vst.msk [vmem:[%s4261_s16 + $0x40] sm:$0xff] %vm1323_vm3, %v2631_v35  ;;  %v2632_v28 = vmax.f32 %v2616_v34, 0.0 }
 0x364   : > { %2650 = vst.msk [vmem:[%s4261_s16 + $0x58] sm:$0xff] %vm1323_vm3, %v2634_v36 }
 0x365   : > { %2648 = vst.msk [vmem:[%s4261_s16 + $0x48] sm:$0xff] %vm1323_vm3, %v2632_v28 }
 0x36d   : > { %v3034_v43 = vpop.f32.mrb[12].mxu1 }
 0x36e   : > { %v2374_v10 = vadd.f32 %v3034_v43, %v4249_v4  ;;  %v2365_v56 = vpop.f32.mrb[13].mxu1 }
 0x36f   : > { %v2366_v29 = vadd.f32 %v4249_v4, %v2365_v56  ;;  %v3035_v60 = vpop.f32.mrb[14].mxu1 }
 0x370   : > { %v2621_v3 = vadd.f32 %v2605_v55, %v2374_v10  ;;  %v2377_v52 = vadd.f32 %v3035_v60, %v4249_v4  ;;  %v2368_v8 = vpop.f32.mrb[15].mxu1 }
 0x371   : > { %v2619_v39 = vadd.f32 %v2603_v2, %v2366_v29  ;;  %v2369_v33 = vadd.f32 %v4249_v4, %v2368_v8 }
 0x372   : > { %v2637_v9 = vmax.f32 %v2621_v3, 0.0  ;;  %v2622_v49 = vadd.f32 %v2606_v58, %v2377_v52 }
 0x373   : > { %v2635_v63 = vmax.f32 %v2619_v39, 0.0  ;;  %v2620_v12 = vadd.f32 %v2604_v57, %v2369_v33 }
 0x374   : > { %2653 = vst.msk [vmem:[%s4261_s16 + $0x70] sm:$0xff] %vm1323_vm3, %v2637_v9  ;;  %v2638_v25 = vmax.f32 %v2622_v49, 0.0 }
 0x375   : > { %2651 = vst.msk [vmem:[%s4261_s16 + $0x60] sm:$0xff] %vm1323_vm3, %v2635_v63  ;;  %v2636_v0 = vmax.f32 %v2620_v12, 0.0 }
 0x376   : > { %2654 = vst.msk [vmem:[%s4261_s16 + $0x78] sm:$0xff] %vm1323_vm3, %v2638_v25 }
 0x377   : > { %2652 = vst.msk [vmem:[%s4261_s16 + $0x68] sm:$0xff] %vm1323_vm3, %v2636_v0 }
 0x378 PF: > { %s15_s22 = sadd.s32 1, %s3245_s22   ;;  %s4375_s18 = smov %s3237_s20 }
 0x379   : > { %p12_p9 = scmp.ge.s32.totalorder %s15_s22, 6   ;;  %s4376_s19 = smov %s3241_s21 }
 0x37a   : > { %s4377_s20 = smov %s4380_s23  ;;  %s4378_s21 = smov %s4384_s24 }
 0x37b   :  { %14 = sbr.rel (!%p12_p9) target bundleno = 3 (0x3), region = 73 }

// kernel: tpu_custom_call.1
= control target key start
LH: loop header
LB: loop body
LE: loop exit
PB: predicated region body
PF: predicated region fallthrough
CT: control target
= control target key end

     0   :  { %s3285_s18 = smov 0   ;;  %s3287_s19 = smov 0   ;;  %s4365_s0 = inlined_call_operand.vmem [shape: bf16[2,1,20,18,4], index: 0, kind: input, shape index: {}]   ;;  %s4366_s1 = inlined_call_operand.vmem [shape: bf16[36,4], index: 1, kind: input, shape index: {}]   ;;  %s4367_s2 = inlined_call_operand.vmem [shape: f32[1,4], index: 2, kind: input, shape index: {}]   ;;  %s4368_s3 = inlined_call_operand.vmem [shape: bf16[36,4], index: 3, kind: input, shape index: {}]   ;;  %s4369_s4 = inlined_call_operand.vmem [shape: f32[1,4], index: 4, kind: input, shape index: {}]   ;;  %s4370_s5 = inlined_call_operand.vmem [shape: f32[2,256,4], index: 5, kind: output, shape index: {}]  }
   0x1   :  { %s3289_s20 = smov 0   ;;  %s3291_s21 = smov 0  }
   0x2   :  { %s3293_s22 = smov 0  }
   0x3 LB: > { %s24_s23 = sadd.s32 1, %s3237_s20  ;;  %s27_s24 = sadd.s32 1, %s3241_s21  ;;  %s3245_s22 = sphi %s3293_s22, %s15_s22   ;;  %s3241_s21 = sphi %s3291_s21, %s4378_s21   ;;  %s3237_s20 = sphi %s3289_s20, %s4377_s20   ;;  %s3233_s19 = sphi %s3287_s19, %s4376_s19   ;;  %s3229_s18 = sphi %s3285_s18, %s4375_s18  }
   0x4   : > { %p25_p0 = scmp.ge.s32.totalorder %s24_s23, 2  ;;  %p2753_p1 = scmp.ge.s32.totalorder %s3245_s22, 1 }
   0x5   : > { %p201_p2 = scmp.lt.s32.totalorder %s3245_s22, 5 }
   0x6   : > { %s4380_s23 = smov (%p25_p0, %s24_s23), 0  ;;  %s4382_s24 = smov (!%p25_p0, %s27_s24), %s3241_s21 }
   0x7   : > { %p202_p3 = pnand %p2753_p1, %p201_p2  ;;  %p29_p4 = scmp.ge.s32.totalorder %s4382_s24, 2 }
   0x8   : > { %p233_p5 = scmp.lt.s32.totalorder (!%p202_p3), %s3233_s19, 1  ;;  %s2963_s25 = smul.u32 (!%p202_p3), 96, %s3229_s18  ;;  %vm632_vm0 = vcmask (!%p202_p3), 1046528   ;;  %vm461_vm1 = vsmask.f32 (!%p202_p3), 7424  ;;  %v3165_v61 = vld [vmem:[%s4366_s1] sm:$0xff] (!%p202_p3)  }
   0x9   : > { %s4384_s24 = smov (%p29_p4, %s4382_s24), 0  ;;  %205 = sbr.rel (%p202_p3) target bundleno = 888 (0x378), region = 40 }
   0xa   : > { %s3247_s6 = smov (!%p202_p3), 12   ;;  %s3248_s7 = smov (!%p202_p3), 20   ;;  %2988 = vmatprep.subr.bf16.mxu0 (!%p202_p3), %v3165_v61  ;;  %vm1539_vm2 = vcmask (!%p202_p3), 1041408   ;;  %vm1323_vm3 = vcmask (!%p202_p3), 31744   ;;  %vm1344_vm4 = vcmask (!%p202_p3), 64512   ;;  %vm1365_vm5 = vcmask (!%p202_p3), 97280  }
   0xb   : > { %s3249_s8 = smov (!%p202_p3), 8   ;;  %s3250_s11 = smov (!%p202_p3), 4   ;;  %2989 = vmatpush3.bf16.msra.mxu0 (!%p202_p3), %v3165_v61  ;;  %vm1386_vm6 = vcmask (!%p202_p3), 130048   ;;  %vm1407_vm7 = vcmask (!%p202_p3), 162816   ;;  %vm1428_vm8 = vcmask (!%p202_p3), 195584   ;;  %vm1449_vm9 = vcmask (!%p202_p3), 228352  }
   0xc   : > { %s3251_s14 = smov (!%p202_p3), 16   ;;  %s3252_s15 = smov (!%p202_p3), 24   ;;  %vm1470_vm10 = vcmask (!%p202_p3), 261120   ;;  %vm1518_vm11 = vcmask (!%p202_p3), 293888   ;;  %vm1788_vm12 = vcmask (!%p202_p3), 1040384  }
   0xd   : > { %s3253_s16 = smov (!%p202_p3), 28   ;;  %s3254_s17 = smov (!%p202_p3), 32   ;;  %vm1789_vm13 = vsmask.f32 (!%p202_p3), 256  ;;  %vm2380_vm15 = vsmask.f32 (!%p202_p3), 3328 }
   0xe   : > { %p1676_p6 = scmp.gt.s32.totalorder (!%p202_p3), %s3229_s18, 0  ;;  %vm3941_vm14 = vmand (!%p202_p3), %vm1788_vm12, %vm1789_vm13  ;;  %p1679_p7 = scmp.lt.s32.totalorder (!%p202_p3), %s3229_s18, 1 }
  0x10   : > { %s4386_s19 = smov (!%p233_p5, %s3233_s19), 1 }
  0x11   : > { %s3038_s26 = smul.u32 240, %s4386_s19 }
  0x12   : > { %s1677_s27 = scalar_select %p1676_p6, 1, 0 }
  0x13   : > { %s237_s29 = scalar_lea.vmem %s4365_s0, %s3038_s26 }
  0x14   : > { %s3324_s30 = scalar_lea.vmem %s237_s29, %s2963_s25  ;;  %s1678_s9 = scvt.s32.f32 %s1677_s27 }
  0x15   : > { %v2765_v0 = vld [vmem:[%s3324_s30 + $0x18] sm:$0xf]  ;;  %v2766_v1 = vld [vmem:[%s3324_s30 + $0x1c] sm:$0xf]  ;;  %v2763_v2 = vld [vmem:[%s3324_s30 + $0xc] sm:$0xf] }
  0x16   : > { %v3329_v3 = vcombine.low %v2765_v0, %v2766_v1  ;;  %v2764_v4 = vld [vmem:[%s3324_s30 + $0x10] sm:$0xf]  ;;  %v2793_v5 = vld [vmem:[%s3324_s30 + $0xc] sm:$0xe]  ;;  %v254_v7 = vld [vmem:[%s3324_s30 + $0x4] sm:$0xf] }
  0x17   : > { %v3333_v6 = vcombine.low %v2763_v2, %v2764_v4  ;;  %v2895_v9 = vcombine.low %v2793_v5, %v2764_v4  ;;  %v3340_v10 = vld [vmem:[%s3324_s30 + $0x14] ss:$0 sps:$4 sm:$0x11]   ;;  %v283_v12 = vld [vmem:[%s3324_s30] sm:$0xe] }
  0x18   : > { %735 = vrot.lane.b32.xlu1 %v3329_v3, %s3247_s6  ;;  %v798_v8 = vshll.u32 %v3329_v3, 16  ;;  %v796_v13 = vshrl.u32 %v3329_v3, 16  ;;  %v954_v15 = vrot.slane %v3340_v10, 1  ;;  %v3091_v16 = vld [vmem:[%s3324_s30 + $0x8] ss:$0 sps:$4 sm:$0x11]   ;;  %v2865_v17 = vcombine.low %v283_v12, %v254_v7 }
  0x19   : > { %733 = vrot.lane.b32.xlu0 %v3333_v6, %s3247_s6  ;;  %v786_v11 = vshll.u32 %v3333_v6, 16  ;;  %v953_v14 = vrot.slane %v2895_v9, 1  ;;  %v253_v19 = vld [vmem:[%s3324_s30] sm:$0xf]  ;;  %v255_v20 = vld [vmem:[%s3324_s30 + $0xc] sm:$0xf] }
  0x1a   : > { %v800_v18 = vrot.slane %v798_v8, 1  ;;  %v256_v21 = vld [vmem:[%s3324_s30 + $0x10] sm:$0xf]  ;;  %v633_v23 = vrot.slane %v2865_v17, 1  ;;  %v634_v24 = vrot.slane %v3091_v16, 1  ;;  %v3353_v25 = vcombine.low %v253_v19, %v254_v7 }
  0x1b   : > { %v955_v22 = vsel %vm632_vm0, %v953_v14, %v954_v15  ;;  %v284_v26 = vld [vmem:[%s3324_s30 + $0xc] sm:$0xe]  ;;  %v3357_v27 = vcombine.low %v255_v20, %v256_v21  ;;  %v3095_v28 = vld [vmem:[%s3324_s30 + $0x14] ss:$0 sps:$4 sm:$0x11]   ;;  %v470_v30 = vshll.u32 %v3091_v16, 16 }
  0x1c   : > { %v2866_v29 = vcombine.low %v284_v26, %v256_v21  ;;  %v2784_v31 = vld [vmem:[%s3324_s30 + $0x20] sm:$0x1]  ;;  %v635_v32 = vsel %vm632_vm0, %v633_v23, %v634_v24  ;;  %v463_v33 = vshrl.u32 %v3353_v25, 16  ;;  %v465_v34 = vshll.u32 %v3353_v25, 16  ;;  %v2794_v35 = vld [vmem:[%s3324_s30 + $0x18] sm:$0xe] }
  0x1d   : > { %983 = vrot.lane.b32.xlu0 %v955_v22, %s3248_s7  ;;  %v2886_v36 = vcombine.low %v2784_v31, %v2784_v31  ;;  %663 = vrot.lane.b32.xlu1 %v635_v32, %s3249_s8  ;;  %v637_v38 = vrot.slane %v3095_v28, 1  ;;  %v472_v39 = vrot.slane %v470_v30, 1  ;;  %v2896_v40 = vcombine.low %v2794_v35, %v2766_v1  ;;  %v2807_v41 = vld [vmem:[%s3324_s30 + $0x24] sm:$0xf]  ;;  %v3370_v46 = vld [vmem:[%s3324_s30 + $0x28] sm:$0xf] }
  0x1e   : > { %v636_v37 = vrot.slane %v2866_v29, 1  ;;  %v467_v42 = vrot.slane %v465_v34, 1  ;;  %v475_v44 = vshrl.u32 %v3357_v27, 16  ;;  %v477_v45 = vshll.u32 %v3357_v27, 16  ;;  %v2805_v51 = vld [vmem:[%s3324_s30 + $0x18] sm:$0xf] }
  0x1f   : > { %v957_v43 = vrot.slane %v2886_v36, 1  ;;  %v956_v48 = vrot.slane %v2896_v40, 1  ;;  %v482_v49 = vshll.u32 %v3095_v28, 16  ;;  %v803_v50 = vshll.u32 %v2886_v36, 16  ;;  %v3376_v56 = vld [vmem:[%s3324_s30 + $0x1c] sm:$0xf] }
  0x20   : > { %v638_v47 = vsel %vm632_vm0, %v636_v37, %v637_v38  ;;  %v468_v52 = vor.u32 %v467_v42, %v463_v33  ;;  %v479_v53 = vrot.slane %v477_v45, 1  ;;  %v784_v54 = vshrl.u32 %v3333_v6, 16  ;;  %v3387_v2 = vld [vmem:[%s3324_s30 + $0x2c] ss:$0 sps:$4 sm:$0x11]  }
  0x21   : > { %v788_v55 = vrot.slane %v786_v11, 1  ;;  %665 = vrot.lane.b32.xlu1 %v638_v47, %s3249_s8  ;;  %v958_v57 = vsel %vm632_vm0, %v956_v48, %v957_v43  ;;  %v484_v58 = vrot.slane %v482_v49, 1  ;;  %v801_v59 = vor.u32 %v800_v18, %v796_v13  ;;  %v3392_v6 = vld [vmem:[%s3324_s30 + $0x20] ss:$0 sps:$4 sm:$0x11]   ;;  %v3169_v14 = vld [vmem:[%s4366_s1 + $0x8] sm:$0xff]  }
  0x22   : > { %v791_v60 = vshll.u32 %v3340_v10, 16  ;;  %v473_v62 = vsel %vm461_vm1, %v468_v52, %v472_v39  ;;  %v480_v63 = vor.u32 %v479_v53, %v475_v44  ;;  %v805_v0 = vrot.slane %v803_v50, 1  ;;  %v257_v9 = vld [vmem:[%s3324_s30 + $0x18] sm:$0xf]  ;;  %v3397_v10 = vld [vmem:[%s3324_s30 + $0x1c] sm:$0xf]  ;;  %2990 = vmatprep.subr.bf16.mxu0 %v3169_v14 }
  0x23   : > { %v2906_v1 = vcombine.low %v2807_v41, %v3370_v46  ;;  %582 = vrot.lane.b32.xlu0 %v473_v62, %s3250_s11  ;;  %v789_v3 = vor.u32 %v788_v55, %v784_v54  ;;  %v2905_v5 = vcombine.low %v2805_v51, %v3376_v56  ;;  %v1123_v13 = vshll.u32 %v3387_v2, 16  ;;  %v3409_v18 = vld [vmem:[%s3324_s30 + $0x20] ss:$0 sps:$4 sm:$0x11]   ;;  %v259_v20 = vld [vmem:[%s3324_s30 + $0x24] sm:$0xf]  ;;  %2991 = vmatpush3.bf16.msra.mxu0 %v3169_v14 }
  0x24   : > { %v793_v4 = vrot.slane %v791_v60, 1  ;;  %v485_v7 = vsel %vm461_vm1, %v480_v63, %v484_v58  ;;  %v806_v15 = vsel %vm461_vm1, %v801_v59, %v805_v0  ;;  %v3406_v17 = vcombine.low %v257_v9, %v3397_v10  ;;  %v260_v26 = vld [vmem:[%s3324_s30 + $0x28] sm:$0xf]  ;;  %v2835_v28 = vld [vmem:[%s3324_s30 + $0x18] sm:$0xe] }
  0x25   : > { %v1118_v8 = vshll.u32 %v2906_v1, 16  ;;  %985 = vrot.lane.b32.xlu1 %v958_v57, %s3248_s7  ;;  %v1106_v11 = vshll.u32 %v2905_v5, 16  ;;  %v1116_v12 = vshrl.u32 %v2906_v1, 16  ;;  %v1104_v21 = vshrl.u32 %v2905_v5, 16  ;;  %v2836_v37 = vld [vmem:[%s3324_s30 + $0x24] sm:$0xe] }
  0x26   : > { %v794_v19 = vsel %vm461_vm1, %v789_v3, %v793_v4  ;;  %v1111_v23 = vshll.u32 %v3392_v6, 16  ;;  %v489_v24 = vshll.u32 %v3406_v17, 16  ;;  %v1125_v30 = vrot.slane %v1123_v13, 1  ;;  %v3108_v35 = vld [vmem:[%s3324_s30 + $0x2c] ss:$0 sps:$4 sm:$0x11]  }
  0x27   : > { %v1120_v16 = vrot.slane %v1118_v8, 1  ;;  %584 = vrot.lane.b32.xlu0 %v485_v7, %s3250_s11  ;;  %v1108_v22 = vrot.slane %v1106_v11, 1  ;;  %v494_v31 = vshll.u32 %v3409_v18, 16  ;;  %v3420_v32 = vcombine.low %v259_v20, %v260_v26  ;;  %v286_v48 = vld [vmem:[%s3324_s30 + $0x24] sm:$0xe] }
  0x28   : > { %v487_v33 = vshrl.u32 %v3406_v17, 16  ;;  %v491_v34 = vrot.slane %v489_v24, 1  ;;  %v2925_v38 = vcombine.low %v2835_v28, %v3376_v56  ;;  %v1113_v40 = vrot.slane %v1111_v23, 1  ;;  %v2769_v50 = vld [vmem:[%s3324_s30 + $0x30] sm:$0xf] }
  0x29   : > { %905 = vrot.lane.b32.xlu1 %v806_v15, %s3251_s14  ;;  %v1121_v29 = vor.u32 %v1120_v16, %v1116_v12  ;;  %v501_v36 = vshll.u32 %v3420_v32, 16  ;;  %v1109_v39 = vor.u32 %v1108_v22, %v1104_v21  ;;  %v496_v42 = vrot.slane %v494_v31, 1  ;;  %v3436_v51 = vld [vmem:[%s3324_s30 + $0x34] sm:$0xf]  ;;  %v285_v56 = vld [vmem:[%s3324_s30 + $0x18] sm:$0xe] }
  0x2a   : > { %v492_v43 = vor.u32 %v491_v34, %v487_v33  ;;  %v499_v44 = vshrl.u32 %v3420_v32, 16  ;;  %v506_v47 = vshll.u32 %v3108_v35, 16  ;;  %v2926_v49 = vcombine.low %v2836_v37, %v3370_v46  ;;  %v2767_v57 = vld [vmem:[%s3324_s30 + $0x24] sm:$0xf]  ;;  %v2768_v58 = vld [vmem:[%s3324_s30 + $0x28] sm:$0xf] }
  0x2b   : > { %903 = vrot.lane.b32.xlu0 %v794_v19, %s3251_s14  ;;  %v1126_v41 = vsel %vm461_vm1, %v1121_v29, %v1125_v30  ;;  %v503_v45 = vrot.slane %v501_v36, 1  ;;  %v1114_v52 = vsel %vm461_vm1, %v1109_v39, %v1113_v40  ;;  %v1273_v53 = vrot.slane %v2925_v38, 1  ;;  %v2786_v0 = vld [vmem:[%s3324_s30 + $0x38] sm:$0x1]  ;;  %v2796_v21 = vld [vmem:[%s3324_s30 + $0x30] sm:$0xe] }
  0x2c   : > { %v1274_v54 = vrot.slane %v3392_v6, 1  ;;  %v2868_v55 = vcombine.low %v286_v48, %v260_v26  ;;  %v497_v46 = vsel %vm461_vm1, %v492_v43, %v496_v42  ;;  %v508_v60 = vrot.slane %v506_v47, 1  ;;  %v2785_v6 = vld [vmem:[%s3324_s30 + $0x2c] sm:$0x1]  ;;  %v2811_v22 = vld [vmem:[%s3324_s30 + $0x3c] sm:$0xf] }
  0x2d   : > { %1055 = vrot.lane.b32.xlu1 %v2906_v1, %s3252_s15  ;;  %v504_v59 = vor.u32 %v503_v45, %v499_v44  ;;  %v2878_v61 = vcombine.low %v2769_v50, %v3436_v51  ;;  %v1276_v62 = vrot.slane %v2926_v49, 1  ;;  %v1277_v63 = vrot.slane %v3387_v2, 1  ;;  %v3463_v23 = vld [vmem:[%s3324_s30 + $0x40] sm:$0xf]  ;;  %v2795_v29 = vld [vmem:[%s3324_s30 + $0x24] sm:$0xe] }
  0x2e   : > { %v1275_v1 = vsel %vm632_vm0, %v1273_v53, %v1274_v54  ;;  %v2867_v3 = vcombine.low %v285_v56, %v3397_v10  ;;  %v2877_v4 = vcombine.low %v2767_v57, %v2768_v58  ;;  %v642_v8 = vrot.slane %v2868_v55, 1  ;;  %v2809_v31 = vld [vmem:[%s3324_s30 + $0x30] sm:$0xf]  ;;  %v3471_v33 = vld [vmem:[%s3324_s30 + $0x34] sm:$0xf] }
  0x2f   : > { %1053 = vrot.lane.b32.xlu0 %v2905_v5, %s3252_s15  ;;  %v643_v5 = vrot.slane %v3108_v35, 1  ;;  %v509_v7 = vsel %vm461_vm1, %v504_v59, %v508_v60  ;;  %v822_v9 = vshll.u32 %v2878_v61, 16  ;;  %v2888_v11 = vcombine.low %v2786_v0, %v2786_v0  ;;  %v261_v38 = vld [vmem:[%s3324_s30 + $0x30] sm:$0xf]  ;;  %v3477_v39 = vld [vmem:[%s3324_s30 + $0x34] sm:$0xf] }
  0x30   : > { %v1278_v2 = vsel %vm632_vm0, %v1276_v62, %v1277_v63  ;;  %v639_v12 = vrot.slane %v2867_v3, 1  ;;  %v640_v10 = vrot.slane %v3409_v18, 1  ;;  %v810_v13 = vshll.u32 %v2877_v4, 16  ;;  %v3481_v43 = vld [vmem:[%s3324_s30 + $0x44] ss:$0 sps:$4 sm:$0x11]  }
  0x31   : > { %1225 = vrot.lane.b32.xlu1 %v1126_v41, %s3253_s16  ;;  %v2887_v14 = vcombine.low %v2785_v6, %v2785_v6  ;;  %v644_v15 = vsel %vm632_vm0, %v642_v8, %v643_v5  ;;  %v820_v16 = vshrl.u32 %v2878_v61, 16  ;;  %v824_v19 = vrot.slane %v822_v9, 1  ;;  %v3491_v53 = vld [vmem:[%s3324_s30 + $0x40] sm:$0xf]  ;;  %v2837_v0 = vld [vmem:[%s3324_s30 + $0x30] sm:$0xe] }
  0x32   : > { %v827_v20 = vshll.u32 %v2888_v11, 16  ;;  %v641_v18 = vsel %vm632_vm0, %v639_v12, %v640_v10  ;;  %v808_v24 = vshrl.u32 %v2877_v4, 16  ;;  %v812_v26 = vrot.slane %v810_v13, 1  ;;  %v3122_v57 = vld [vmem:[%s3324_s30 + $0x38] ss:$0 sps:$4 sm:$0x11]  }
  0x33   : > { %1223 = vrot.lane.b32.xlu0 %v1114_v52, %s3253_s16  ;;  %v815_v28 = vshll.u32 %v2887_v14, 16  ;;  %v2898_v30 = vcombine.low %v2796_v21, %v3436_v51  ;;  %v825_v34 = vor.u32 %v824_v19, %v820_v16  ;;  %v2908_v36 = vcombine.low %v2811_v22, %v3463_v23  ;;  %v263_v52 = vld [vmem:[%s3324_s30 + $0x3c] sm:$0xf]  ;;  %s1680_s28 = scalar_select %p1679_p7, 1, 0 }
  0x34   : > { %v829_v35 = vrot.slane %v827_v20, 1  ;;  %v2897_v37 = vcombine.low %v2795_v29, %v2768_v58  ;;  %v813_v40 = vor.u32 %v812_v26, %v808_v24  ;;  %v2907_v42 = vcombine.low %v2809_v31, %v3471_v33  ;;  %v2838_v12 = vld [vmem:[%s3324_s30 + $0x3c] sm:$0xe]  ;;  %v2773_v26 = vld [vmem:[%s3324_s30 + $0x48] sm:$0xf] }
  0x35   : > { %586 = vrot.lane.b32.xlu1 %v497_v46, %s3250_s11  ;;  %v817_v41 = vrot.slane %v815_v28, 1  ;;  %v962_v44 = vrot.slane %v2898_v30, 1  ;;  %v963_v45 = vrot.slane %v2888_v11, 1  ;;  %v1142_v48 = vshll.u32 %v2908_v36, 16  ;;  %v288_v24 = vld [vmem:[%s3324_s30 + $0x3c] sm:$0xe]  ;;  %s1681_s29 = scvt.s32.f32 %s1680_s28 }
  0x36   : > { %v830_v47 = vsel %vm461_vm1, %v825_v34, %v829_v35  ;;  %v3486_v49 = vcombine.low %v261_v38, %v3477_v39  ;;  %v959_v50 = vrot.slane %v2897_v37, 1  ;;  %v960_v51 = vrot.slane %v2887_v14, 1  ;;  %v3499_v46 = vld [vmem:[%s3324_s30 + $0x38] ss:$0 sps:$4 sm:$0x11]  }
  0x37   : > { %1303 = vrot.lane.b32.xlu0 %v1275_v1, %s3254_s17  ;;  %v818_v54 = vsel %vm461_vm1, %v813_v40, %v817_v41  ;;  %v1130_v55 = vshll.u32 %v2907_v42, 16  ;;  %v1147_v56 = vshll.u32 %v3481_v43, 16  ;;  %v964_v58 = vsel %vm632_vm0, %v962_v44, %v963_v45  ;;  %v2774_v28 = vld [vmem:[%s3324_s30 + $0x4c] sm:$0xf]  ;;  %v2771_v35 = vld [vmem:[%s3324_s30 + $0x3c] sm:$0xf] }
  0x38   : > { %v1140_v59 = vshrl.u32 %v2908_v36, 16  ;;  %v1144_v60 = vrot.slane %v1142_v48, 1  ;;  %v3503_v62 = vcombine.low %v263_v52, %v3491_v53  ;;  %v961_v63 = vsel %vm632_vm0, %v959_v50, %v960_v51  ;;  %v2787_v51 = vld [vmem:[%s3324_s30 + $0x44] sm:$0x1] }
  0x39   : > { %588 = vrot.lane.b32.xlu1 %v509_v7, %s3250_s11  ;;  %v1149_v1 = vrot.slane %v1147_v56, 1  ;;  %v1128_v3 = vshrl.u32 %v2907_v42, 16  ;;  %v1135_v5 = vshll.u32 %v3122_v57, 16  ;;  %v518_v6 = vshll.u32 %v3499_v46, 16 }
  0x3a   : > { %v3126_v7 = vld [vmem:[%s3324_s30 + $0x44] ss:$0 sps:$4 sm:$0x11]   ;;  %v1145_v8 = vor.u32 %v1144_v60, %v1140_v59  ;;  %v511_v9 = vshrl.u32 %v3486_v49, 16  ;;  %v2927_v10 = vcombine.low %v2837_v0, %v3471_v33  ;;  %v523_v21 = vshrl.u32 %v3503_v62, 16 }
  0x3b   : > { %1305 = vrot.lane.b32.xlu0 %v1278_v2, %s3254_s17  ;;  %v525_v2 = vshll.u32 %v3503_v62, 16  ;;  %v1137_v14 = vrot.slane %v1135_v5, 1  ;;  %v530_v16 = vshll.u32 %v3126_v7, 16  ;;  %v1280_v31 = vrot.slane %v3122_v57, 1  ;;  %v287_v33 = vld [vmem:[%s3324_s30 + $0x30] sm:$0xe] }
  0x3c   : > { %v1150_v19 = vsel %vm461_vm1, %v1145_v8, %v1149_v1  ;;  %v1279_v30 = vrot.slane %v2927_v10, 1  ;;  %v2870_v38 = vcombine.low %v288_v24, %v3491_v53  ;;  %v2880_v40 = vcombine.low %v2773_v26, %v2774_v28  ;;  %v2798_v59 = vld [vmem:[%s3324_s30 + $0x48] sm:$0xe]  ;;  %v2815_v1 = vld [vmem:[%s3324_s30 + $0x54] sm:$0xf] }
  0x3d   : > { %669 = vrot.lane.b32.xlu1 %v644_v15, %s3249_s8  ;;  %v520_v15 = vrot.slane %v518_v6, 1  ;;  %v527_v22 = vrot.slane %v525_v2, 1  ;;  %v532_v34 = vrot.slane %v530_v16, 1  ;;  %v1283_v45 = vrot.slane %v3481_v43, 1  ;;  %v2797_v8 = vld [vmem:[%s3324_s30 + $0x3c] sm:$0xe] }
  0x3e   : > { %v1281_v44 = vsel %vm632_vm0, %v1279_v30, %v1280_v31  ;;  %v649_v50 = vrot.slane %v3126_v7, 1  ;;  %v648_v53 = vrot.slane %v2870_v38, 1  ;;  %v646_v43 = vrot.slane %v3499_v46, 1  ;;  %v3551_v46 = vld [vmem:[%s3324_s30 + $0x58] sm:$0xf] }
  0x3f   : > { %667 = vrot.lane.b32.xlu0 %v641_v18, %s3249_s8  ;;  %v2928_v18 = vcombine.low %v2838_v12, %v3463_v23  ;;  %v528_v37 = vor.u32 %v527_v22, %v523_v21  ;;  %v2900_v7 = vcombine.low %v2798_v59, %v2774_v28  ;;  %v2910_v10 = vcombine.low %v2815_v1, %v3551_v46  ;;  %v3576_v30 = vld [vmem:[%s3324_s30 + $0x58] sm:$0xf]  ;;  %v3584_v38 = vld [vmem:[%s3324_s30 + $0x50] ss:$0 sps:$4 sm:$0x11]  }
  0x40   : > { %v650_v60 = vsel %vm632_vm0, %v648_v53, %v649_v50 }
  0x41   : > { %739 = vrot.lane.b32.xlu1 %v2878_v61, %s3247_s6  ;;  %v513_v61 = vshll.u32 %v3486_v49, 16  ;;  %v1282_v41 = vrot.slane %v2928_v18, 1  ;;  %v533_v52 = vsel %vm461_vm1, %v528_v37, %v532_v34  ;;  %v968_v21 = vrot.slane %v2900_v7, 1  ;;  %v3567_v18 = vld [vmem:[%s3324_s30 + $0x5c] ss:$0 sps:$4 sm:$0x11]  }
  0x42   : > { %v1166_v26 = vshll.u32 %v2910_v10, 16  ;;  %v1171_v37 = vshll.u32 %v3567_v18, 16 }
  0x43   : > { %737 = vrot.lane.b32.xlu0 %v2877_v4, %s3247_s6  ;;  %v1132_v4 = vrot.slane %v1130_v55, 1  ;;  %v515_v11 = vrot.slane %v513_v61, 1  ;;  %v844_v61 = vshrl.u32 %v2880_v40, 16 }
  0x45   : > { %909 = vrot.lane.b32.xlu1 %v830_v47, %s3251_s14  ;;  %v1133_v13 = vor.u32 %v1132_v4, %v1128_v3  ;;  %v516_v20 = vor.u32 %v515_v11, %v511_v9  ;;  %v2869_v47 = vcombine.low %v287_v33, %v3477_v39  ;;  %v1284_v39 = vsel %vm632_vm0, %v1282_v41, %v1283_v45  ;;  %v2813_v9 = vld [vmem:[%s3324_s30 + $0x48] sm:$0xf]  ;;  %v2814_v11 = vld [vmem:[%s3324_s30 + $0x4c] sm:$0xf] }
  0x46   : > { %v1164_v41 = vshrl.u32 %v2910_v10, 16 }
  0x47   : > { %907 = vrot.lane.b32.xlu0 %v818_v54, %s3251_s14  ;;  %v1138_v29 = vsel %vm461_vm1, %v1133_v13, %v1137_v14  ;;  %v521_v23 = vsel %vm461_vm1, %v516_v20, %v520_v15  ;;  %v846_v54 = vshll.u32 %v2880_v40, 16  ;;  %v645_v56 = vrot.slane %v2869_v47, 1  ;;  %v265_v13 = vld [vmem:[%s3324_s30 + $0x48] sm:$0xf]  ;;  %v3562_v14 = vld [vmem:[%s3324_s30 + $0x4c] sm:$0xf] }
  0x48   : > { %v2909_v20 = vcombine.low %v2813_v9, %v2814_v11  ;;  %v3571_v28 = vcombine.low %v265_v13, %v3562_v14  ;;  %v2777_v9 = vld [vmem:[%s3324_s30 + $0x60] sm:$0xf]  ;;  %v3617_v13 = vld [vmem:[%s3324_s30 + $0x58] sm:$0xf] }
  0x49   : > { %989 = vrot.lane.b32.xlu1 %v964_v58, %s3248_s7  ;;  %v2889_v58 = vcombine.low %v2787_v51, %v2787_v51  ;;  %v647_v3 = vsel %vm632_vm0, %v645_v56, %v646_v43 }
  0x4b   : > { %987 = vrot.lane.b32.xlu0 %v961_v63, %s3248_s7  ;;  %v848_v63 = vrot.slane %v846_v54, 1  ;;  %v839_v6 = vshll.u32 %v2889_v58, 16  ;;  %v966_v34 = vrot.slane %v2889_v58, 1  ;;  %v1173_v54 = vrot.slane %v1171_v37, 1  ;;  %v2840_v58 = vld [vmem:[%s3324_s30 + $0x54] sm:$0xe] }
  0x4c   : > { %v2930_v7 = vcombine.low %v2840_v58, %v3551_v46  ;;  %v652_v37 = vrot.slane %v3584_v38, 1  ;;  %v2817_v58 = vld [vmem:[%s3324_s30 + $0x60] sm:$0xf] }
  0x4d   : > { %1059 = vrot.lane.b32.xlu1 %v2908_v36, %s3252_s15  ;;  %v3529_v36 = vld [vmem:[%s3324_s30 + $0x40] sm:$0xf]  ;;  %v849_v2 = vor.u32 %v848_v63, %v844_v61  ;;  %v841_v16 = vrot.slane %v839_v6, 1  ;;  %v290_v6 = vld [vmem:[%s3324_s30 + $0x54] sm:$0xe] }
  0x4e   : > { %v2879_v48 = vcombine.low %v2771_v35, %v3529_v36  ;;  %v1154_v35 = vshll.u32 %v2909_v20, 16 }
  0x4f   : > { %1057 = vrot.lane.b32.xlu0 %v2907_v42, %s3252_s15  ;;  %v2788_v42 = vld [vmem:[%s3324_s30 + $0x50] sm:$0x1] }
  0x50   : > { %v2890_v55 = vcombine.low %v2788_v42, %v2788_v42  ;;  %v834_v57 = vshll.u32 %v2879_v48, 16  ;;  %v832_v4 = vshrl.u32 %v2879_v48, 16  ;;  %v1168_v42 = vrot.slane %v1166_v26, 1  ;;  %v2790_v26 = vld [vmem:[%s3324_s30 + $0x68] sm:$0x1] }
  0x51   : > { %1229 = vrot.lane.b32.xlu1 %v1150_v19, %s3253_s16  ;;  %v2899_v19 = vcombine.low %v2797_v8, %v3529_v36  ;;  %v3140_v36 = vld [vmem:[%s3324_s30 + $0x50] ss:$0 sps:$4 sm:$0x11]   ;;  %v1156_v50 = vrot.slane %v1154_v35, 1  ;;  %v289_v8 = vld [vmem:[%s3324_s30 + $0x48] sm:$0xe] }
  0x52   : > { %v851_v0 = vshll.u32 %v2890_v55, 16  ;;  %v836_v5 = vrot.slane %v834_v57, 1  ;;  %v969_v22 = vrot.slane %v2890_v55, 1  ;;  %v1159_v51 = vshll.u32 %v3140_v36, 16 }
  0x53   : > { %1227 = vrot.lane.b32.xlu0 %v1138_v29, %s3253_s16  ;;  %v267_v29 = vld [vmem:[%s3324_s30 + $0x54] sm:$0xf]  ;;  %v965_v33 = vrot.slane %v2899_v19, 1  ;;  %v542_v55 = vshll.u32 %v3584_v38, 16  ;;  %v1169_v43 = vor.u32 %v1168_v42, %v1164_v41  ;;  %v2800_v38 = vld [vmem:[%s3324_s30 + $0x60] sm:$0xe] }
  0x54   : > { %v853_v12 = vrot.slane %v851_v0, 1  ;;  %v837_v15 = vor.u32 %v836_v5, %v832_v4  ;;  %v3589_v45 = vcombine.low %v267_v29, %v3576_v30 }
  0x55   : > { %590 = vrot.lane.b32.xlu1 %v521_v23, %s3250_s11  ;;  %v970_v23 = vsel %vm632_vm0, %v968_v21, %v969_v22  ;;  %v967_v47 = vsel %vm632_vm0, %v965_v33, %v966_v34  ;;  %v544_v61 = vrot.slane %v542_v55, 1  ;;  %v1174_v1 = vsel %vm461_vm1, %v1169_v43, %v1173_v54  ;;  %v2789_v34 = vld [vmem:[%s3324_s30 + $0x5c] sm:$0x1] }
  0x56   : > { %v854_v24 = vsel %vm461_vm1, %v849_v2, %v853_v12  ;;  %v842_v31 = vsel %vm461_vm1, %v837_v15, %v841_v16  ;;  %v549_v57 = vshll.u32 %v3589_v45, 16  ;;  %v547_v4 = vshrl.u32 %v3589_v45, 16  ;;  %v2775_v2 = vld [vmem:[%s3324_s30 + $0x54] sm:$0xf] }
  0x57   : > { %1307 = vrot.lane.b32.xlu0 %v1281_v44, %s3254_s17  ;;  %v537_v44 = vshll.u32 %v3571_v28, 16  ;;  %v3172_v15 = vld [vmem:[%s4366_s1 + $0x10] ss:$0 sps:$4 sm:$0x33]   ;;  %v1288_v22 = vrot.slane %v2930_v7, 1  ;;  %v2881_v33 = vcombine.low %v2775_v2, %v3617_v13  ;;  %v2891_v42 = vcombine.low %v2789_v34, %v2789_v34 }
  0x58   : > { %v551_v5 = vrot.slane %v549_v57, 1  ;;  %3036 = vmatprep.subr.msk.bf16.mxu0 %vm1539_vm2, %v3172_v15 }
  0x59   : > { %592 = vrot.lane.b32.xlu1 %v533_v52, %s3250_s11  ;;  %v3594_v52 = vld [vmem:[%s3324_s30 + $0x5c] ss:$0 sps:$4 sm:$0x11]   ;;  %v539_v56 = vrot.slane %v537_v44, 1  ;;  %v858_v41 = vshll.u32 %v2881_v33, 16  ;;  %v1541_v44 = vsel %vm1539_vm2, %v3172_v15, 0 }
  0x5a   : > { %v554_v0 = vshll.u32 %v3594_v52, 16  ;;  %v552_v19 = vor.u32 %v551_v5, %v547_v4  ;;  %2993 = vmatpush3.bf16.msra.mxu0 %v1541_v44  ;;  %v856_v55 = vshrl.u32 %v2881_v33, 16 }
  0x5b   : > { %1309 = vrot.lane.b32.xlu0 %v1284_v39, %s3254_s17  ;;  %v535_v39 = vshrl.u32 %v3571_v28, 16  ;;  %v860_v43 = vrot.slane %v858_v41, 1  ;;  %v3699_v41 = vld [vmem:[%s3324_s30 + $0x74] ss:$0 sps:$4 sm:$0x11]  }
  0x5c   : > { %v556_v46 = vrot.slane %v554_v0, 1  ;;  %v269_v0 = vld [vmem:[%s3324_s30 + $0x60] sm:$0xf] }
  0x5d   : > { %673 = vrot.lane.b32.xlu1 %v650_v60, %s3249_s8  ;;  %v1161_v60 = vrot.slane %v1159_v51, 1 }
  0x5e   : > { %v557_v35 = vsel %vm461_vm1, %v552_v19, %v556_v46 }
  0x5f   : > { %671 = vrot.lane.b32.xlu0 %v647_v3, %s3249_s8  ;;  %v540_v3 = vor.u32 %v539_v56, %v535_v39  ;;  %v863_v39 = vshll.u32 %v2891_v42, 16  ;;  %v2799_v56 = vld [vmem:[%s3324_s30 + $0x54] sm:$0xe] }
  0x60   : > { %v2901_v5 = vcombine.low %v2799_v56, %v3617_v13  ;;  %v3676_v13 = vld [vmem:[%s3324_s30 + $0x70] sm:$0xf] }
  0x61   : > { %743 = vrot.lane.b32.xlu1 %v2880_v40, %s3247_s6  ;;  %v2839_v40 = vld [vmem:[%s3324_s30 + $0x48] sm:$0xe]  ;;  %v545_v16 = vsel %vm461_vm1, %v540_v3, %v544_v61  ;;  %v861_v3 = vor.u32 %v860_v43, %v856_v55  ;;  %v865_v4 = vrot.slane %v863_v39, 1  ;;  %v578_v55 = vshll.u32 %v3699_v41, 16 }
  0x62   : > { %v2929_v53 = vcombine.low %v2839_v40, %v2814_v11  ;;  %v3612_v11 = vld [vmem:[%s3324_s30 + $0x64] sm:$0xf]  ;;  %v971_v46 = vrot.slane %v2901_v5, 1 }
  0x63   : > { %741 = vrot.lane.b32.xlu0 %v2879_v48, %s3247_s6  ;;  %v1152_v48 = vshrl.u32 %v2909_v20, 16  ;;  %v2882_v21 = vcombine.low %v2777_v9, %v3612_v11  ;;  %v866_v15 = vsel %vm461_vm1, %v861_v3, %v865_v4 }
  0x64   : > { %v1285_v63 = vrot.slane %v2929_v53, 1  ;;  %v3645_v53 = vld [vmem:[%s3324_s30 + $0x70] sm:$0xf] }
  0x65   : > { %913 = vrot.lane.b32.xlu1 %v854_v24, %s3251_s14  ;;  %v1157_v59 = vor.u32 %v1156_v50, %v1152_v48  ;;  %v1289_v24 = vrot.slane %v3567_v18, 1  ;;  %v870_v18 = vshll.u32 %v2882_v21, 16  ;;  %v868_v50 = vshrl.u32 %v2882_v21, 16 }
  0x67   : > { %911 = vrot.lane.b32.xlu0 %v842_v31, %s3251_s14  ;;  %v1162_v12 = vsel %vm461_vm1, %v1157_v59, %v1161_v60  ;;  %v2871_v31 = vcombine.low %v289_v8, %v3562_v14  ;;  %v1290_v14 = vsel %vm632_vm0, %v1288_v22, %v1289_v24  ;;  %v872_v51 = vrot.slane %v870_v18, 1  ;;  %v3655_v59 = vld [vmem:[%s3324_s30 + $0x64] sm:$0xf]  ;;  %v3667_v8 = vld [vmem:[%s3324_s30 + $0x74] ss:$0 sps:$4 sm:$0x11]  }
  0x68   : > { %v1195_v24 = vshll.u32 %v3667_v8, 16 }
  0x69   : > { %993 = vrot.lane.b32.xlu1 %v970_v23, %s3248_s7  ;;  %v2892_v23 = vcombine.low %v2790_v26, %v2790_v26  ;;  %v651_v40 = vrot.slane %v2871_v31, 1  ;;  %v873_v60 = vor.u32 %v872_v51, %v868_v50  ;;  %v2842_v50 = vld [vmem:[%s3324_s30 + $0x6c] sm:$0xe] }
  0x6b   : > { %991 = vrot.lane.b32.xlu0 %v967_v47, %s3248_s7  ;;  %v2819_v47 = vld [vmem:[%s3324_s30 + $0x6c] sm:$0xf]  ;;  %v653_v54 = vsel %vm632_vm0, %v651_v40, %v652_v37  ;;  %v975_v2 = vrot.slane %v2892_v23, 1  ;;  %v1197_v40 = vrot.slane %v1195_v24, 1 }
  0x6c   : > { %v2912_v57 = vcombine.low %v2819_v47, %v3645_v53 }
  0x6d   : > { %1063 = vrot.lane.b32.xlu1 %v2910_v10, %s3252_s15  ;;  %v1286_v10 = vrot.slane %v3140_v36, 1 }
  0x6e   : > { %v1190_v7 = vshll.u32 %v2912_v57, 16 }
  0x6f   : > { %1061 = vrot.lane.b32.xlu0 %v2909_v20, %s3252_s15  ;;  %v2872_v20 = vcombine.low %v290_v6, %v3576_v30  ;;  %v1287_v29 = vsel %vm632_vm0, %v1285_v63, %v1286_v10  ;;  %v655_v30 = vrot.slane %v3594_v52, 1  ;;  %v875_v52 = vshll.u32 %v2892_v23, 16  ;;  %v271_v10 = vld [vmem:[%s3324_s30 + $0x6c] sm:$0xf] }
  0x70   : > { %v2902_v63 = vcombine.low %v2800_v38, %v3612_v11  ;;  %v2911_v6 = vcombine.low %v2817_v58, %v3655_v59  ;;  %v1192_v22 = vrot.slane %v1190_v7, 1  ;;  %v291_v7 = vld [vmem:[%s3324_s30 + $0x60] sm:$0xe] }
  0x71   : > { %1233 = vrot.lane.b32.xlu1 %v1174_v1, %s3253_s16  ;;  %v654_v36 = vrot.slane %v2872_v20, 1  ;;  %v877_v61 = vrot.slane %v875_v52, 1  ;;  %v3661_v1 = vld [vmem:[%s3324_s30 + $0x64] sm:$0xf] }
  0x72   : > { %v974_v11 = vrot.slane %v2902_v63, 1  ;;  %v1178_v19 = vshll.u32 %v2911_v6, 16  ;;  %v3158_v20 = vld [vmem:[%s3324_s30 + $0x68] ss:$0 sps:$4 sm:$0x11]   ;;  %v1176_v34 = vshrl.u32 %v2911_v6, 16 }
  0x73   : > { %1231 = vrot.lane.b32.xlu0 %v1162_v12, %s3253_s16  ;;  %v656_v48 = vsel %vm632_vm0, %v654_v36, %v655_v30  ;;  %v878_v9 = vsel %vm461_vm1, %v873_v60, %v877_v61  ;;  %v3671_v12 = vcombine.low %v269_v0, %v3661_v1  ;;  %v1183_v36 = vshll.u32 %v3158_v20, 16  ;;  %v2781_v63 = vld [vmem:[%s3324_s30 + $0x78] sm:$0xf]  ;;  %v3720_v0 = vld [vmem:[%s3324_s30 + $0x7c] sm:$0xf] }
  0x74   : > { %v976_v26 = vsel %vm632_vm0, %v974_v11, %v975_v2  ;;  %v2932_v60 = vcombine.low %v2842_v50, %v3645_v53  ;;  %v1292_v5 = vrot.slane %v3158_v20, 1  ;;  %v2779_v53 = vld [vmem:[%s3324_s30 + $0x6c] sm:$0xf]  ;;  %v3727_v11 = vld [vmem:[%s3324_s30 + $0x70] sm:$0xf] }
  0x75   : > { %594 = vrot.lane.b32.xlu1 %v545_v16, %s3250_s11  ;;  %v972_v16 = vrot.slane %v2891_v42, 1  ;;  %v561_v31 = vshll.u32 %v3671_v12, 16  ;;  %v559_v42 = vshrl.u32 %v3671_v12, 16  ;;  %v1185_v38 = vrot.slane %v1183_v36, 1 }
  0x77   : > { %1311 = vrot.lane.b32.xlu0 %v1287_v29, %s3254_s17  ;;  %v3684_v29 = vld [vmem:[%s3324_s30 + $0x68] ss:$0 sps:$4 sm:$0x11]   ;;  %v973_v30 = vsel %vm632_vm0, %v971_v46, %v972_v16  ;;  %v563_v44 = vrot.slane %v561_v31, 1  ;;  %v1294_v16 = vrot.slane %v2932_v60, 1 }
  0x78   : > { %v566_v47 = vshll.u32 %v3684_v29, 16 }
  0x79   : > { %596 = vrot.lane.b32.xlu1 %v557_v35, %s3250_s11  ;;  %v1180_v35 = vrot.slane %v1178_v19, 1  ;;  %v564_v43 = vor.u32 %v563_v44, %v559_v42  ;;  %v1295_v19 = vrot.slane %v3667_v8, 1  ;;  %v2802_v44 = vld [vmem:[%s3324_s30 + $0x78] sm:$0xe] }
  0x7a   : > { %v568_v39 = vrot.slane %v566_v47, 1  ;;  %v2904_v60 = vcombine.low %v2802_v44, %v3720_v0 }
  0x7b   : > { %1313 = vrot.lane.b32.xlu0 %v1290_v14, %s3254_s17  ;;  %v2841_v14 = vld [vmem:[%s3324_s30 + $0x60] sm:$0xe]  ;;  %v1181_v52 = vor.u32 %v1180_v35, %v1176_v34  ;;  %v3746_v35 = vld [vmem:[%s3324_s30 + $0x80] ss:$0 sps:$4 sm:$0x11]  }
  0x7c   : > { %v2931_v51 = vcombine.low %v2841_v14, %v3655_v59  ;;  %v658_v14 = vrot.slane %v3684_v29, 1  ;;  %v899_v50 = vshll.u32 %v3746_v35, 16 }
  0x7d   : > { %677 = vrot.lane.b32.xlu1 %v656_v48, %s3249_s8  ;;  %v1186_v3 = vsel %vm461_vm1, %v1181_v52, %v1185_v38  ;;  %v3765_v52 = vld [vmem:[%s3324_s30 + $0x88] sm:$0xf] }
  0x7e   : > { %v1291_v4 = vrot.slane %v2931_v51, 1  ;;  %v2823_v51 = vld [vmem:[%s3324_s30 + $0x84] sm:$0xf] }
  0x7f   : > { %675 = vrot.lane.b32.xlu0 %v653_v54, %s3249_s8 }
  0x80   : > { %v1293_v20 = vsel %vm632_vm0, %v1291_v4, %v1292_v5  ;;  %v901_v4 = vrot.slane %v899_v50, 1  ;;  %v3780_v5 = vcombine.low %v2823_v51, %v3765_v52 }
  0x81   : > { %747 = vrot.lane.b32.xlu1 %v2882_v21, %s3247_s6  ;;  %v1188_v21 = vshrl.u32 %v2912_v57, 16 }
  0x83   : > { %745 = vrot.lane.b32.xlu0 %v2881_v33, %s3247_s6  ;;  %v3688_v33 = vcombine.low %v271_v10, %v3676_v13  ;;  %v1193_v37 = vor.u32 %v1192_v22, %v1188_v21  ;;  %v2873_v21 = vcombine.low %v291_v7, %v3661_v1  ;;  %v3739_v22 = vcombine.low %v2779_v53, %v3727_v11 }
  0x84   : > { %v1296_v1 = vsel %vm632_vm0, %v1294_v16, %v1295_v19  ;;  %v981_v16 = vrot.slane %v3746_v35, 1  ;;  %v1212_v35 = vshrl.u32 %v3780_v5, 16 }
  0x85   : > { %917 = vrot.lane.b32.xlu1 %v878_v9, %s3251_s14  ;;  %v573_v48 = vshll.u32 %v3688_v33, 16  ;;  %v1198_v54 = vsel %vm461_vm1, %v1193_v37, %v1197_v40  ;;  %v571_v56 = vshrl.u32 %v3688_v33, 16  ;;  %v580_v9 = vrot.slane %v578_v55, 1 }
  0x86   : > { %v657_v36 = vrot.slane %v2873_v21, 1  ;;  %v882_v37 = vshll.u32 %v3739_v22, 16 }
  0x87   : > { %915 = vrot.lane.b32.xlu0 %v866_v15, %s3251_s14  ;;  %v575_v58 = vrot.slane %v573_v48, 1  ;;  %v2884_v15 = vcombine.low %v2781_v63, %v3720_v0  ;;  %v3777_v63 = vld [vmem:[%s3324_s30 + $0x7c] sm:$0xf] }
  0x88   : > { %v659_v38 = vsel %vm632_vm0, %v657_v36, %v658_v14  ;;  %v884_v55 = vrot.slane %v882_v37, 1 }
  0x89   : > { %997 = vrot.lane.b32.xlu1 %v976_v26, %s3248_s7  ;;  %v576_v2 = vor.u32 %v575_v58, %v571_v56  ;;  %v894_v34 = vshll.u32 %v2884_v15, 16  ;;  %v892_v47 = vshrl.u32 %v2884_v15, 16 }
  0x8a   : > { %v3693_v18 = vpop.permute.xlu1 %735 }
  0x8b   : > { %v3695_v23 = vpop.permute.xlu0 %733  ;;  %995 = vrot.lane.b32.xlu0 %v973_v30, %s3248_s7  ;;  %v581_v26 = vsel %vm461_vm1, %v576_v2, %v580_v9  ;;  %v661_v30 = vrot.slane %v3699_v41, 1  ;;  %v896_v48 = vrot.slane %v894_v34, 1 }
  0x8d   : > { %1067 = vrot.lane.b32.xlu1 %v2912_v57, %s3252_s15  ;;  %v292_v57 = vld [vmem:[%s3324_s30 + $0x6c] sm:$0xe] }
  0x8e   : > { %v2874_v10 = vcombine.low %v292_v57, %v3676_v13  ;;  %v2791_v13 = vld [vmem:[%s3324_s30 + $0x74] sm:$0x1]  ;;  %v2821_v57 = vld [vmem:[%s3324_s30 + $0x78] sm:$0xf] }
  0x8f   : > { %1065 = vrot.lane.b32.xlu0 %v2911_v6, %s3252_s15  ;;  %v3713_v59 = vpop.permute.xlu0 %983  ;;  %v3715_v61 = vpop.permute.xlu1 %663  ;;  %v569_v6 = vsel %vm461_vm1, %v564_v43, %v568_v39  ;;  %v3754_v40 = vcombine.low %v2791_v13, %v2791_v13  ;;  %v2801_v39 = vld [vmem:[%s3324_s30 + $0x6c] sm:$0xe]  ;;  %v3789_v2 = vcombine.low %v2821_v57, %v3777_v63 }
  0x90   : > { %v660_v31 = vrot.slane %v2874_v10, 1  ;;  %v2903_v9 = vcombine.low %v2801_v39, %v3727_v11 }
  0x91   : > { %1237 = vrot.lane.b32.xlu1 %v1198_v54, %s3253_s16  ;;  %v880_v54 = vshrl.u32 %v3739_v22, 16  ;;  %v887_v43 = vshll.u32 %v3754_v40, 16  ;;  %v978_v13 = vrot.slane %v3754_v40, 1  ;;  %v2844_v40 = vld [vmem:[%s3324_s30 + $0x84] sm:$0xe] }
  0x92   : > { %v662_v42 = vsel %vm632_vm0, %v660_v31, %v661_v30  ;;  %v1202_v31 = vshll.u32 %v3789_v2, 16  ;;  %v3179_v30 = vld [vmem:[%s3324_s30 + $0x80] ss:$0 sps:$4 sm:$0x11]  }
  0x93   : > { %1235 = vrot.lane.b32.xlu0 %v1186_v3, %s3253_s16  ;;  %v3733_v46 = vpop.permute.xlu1 %665  ;;  %v897_v3 = vor.u32 %v896_v48, %v892_v47  ;;  %v885_v53 = vor.u32 %v884_v55, %v880_v54  ;;  %v1207_v48 = vshll.u32 %v3179_v30, 16  ;;  %v2934_v54 = vcombine.low %v2844_v40, %v3765_v52 }
  0x94   : > { %v1204_v47 = vrot.slane %v1202_v31, 1 }
  0x95   : > { %v583_v24 = vpop.permute.xlu0 %582  ;;  %598 = vrot.lane.b32.xlu1 %v569_v6, %s3250_s11  ;;  %v889_v6 = vrot.slane %v887_v43, 1  ;;  %v902_v11 = vsel %vm461_vm1, %v897_v3, %v901_v4  ;;  %v1209_v57 = vrot.slane %v1207_v48, 1 }
  0x96   : > { %v1325_v56 = vsel %vm1323_vm3, %v3353_v25, %v583_v24  ;;  %v977_v24 = vrot.slane %v2903_v9, 1 }
  0x97   : > { %1315 = vrot.lane.b32.xlu0 %v1293_v20, %s3254_s17  ;;  %v3749_v8 = vpop.permute.xlu1 %985  ;;  %v1346_v0 = vsel %vm1344_vm4, %v1325_v56, %v3715_v61  ;;  %v1214_v61 = vshll.u32 %v3780_v5, 16  ;;  %v3798_v20 = vld [vmem:[%s3324_s30 + $0x8c] ss:$0 sps:$4 sm:$0x11]  }
  0x98   : > { %v1367_v21 = vsel %vm1365_vm5, %v1346_v0, %v3695_v23  ;;  %v1219_v36 = vshll.u32 %v3798_v20, 16  ;;  %v979_v37 = vsel %vm632_vm0, %v977_v24, %v978_v13  ;;  %v1301_v9 = vrot.slane %v3798_v20, 1 }
  0x99   : > { %v585_v41 = vpop.permute.xlu0 %584  ;;  %600 = vrot.lane.b32.xlu1 %v581_v26, %s3250_s11 }
  0x9a   : > { %v1327_v7 = vsel %vm1323_vm3, %v3357_v27, %v585_v41  ;;  %v980_v27 = vrot.slane %v2904_v60, 1  ;;  %v1200_v41 = vshrl.u32 %v3789_v2, 16  ;;  %v1221_v43 = vrot.slane %v1219_v36, 1 }
  0x9b   : > { %1317 = vrot.lane.b32.xlu0 %v1296_v1, %s3254_s17  ;;  %v3761_v29 = vpop.permute.xlu1 %905  ;;  %v1348_v19 = vsel %vm1344_vm4, %v1327_v7, %v3733_v46  ;;  %v890_v46 = vsel %vm461_vm1, %v885_v53, %v889_v6  ;;  %v1216_v1 = vrot.slane %v1214_v61, 1  ;;  %v1300_v7 = vrot.slane %v2934_v54, 1 }
  0x9c   : > { %v1369_v34 = vsel %vm1365_vm5, %v1348_v19, %v3693_v18  ;;  %v1205_v60 = vor.u32 %v1204_v47, %v1200_v41  ;;  %v1298_v53 = vrot.slane %v3179_v30, 1 }
  0x9d   : > { %v904_v58 = vpop.permute.xlu0 %903  ;;  %681 = vrot.lane.b32.xlu1 %v662_v42, %s3249_s8  ;;  %v1390_v42 = vsel %vm1386_vm6, %v1369_v34, %v3761_v29  ;;  %v1217_v55 = vor.u32 %v1216_v1, %v1212_v35 }
  0x9e   : > { %v1388_v26 = vsel %vm1386_vm6, %v1367_v21, %v904_v58  ;;  %v1411_v39 = vsel %vm1407_vm7, %v1390_v42, %v3749_v8 }
  0x9f   : > { %679 = vrot.lane.b32.xlu0 %v659_v38, %s3249_s8  ;;  %v1056_v25 = vpop.permute.xlu1 %1055  ;;  %v1409_v14 = vsel %vm1407_vm7, %v1388_v26, %v3713_v59  ;;  %v2843_v59 = vld [vmem:[%s3324_s30 + $0x78] sm:$0xe]  ;;  %v1222_v8 = vsel %vm461_vm1, %v1217_v55, %v1221_v43 }
  0xa0   : > { %v1432_v56 = vsel %vm1428_vm8, %v1411_v39, %v1056_v25  ;;  %v2933_v58 = vcombine.low %v2843_v59, %v3777_v63  ;;  %v1210_v25 = vsel %vm461_vm1, %v1205_v60, %v1209_v57 }
  0xa1   : > { %v1054_v10 = vpop.permute.xlu0 %1053  ;;  %751 = vrot.lane.b32.xlu1 %v2884_v15, %s3247_s6 }
  0xa2   : > { %v1430_v44 = vsel %vm1428_vm8, %v1409_v14, %v1054_v10  ;;  %v1297_v0 = vrot.slane %v2933_v58, 1 }
  0xa3   : > { %749 = vrot.lane.b32.xlu0 %v3739_v22, %s3247_s6  ;;  %v1226_v15 = vpop.permute.xlu1 %1225  ;;  %v982_v22 = vsel %vm632_vm0, %v980_v27, %v981_v16 }
  0xa4   : > { %v1453_v3 = vsel %vm1449_vm9, %v1432_v56, %v1226_v15  ;;  %v1299_v27 = vsel %vm632_vm0, %v1297_v0, %v1298_v53 }
  0xa5   : > { %v1224_v23 = vpop.permute.xlu0 %1223  ;;  %921 = vrot.lane.b32.xlu1 %v902_v11, %s3251_s14 }
  0xa6   : > { %v1451_v50 = vsel %vm1449_vm9, %v1430_v44, %v1224_v23 }
  0xa7   : > { %919 = vrot.lane.b32.xlu0 %v890_v46, %s3251_s14  ;;  %v587_v18 = vpop.permute.xlu1 %586 }
  0xa8   : > { %v1329_v15 = vsel %vm1323_vm3, %v3406_v17, %v587_v18 }
  0xa9   : > { %v1304_v51 = vpop.permute.xlu0 %1303  ;;  %1001 = vrot.lane.b32.xlu1 %v982_v22, %s3248_s7 }
  0xaa   : > { %v1472_v38 = vsel %vm1470_vm10, %v1451_v50, %v1304_v51 }
  0xab   : > { %999 = vrot.lane.b32.xlu0 %v979_v37, %s3248_s7  ;;  %2994 = vmatprep.mubr.msk.bf16.mxu0 %vm1518_vm11, %v1472_v38  ;;  %v589_v29 = vpop.permute.xlu1 %588 }
  0xac   : > { %v1331_v26 = vsel %vm1323_vm3, %v3420_v32, %v589_v29 }
  0xad   : > { %v1306_v4 = vpop.permute.xlu0 %1305  ;;  %1071 = vrot.lane.b32.xlu1 %v3780_v5, %s3252_s15  ;;  %v1302_v5 = vsel %vm632_vm0, %v1300_v7, %v1301_v9 }
  0xae   : > { %v1474_v52 = vsel %vm1470_vm10, %v1453_v3, %v1306_v4 }
  0xaf   : > { %1069 = vrot.lane.b32.xlu0 %v3789_v2, %s3252_s15  ;;  %2995 = vmatmul.mubr.msk.bf16.vlgmr.msra.gmra.mrb[0].mxu0 %vm1518_vm11, %v1474_v52  ;;  %v670_v63 = vpop.permute.xlu1 %669 }
  0xb0   : > { %v1352_v22 = vsel %vm1344_vm4, %v1331_v26, %v670_v63 }
  0xb1   : > { %v668_v6 = vpop.permute.xlu0 %667  ;;  %1241 = vrot.lane.b32.xlu1 %v1222_v8, %s3253_s16 }
  0xb2   : > { %v1350_v13 = vsel %vm1344_vm4, %v1329_v15, %v668_v6 }
  0xb3   : > { %1239 = vrot.lane.b32.xlu0 %v1210_v25, %s3253_s16  ;;  %v740_v10 = vpop.permute.xlu1 %739 }
  0xb4   : > { %v1373_v17 = vsel %vm1365_vm5, %v1352_v22, %v740_v10 }
  0xb5   : > { %v738_v16 = vpop.permute.xlu0 %737  ;;  %1321 = vrot.lane.b32.xlu1 %v1302_v5, %s3254_s17 }
  0xb6   : > { %v1371_v46 = vsel %vm1365_vm5, %v1350_v13, %v738_v16 }
  0xb7   : > { %1319 = vrot.lane.b32.xlu0 %v1299_v27, %s3254_s17  ;;  %v910_v2 = vpop.permute.xlu1 %909 }
  0xb8   : > { %v1394_v14 = vsel %vm1386_vm6, %v1373_v17, %v910_v2 }
  0xb9   : > { %v908_v19 = vpop.permute.xlu0 %907 }
  0xba   : > { %v1392_v30 = vsel %vm1386_vm6, %v1371_v46, %v908_v19 }
  0xbb   : > { %v990_v11 = vpop.permute.xlu1 %989 }
  0xbc   : > { %v1415_v18 = vsel %vm1407_vm7, %v1394_v14, %v990_v11 }
  0xbd   : > { %v988_v61 = vpop.permute.xlu0 %987 }
  0xbe   : > { %v1413_v34 = vsel %vm1407_vm7, %v1392_v30, %v988_v61 }
  0xbf   : > { %v1060_v20 = vpop.permute.xlu1 %1059 }
  0xc0   : > { %v1436_v40 = vsel %vm1428_vm8, %v1415_v18, %v1060_v20 }
  0xc1   : > { %v1058_v21 = vpop.permute.xlu0 %1057 }
  0xc2   : > { %v1434_v35 = vsel %vm1428_vm8, %v1413_v34, %v1058_v21 }
  0xc3   : > { %v1230_v24 = vpop.permute.xlu1 %1229 }
  0xc4   : > { %v1457_v41 = vsel %vm1449_vm9, %v1436_v40, %v1230_v24 }
  0xc5   : > { %v1228_v31 = vpop.permute.xlu0 %1227 }
  0xc6   : > { %v1455_v1 = vsel %vm1449_vm9, %v1434_v35, %v1228_v31 }
  0xc7   : > { %v591_v23 = vpop.permute.xlu1 %590 }
  0xc8   : > { %v1333_v29 = vsel %vm1323_vm3, %v3486_v49, %v591_v23 }
  0xc9   : > { %v1308_v36 = vpop.permute.xlu0 %1307 }
  0xca   : > { %v1476_v32 = vsel %vm1470_vm10, %v1455_v1, %v1308_v36 }
  0xcb   : > { %2998 = vmatprep.mubr.msk.bf16.mxu0 %vm1518_vm11, %v1476_v32  ;;  %v593_v37 = vpop.permute.xlu1 %592 }
  0xcc   : > { %v1335_v60 = vsel %vm1323_vm3, %v3503_v62, %v593_v37 }
  0xcd   : > { %v1310_v42 = vpop.permute.xlu0 %1309 }
  0xce   : > { %v1478_v44 = vsel %vm1470_vm10, %v1457_v41, %v1310_v42 }
  0xcf   : > { %2999 = vmatmul.mubr.msk.bf16.gmra.mrb[4].mxu0 %vm1518_vm11, %v1478_v44  ;;  %v674_v47 = vpop.permute.xlu1 %673 }
  0xd0   : > { %v1356_v7 = vsel %vm1344_vm4, %v1335_v60, %v674_v47 }
  0xd1   : > { %v672_v48 = vpop.permute.xlu0 %671 }
  0xd2   : > { %v1354_v58 = vsel %vm1344_vm4, %v1333_v29, %v672_v48 }
  0xd3   : > { %v744_v50 = vpop.permute.xlu1 %743 }
  0xd4   : > { %v1377_v49 = vsel %vm1365_vm5, %v1356_v7, %v744_v50 }
  0xd5   : > { %v742_v51 = vpop.permute.xlu0 %741 }
  0xd6   : > { %v1375_v57 = vsel %vm1365_vm5, %v1354_v58, %v742_v51 }
  0xd7   : > { %v914_v59 = vpop.permute.xlu1 %913 }
  0xd8   : > { %v1398_v0 = vsel %vm1386_vm6, %v1377_v49, %v914_v59 }
  0xd9   : > { %v912_v38 = vpop.permute.xlu0 %911 }
  0xda   : > { %v1396_v4 = vsel %vm1386_vm6, %v1375_v57, %v912_v38 }
  0xdb   : > { %v994_v54 = vpop.permute.xlu1 %993 }
  0xdc   : > { %v1419_v53 = vsel %vm1407_vm7, %v1398_v0, %v994_v54 }
  0xdd   : > { %v992_v55 = vpop.permute.xlu0 %991 }
  0xde   : > { %v1417_v52 = vsel %vm1407_vm7, %v1396_v4, %v992_v55 }
  0xdf   : > { %v1064_v43 = vpop.permute.xlu1 %1063 }
  0xe0   : > { %v1440_v5 = vsel %vm1428_vm8, %v1419_v53, %v1064_v43 }
  0xe1   : > { %v1062_v39 = vpop.permute.xlu0 %1061 }
  0xe2   : > { %v1438_v9 = vsel %vm1428_vm8, %v1417_v52, %v1062_v39 }
  0xe3   : > { %v1234_v56 = vpop.permute.xlu1 %1233 }
  0xe4   : > { %v1461_v10 = vsel %vm1449_vm9, %v1440_v5, %v1234_v56 }
  0xe5   : > { %v1232_v3 = vpop.permute.xlu0 %1231 }
  0xe6   : > { %v1459_v63 = vsel %vm1449_vm9, %v1438_v9, %v1232_v3 }
  0xe7   : > { %v595_v8 = vpop.permute.xlu1 %594 }
  0xe8   : > { %v1337_v46 = vsel %vm1323_vm3, %v3571_v28, %v595_v8 }
  0xe9   : > { %v1312_v25 = vpop.permute.xlu0 %1311 }
  0xea   : > { %v1480_v62 = vsel %vm1470_vm10, %v1459_v63, %v1312_v25 }
  0xeb   : > { %3002 = vmatprep.mubr.msk.bf16.mxu0 %vm1518_vm11, %v1480_v62  ;;  %v597_v6 = vpop.permute.xlu1 %596 }
  0xec   : > { %v1339_v34 = vsel %vm1323_vm3, %v3589_v45, %v597_v6 }
  0xed   : > { %v1314_v27 = vpop.permute.xlu0 %1313 }
  0xee   : > { %v1482_v16 = vsel %vm1470_vm10, %v1461_v10, %v1314_v27  ;;  %v3935_v27 = vld [vmem:[%s4367_s2] ss:$0 sm:$0xff] }
  0xef   : > { %3003 = vmatmul.mubr.msk.bf16.gmra.mrb[8].mxu0 %vm1518_vm11, %v1482_v16  ;;  %v678_v2 = vpop.permute.xlu1 %677 }
  0xf0   : > { %v1360_v36 = vsel %vm1344_vm4, %v1339_v34, %v678_v2 }
  0xf1   : > { %v676_v19 = vpop.permute.xlu0 %675 }
  0xf2   : > { %v1358_v30 = vsel %vm1344_vm4, %v1337_v46, %v676_v19 }
  0xf3   : > { %v748_v11 = vpop.permute.xlu1 %747 }
  0xf4   : > { %v1381_v28 = vsel %vm1365_vm5, %v1360_v36, %v748_v11 }
  0xf5   : > { %v746_v61 = vpop.permute.xlu0 %745 }
  0xf6   : > { %v1379_v23 = vsel %vm1365_vm5, %v1358_v30, %v746_v61 }
  0xf7   : > { %v918_v20 = vpop.permute.xlu1 %917 }
  0xf8   : > { %v1402_v37 = vsel %vm1386_vm6, %v1381_v28, %v918_v20 }
  0xf9   : > { %v916_v21 = vpop.permute.xlu0 %915 }
  0xfa   : > { %v1400_v35 = vsel %vm1386_vm6, %v1379_v23, %v916_v21 }
  0xfb   : > { %v998_v15 = vpop.permute.xlu1 %997 }
  0xfc   : > { %v1423_v40 = vsel %vm1407_vm7, %v1402_v37, %v998_v15 }
  0xfd   : > { %v996_v24 = vpop.permute.xlu0 %995 }
  0xfe   : > { %v1421_v17 = vsel %vm1407_vm7, %v1400_v35, %v996_v24 }
  0xff   : > { %v1068_v13 = vpop.permute.xlu1 %1067 }
 0x100   : > { %v1444_v42 = vsel %vm1428_vm8, %v1423_v40, %v1068_v13 }
 0x101   : > { %v1066_v26 = vpop.permute.xlu0 %1065 }
 0x102   : > { %v1442_v14 = vsel %vm1428_vm8, %v1421_v17, %v1066_v26  ;;  %v1682_v26 = vstv %s1678_s9 }
 0x103   : > { %v1238_v31 = vpop.permute.xlu1 %1237 }
 0x104   : > { %v1465_v44 = vsel %vm1449_vm9, %v1444_v42, %v1238_v31 }
 0x105   : > { %v1236_v22 = vpop.permute.xlu0 %1235 }
 0x106   : > { %v1463_v32 = vsel %vm1449_vm9, %v1442_v14, %v1236_v22 }
 0x107   : > { %v599_v1 = vpop.permute.xlu1 %598 }
 0x108   : > { %v1341_v60 = vsel %vm1323_vm3, %v3671_v12, %v599_v1 }
 0x109   : > { %v1316_v18 = vpop.permute.xlu0 %1315 }
 0x10a   : > { %v1484_v45 = vsel %vm1470_vm10, %v1463_v32, %v1316_v18 }
 0x10b   : > { %3006 = vmatprep.mubr.msk.bf16.mxu0 %vm1518_vm11, %v1484_v45  ;;  %v601_v41 = vpop.permute.xlu1 %600 }
 0x10c   : > { %v1343_v56 = vsel %vm1323_vm3, %v3688_v33, %v601_v41 }
 0x10d   : > { %v1318_v47 = vpop.permute.xlu0 %1317 }
 0x10e   : > { %v1486_v48 = vsel %vm1470_vm10, %v1465_v44, %v1318_v47 }
 0x10f   : > { %3007 = vmatmul.mubr.msk.bf16.gmra.mrb[12].mxu0 %vm1518_vm11, %v1486_v48  ;;  %v682_v50 = vpop.permute.xlu1 %681 }
 0x110   : > { %v1364_v57 = vsel %vm1344_vm4, %v1343_v56, %v682_v50 }
 0x111   : > { %v680_v51 = vpop.permute.xlu0 %679 }
 0x112   : > { %v1362_v4 = vsel %vm1344_vm4, %v1341_v60, %v680_v51 }
 0x113   : > { %v752_v59 = vpop.permute.xlu1 %751 }
 0x114   : > { %v1385_v52 = vsel %vm1365_vm5, %v1364_v57, %v752_v59 }
 0x115   : > { %v750_v38 = vpop.permute.xlu0 %749 }
 0x116   : > { %v1383_v8 = vsel %vm1365_vm5, %v1362_v4, %v750_v38 }
 0x117   : > { %v922_v54 = vpop.permute.xlu1 %921 }
 0x118   : > { %v1406_v7 = vsel %vm1386_vm6, %v1385_v52, %v922_v54 }
 0x119   : > { %v920_v55 = vpop.permute.xlu0 %919 }
 0x11a   : > { %v1404_v49 = vsel %vm1386_vm6, %v1383_v8, %v920_v55 }
 0x11b   : > { %v1002_v43 = vpop.permute.xlu1 %1001 }
 0x11c   : > { %v1427_v33 = vsel %vm1407_vm7, %v1406_v7, %v1002_v43 }
 0x11d   : > { %v1000_v39 = vpop.permute.xlu0 %999 }
 0x11e   : > { %v1425_v63 = vsel %vm1407_vm7, %v1404_v49, %v1000_v39 }
 0x11f   : > { %v1072_v29 = vpop.permute.xlu1 %1071 }
 0x120   : > { %v1448_v12 = vsel %vm1428_vm8, %v1427_v33, %v1072_v29 }
 0x121   : > { %v1070_v58 = vpop.permute.xlu0 %1069 }
 0x122   : > { %v1446_v0 = vsel %vm1428_vm8, %v1425_v63, %v1070_v58 }
 0x123   : > { %v1242_v3 = vpop.permute.xlu1 %1241 }
 0x124   : > { %v1469_v62 = vsel %vm1449_vm9, %v1448_v12, %v1242_v3 }
 0x125   : > { %v1240_v9 = vpop.permute.xlu0 %1239 }
 0x126   : > { %v1467_v53 = vsel %vm1449_vm9, %v1446_v0, %v1240_v9 }
 0x127   : > { %v1322_v25 = vpop.permute.xlu1 %1321 }
 0x128   : > { %v1490_v6 = vsel %vm1470_vm10, %v1469_v62, %v1322_v25 }
 0x129   : > { %v1320_v5 = vpop.permute.xlu0 %1319 }
 0x12a   : > { %v1488_v10 = vsel %vm1470_vm10, %v1467_v53, %v1320_v5 }
 0x12b   : > { %3010 = vmatprep.mubr.msk.bf16.mxu0 %vm1518_vm11, %v1488_v10 }
 0x12c   : > { %3011 = vmatmul.mubr.msk.bf16.gmra.mrb[16].mxu0 %vm1518_vm11, %v1490_v6 }
 0x182   : > { %v2996_v16 = vpop.f32.mrb[0].mxu0 }
 0x183   : > { %v1586_v2 = vadd.f32 %v2996_v16, %v3935_v27  ;;  %v1577_v19 = vpop.f32.mrb[1].mxu0 }
 0x184   : > { %v1578_v11 = vadd.f32 %v3935_v27, %v1577_v19  ;;  %v2997_v61 = vpop.f32.mrb[2].mxu0 }
 0x185   : > { %v1589_v20 = vadd.f32 %v2997_v61, %v3935_v27  ;;  %v1580_v21 = vpop.f32.mrb[3].mxu0  ;;  %v1658_v13 = vmax.f32 %v1586_v2, 0.0 }
 0x186   : > { %v1656_v15 = vmax.f32 %v1578_v11, 0.0  ;;  %v1581_v24 = vadd.f32 %v3935_v27, %v1580_v21 }
 0x187   : > { %v1659_v46 = vmax.f32 %v1589_v20, 0.0 }
 0x188   : > { %v1657_v31 = vmax.f32 %v1581_v24, 0.0  ;;  %v1683_v34 = vmul.f32 %v1682_v26, %v1656_v15 }
 0x189   : > { %v1689_v30 = vpack.c.bf16 %v1659_v46, %v1658_v13 }
 0x18a   : > { %v1684_v23 = vmul.f32 %v1682_v26, %v1657_v31 }
 0x18b   : > { %v1706_v22 = vshrl.u32 %v1689_v30, 16  ;;  %v1709_v36 = vshll.u32 %v1689_v30, 16 }
 0x18c   : > { %v1688_v35 = vpack.c.bf16 %v1684_v23, %v1683_v34 }
 0x18d   : > { %v1708_v1 = vrot.slane %v1706_v22, 7 }
 0x18e   : > { %v1699_v14 = vshrl.u32 %v1688_v35, 16  ;;  %v1702_v37 = vshll.u32 %v1688_v35, 16 }
 0x18f   : > { %v1711_v28 = vor.u32 %v1709_v36, %v1708_v1  ;;  %v1802_v32 = vsel %vm3941_vm14, %v1708_v1, 0  ;;  %v3180_v36 = vld [vmem:[%s4368_s3] sm:$0xff]  }
 0x190   : > { %v1701_v18 = vrot.slane %v1699_v14, 7  ;;  %v1943_v40 = vrot.slane %v1802_v32, 1  ;;  %v1831_v47 = vshll.u32 %v1802_v32, 16  ;;  %3014 = vmatprep.subr.bf16.mxu1 %v3180_v36 }
 0x191   : > { %v3949_v45 = vsel %vm3941_vm14, 0, %v1711_v28  ;;  %3015 = vmatpush3.bf16.msra.mxu1 %v3180_v36 }
 0x192   : > { %v1704_v41 = vor.u32 %v1702_v37, %v1701_v18  ;;  %1980 = vrot.lane.b32.xlu0 %v3949_v45, %s3247_s6  ;;  %v1942_v42 = vrot.slane %v3949_v45, 1  ;;  %v1826_v44 = vshll.u32 %v3949_v45, 16  ;;  %v1824_v48 = vshrl.u32 %v3949_v45, 16 }
 0x193   : > { %v1801_v38 = vsel %vm3941_vm14, %v1701_v18, 0  ;;  %v1833_v43 = vrot.slane %v1831_v47, 1 }
 0x194   : > { %v1944_v50 = vsel %vm632_vm0, %v1942_v42, %v1943_v40  ;;  %v1828_v51 = vrot.slane %v1826_v44, 1  ;;  %v3959_v59 = vsel %vm3941_vm14, 0, %v1704_v41  ;;  %v1940_v39 = vrot.slane %v1801_v38, 1  ;;  %v3181_v42 = vld [vmem:[%s4368_s3 + $0x8] sm:$0xff]  }
 0x195   : > { %1965 = vrot.lane.b32.xlu1 %v1944_v50, %s3249_s8  ;;  %v1939_v54 = vrot.slane %v3959_v59, 1  ;;  %v1814_v5 = vshll.u32 %v3959_v59, 16  ;;  %v1812_v20 = vshrl.u32 %v3959_v59, 16  ;;  %v1819_v21 = vshll.u32 %v1801_v38, 16  ;;  %3016 = vmatprep.subr.bf16.mxu1 %v3181_v42 }
 0x196   : > { %2028 = vrot.lane.b32.xlu0 %v1944_v50, %s3248_s7  ;;  %v1829_v55 = vor.u32 %v1828_v51, %v1824_v48  ;;  %3017 = vmatpush3.bf16.msra.mxu1 %v3181_v42 }
 0x197   : > { %v1941_v56 = vsel %vm632_vm0, %v1939_v54, %v1940_v39  ;;  %v1816_v61 = vrot.slane %v1814_v5, 1  ;;  %v1821_v31 = vrot.slane %v1819_v21, 1  ;;  %v3182_v39 = vld [vmem:[%s4368_s3 + $0x10] ss:$0 sps:$4 sm:$0x33]  }
 0x198   : > { %v1834_v29 = vsel %vm461_vm1, %v1829_v55, %v1833_v43  ;;  %3037 = vmatprep.subr.msk.bf16.mxu1 %vm1539_vm2, %v3182_v39 }
 0x199   : > { %1909 = vrot.lane.b32.xlu1 %v1834_v29, %s3250_s11  ;;  %v1817_v13 = vor.u32 %v1816_v61, %v1812_v20 }
 0x19a   : > { %1963 = vrot.lane.b32.xlu0 %v1941_v56, %s3249_s8 }
 0x19b   : > { %v1822_v23 = vsel %vm461_vm1, %v1817_v13, %v1821_v31 }
 0x19e   : > { %2008 = vrot.lane.b32.xlu0 %v1834_v29, %s3251_s14 }
 0x1a2   : > { %v3000_v58 = vpop.f32.mrb[4].mxu0 }
 0x1a3   : > { %v1602_v60 = vadd.f32 %v3000_v58, %v3935_v27  ;;  %v1593_v57 = vpop.f32.mrb[5].mxu0 }
 0x1a4   : > { %v1594_v3 = vadd.f32 %v3935_v27, %v1593_v57  ;;  %v3001_v4 = vpop.f32.mrb[6].mxu0  ;;  %v2281_v57 = vsel %vm1539_vm2, %v3182_v39, 0 }
 0x1a5   : > { %v1605_v52 = vadd.f32 %v3001_v4, %v3935_v27  ;;  %v1596_v8 = vpop.f32.mrb[7].mxu0  ;;  %v1662_v9 = vmax.f32 %v1602_v60, 0.0  ;;  %3019 = vmatpush3.bf16.msra.mxu1 %v2281_v57 }
 0x1a6   : > { %v1597_v7 = vadd.f32 %v3935_v27, %v1596_v8  ;;  %v1660_v33 = vmax.f32 %v1594_v3, 0.0 }
 0x1a7   : > { %v1663_v49 = vmax.f32 %v1605_v52, 0.0 }
 0x1a8   : > { %v1661_v63 = vmax.f32 %v1597_v7, 0.0 }
 0x1a9   : > { %v1691_v12 = vpack.c.bf16 %v1663_v49, %v1662_v9 }
 0x1aa   : > { %v1690_v25 = vpack.c.bf16 %v1661_v63, %v1660_v33 }
 0x1ab   : > { %v1720_v0 = vshrl.u32 %v1691_v12, 16  ;;  %v1723_v6 = vshll.u32 %v1691_v12, 16 }
 0x1ac   : > { %v1713_v62 = vshrl.u32 %v1690_v25, 16  ;;  %v1716_v2 = vshll.u32 %v1690_v25, 16 }
 0x1ad   : > { %v1722_v53 = vrot.slane %v1720_v0, 7 }
 0x1ae   : > { %v1715_v10 = vrot.slane %v1713_v62, 7 }
 0x1af   : > { %v1725_v16 = vor.u32 %v1723_v6, %v1722_v53  ;;  %v1804_v15 = vsel %vm3941_vm14, %v1722_v53, 0 }
 0x1b0   : > { %v1718_v19 = vor.u32 %v1716_v2, %v1715_v10  ;;  %v1949_v30 = vrot.slane %v1804_v15, 1  ;;  %v1803_v34 = vsel %vm3941_vm14, %v1715_v10, 0  ;;  %v1855_v32 = vshll.u32 %v1804_v15, 16 }
 0x1b1   : > { %v3978_v11 = vsel %vm3941_vm14, 0, %v1725_v16  ;;  %v1946_v14 = vrot.slane %v1803_v34, 1  ;;  %v1843_v54 = vshll.u32 %v1803_v34, 16 }
 0x1b2   : > { %1984 = vrot.lane.b32.xlu0 %v3978_v11, %s3247_s6  ;;  %2047 = vrot.lane.b32.xlu1 %v3978_v11, %s3252_s15  ;;  %v3989_v24 = vsel %vm3941_vm14, 0, %v1718_v19  ;;  %v1948_v26 = vrot.slane %v3978_v11, 1  ;;  %v1850_v46 = vshll.u32 %v3978_v11, 16  ;;  %v1848_v28 = vshrl.u32 %v3978_v11, 16 }
 0x1b3   : > { %v1945_v35 = vrot.slane %v3989_v24, 1  ;;  %v1838_v40 = vshll.u32 %v3989_v24, 16  ;;  %v1857_v41 = vrot.slane %v1855_v32, 1  ;;  %v1836_v38 = vshrl.u32 %v3989_v24, 16 }
 0x1b4   : > { %v1950_v22 = vsel %vm632_vm0, %v1948_v26, %v1949_v30  ;;  %v1852_v1 = vrot.slane %v1850_v46, 1  ;;  %v1845_v52 = vrot.slane %v1843_v54, 1 }
 0x1b5   : > { %v1947_v18 = vsel %vm632_vm0, %v1945_v35, %v1946_v14  ;;  %v1840_v47 = vrot.slane %v1838_v40, 1 }
 0x1b6   : > { %2045 = vrot.lane.b32.xlu0 %v3989_v24, %s3252_s15  ;;  %1982 = vrot.lane.b32.xlu1 %v3989_v24, %s3247_s6  ;;  %v1853_v37 = vor.u32 %v1852_v1, %v1848_v28 }
 0x1b7   : > { %v1841_v58 = vor.u32 %v1840_v47, %v1836_v38 }
 0x1b8   : > { %v1858_v44 = vsel %vm461_vm1, %v1853_v37, %v1857_v41 }
 0x1b9   : > { %v1846_v49 = vsel %vm461_vm1, %v1841_v58, %v1845_v52 }
 0x1ba   : > { %1907 = vrot.lane.b32.xlu0 %v1822_v23, %s3250_s11  ;;  %1969 = vrot.lane.b32.xlu1 %v1950_v22, %s3249_s8 }
 0x1be   : > { %2095 = vrot.lane.b32.xlu0 %v1950_v22, %s3254_s17  ;;  %2030 = vrot.lane.b32.xlu1 %v1947_v18, %s3248_s7 }
 0x1c2   : > { %2032 = vrot.lane.b32.xlu0 %v1950_v22, %s3248_s7  ;;  %2075 = vrot.lane.b32.xlu1 %v1858_v44, %s3253_s16  ;;  %v3004_v48 = vpop.f32.mrb[8].mxu0 }
 0x1c3   : > { %v1618_v50 = vadd.f32 %v3004_v48, %v3935_v27  ;;  %v1609_v51 = vpop.f32.mrb[9].mxu0 }
 0x1c4   : > { %v1610_v55 = vadd.f32 %v3935_v27, %v1609_v51  ;;  %v3005_v43 = vpop.f32.mrb[10].mxu0 }
 0x1c5   : > { %v1621_v29 = vadd.f32 %v3005_v43, %v3935_v27  ;;  %v1612_v56 = vpop.f32.mrb[11].mxu0  ;;  %v1666_v3 = vmax.f32 %v1618_v50, 0.0 }
 0x1c6   : > { %v1613_v60 = vadd.f32 %v3935_v27, %v1612_v56  ;;  %2093 = vrot.lane.b32.xlu0 %v1947_v18, %s3254_s17  ;;  %1913 = vrot.lane.b32.xlu1 %v1858_v44, %s3250_s11  ;;  %v1664_v8 = vmax.f32 %v1610_v55, 0.0 }
 0x1c7   : > { %v1667_v4 = vmax.f32 %v1621_v29, 0.0 }
 0x1c8   : > { %v1665_v7 = vmax.f32 %v1613_v60, 0.0 }
 0x1c9   : > { %v1693_v9 = vpack.c.bf16 %v1667_v4, %v1666_v3 }
 0x1ca   : > { %v1692_v33 = vpack.c.bf16 %v1665_v7, %v1664_v8  ;;  %1967 = vrot.lane.b32.xlu0 %v1947_v18, %s3249_s8  ;;  %2010 = vrot.lane.b32.xlu1 %v1846_v49, %s3251_s14 }
 0x1cb   : > { %v1734_v63 = vshrl.u32 %v1693_v9, 16  ;;  %v1737_v0 = vshll.u32 %v1693_v9, 16 }
 0x1cc   : > { %v1727_v12 = vshrl.u32 %v1692_v33, 16  ;;  %v1730_v6 = vshll.u32 %v1692_v33, 16 }
 0x1cd   : > { %v1736_v25 = vrot.slane %v1734_v63, 7 }
 0x1ce   : > { %v1729_v62 = vrot.slane %v1727_v12, 7  ;;  %2012 = vrot.lane.b32.xlu0 %v1858_v44, %s3251_s14  ;;  %1911 = vrot.lane.b32.xlu1 %v1846_v49, %s3250_s11 }
 0x1cf   : > { %v1739_v53 = vor.u32 %v1737_v0, %v1736_v25  ;;  %v1806_v16 = vsel %vm3941_vm14, %v1736_v25, 0 }
 0x1d0   : > { %v1732_v5 = vor.u32 %v1730_v6, %v1729_v62  ;;  %v1955_v20 = vrot.slane %v1806_v16, 1  ;;  %v1805_v21 = vsel %vm3941_vm14, %v1729_v62, 0  ;;  %v1879_v30 = vshll.u32 %v1806_v16, 16 }
 0x1d1   : > { %v4037_v10 = vsel %vm3941_vm14, 0, %v1739_v53  ;;  %v1952_v46 = vrot.slane %v1805_v21, 1  ;;  %v1867_v37 = vshll.u32 %v1805_v21, 16 }
 0x1d2   : > { %2073 = vrot.lane.b32.xlu0 %v1846_v49, %s3253_s16  ;;  %2051 = vrot.lane.b32.xlu1 %v4037_v10, %s3252_s15  ;;  %v4046_v2 = vsel %vm3941_vm14, 0, %v1732_v5  ;;  %v1954_v19 = vrot.slane %v4037_v10, 1  ;;  %v1874_v61 = vshll.u32 %v4037_v10, 16  ;;  %v1872_v31 = vshrl.u32 %v4037_v10, 16 }
 0x1d3   : > { %v1951_v13 = vrot.slane %v4046_v2, 1  ;;  %v1862_v22 = vshll.u32 %v4046_v2, 16  ;;  %v1881_v35 = vrot.slane %v1879_v30, 1  ;;  %v1860_v18 = vshrl.u32 %v4046_v2, 16 }
 0x1d4   : > { %v1956_v15 = vsel %vm632_vm0, %v1954_v19, %v1955_v20  ;;  %v1876_v26 = vrot.slane %v1874_v61, 1  ;;  %v1869_v38 = vrot.slane %v1867_v37, 1 }
 0x1d5   : > { %v1953_v34 = vsel %vm632_vm0, %v1951_v13, %v1952_v46  ;;  %v1864_v36 = vrot.slane %v1862_v22, 1 }
 0x1d6   : > { %1988 = vrot.lane.b32.xlu0 %v4037_v10, %s3247_s6  ;;  %1986 = vrot.lane.b32.xlu1 %v4046_v2, %s3247_s6  ;;  %v1877_v23 = vor.u32 %v1876_v26, %v1872_v31 }
 0x1d7   : > { %v1865_v47 = vor.u32 %v1864_v36, %v1860_v18 }
 0x1d8   : > { %v1882_v1 = vsel %vm461_vm1, %v1877_v23, %v1881_v35 }
 0x1d9   : > { %v1870_v39 = vsel %vm461_vm1, %v1865_v47, %v1869_v38 }
 0x1da   : > { %2049 = vrot.lane.b32.xlu0 %v4046_v2, %s3252_s15  ;;  %1973 = vrot.lane.b32.xlu1 %v1956_v15, %s3249_s8 }
 0x1de   : > { %2099 = vrot.lane.b32.xlu0 %v1956_v15, %s3254_s17  ;;  %2034 = vrot.lane.b32.xlu1 %v1953_v34, %s3248_s7 }
 0x1e2   : > { %2036 = vrot.lane.b32.xlu0 %v1956_v15, %s3248_s7  ;;  %2079 = vrot.lane.b32.xlu1 %v1882_v1, %s3253_s16  ;;  %v3008_v14 = vpop.f32.mrb[12].mxu0 }
 0x1e3   : > { %v1634_v28 = vadd.f32 %v3008_v14, %v3935_v27  ;;  %v1625_v32 = vpop.f32.mrb[13].mxu0 }
 0x1e4   : > { %v1626_v40 = vadd.f32 %v3935_v27, %v1625_v32  ;;  %v3009_v41 = vpop.f32.mrb[14].mxu0 }
 0x1e5   : > { %v1637_v42 = vadd.f32 %v3009_v41, %v3935_v27  ;;  %v1628_v44 = vpop.f32.mrb[15].mxu0  ;;  %v1670_v50 = vmax.f32 %v1634_v28, 0.0 }
 0x1e6   : > { %v1629_v48 = vadd.f32 %v3935_v27, %v1628_v44  ;;  %2097 = vrot.lane.b32.xlu0 %v1953_v34, %s3254_s17  ;;  %1917 = vrot.lane.b32.xlu1 %v1882_v1, %s3250_s11  ;;  %v1668_v54 = vmax.f32 %v1626_v40, 0.0 }
 0x1e7   : > { %v1671_v51 = vmax.f32 %v1637_v42, 0.0 }
 0x1e8   : > { %v1669_v55 = vmax.f32 %v1629_v48, 0.0 }
 0x1e9   : > { %v1695_v43 = vpack.c.bf16 %v1671_v51, %v1670_v50 }
 0x1ea   : > { %v1694_v29 = vpack.c.bf16 %v1669_v55, %v1668_v54  ;;  %1971 = vrot.lane.b32.xlu0 %v1953_v34, %s3249_s8  ;;  %2014 = vrot.lane.b32.xlu1 %v1870_v39, %s3251_s14 }
 0x1eb   : > { %v1748_v56 = vshrl.u32 %v1695_v43, 16  ;;  %v1751_v57 = vshll.u32 %v1695_v43, 16 }
 0x1ec   : > { %v1741_v58 = vshrl.u32 %v1694_v29, 16  ;;  %v1744_v52 = vshll.u32 %v1694_v29, 16 }
 0x1ed   : > { %v1750_v60 = vrot.slane %v1748_v56, 7 }
 0x1ee   : > { %v1743_v3 = vrot.slane %v1741_v58, 7  ;;  %2016 = vrot.lane.b32.xlu0 %v1882_v1, %s3251_s14  ;;  %1915 = vrot.lane.b32.xlu1 %v1870_v39, %s3250_s11  ;;  %v1685_v1 = vstv %s1681_s29 }
 0x1ef   : > { %v1753_v4 = vor.u32 %v1751_v57, %v1750_v60  ;;  %v1808_v9 = vsel %vm3941_vm14, %v1750_v60, 0 }
 0x1f0   : > { %v1746_v8 = vor.u32 %v1744_v52, %v1743_v3  ;;  %v1961_v12 = vrot.slane %v1808_v9, 1  ;;  %v1807_v25 = vsel %vm3941_vm14, %v1743_v3, 0  ;;  %v1903_v16 = vshll.u32 %v1808_v9, 16 }
 0x1f1   : > { %v4083_v7 = vsel %vm3941_vm14, 0, %v1753_v4  ;;  %v1958_v6 = vrot.slane %v1807_v25, 1  ;;  %v1891_v28 = vshll.u32 %v1807_v25, 16 }
 0x1f2   : > { %2077 = vrot.lane.b32.xlu0 %v1870_v39, %s3253_s16  ;;  %2055 = vrot.lane.b32.xlu1 %v4083_v7, %s3252_s15  ;;  %v4092_v49 = vsel %vm3941_vm14, 0, %v1746_v8  ;;  %v1960_v33 = vrot.slane %v4083_v7, 1  ;;  %v1898_v63 = vshll.u32 %v4083_v7, 16  ;;  %v1896_v5 = vshrl.u32 %v4083_v7, 16 }
 0x1f3   : > { %v1957_v62 = vrot.slane %v4092_v49, 1  ;;  %v1886_v20 = vshll.u32 %v4092_v49, 16  ;;  %v1905_v15 = vrot.slane %v1903_v16, 1  ;;  %v1884_v14 = vshrl.u32 %v4092_v49, 16 }
 0x1f4   : > { %v1962_v0 = vsel %vm632_vm0, %v1960_v33, %v1961_v12  ;;  %v1900_v53 = vrot.slane %v1898_v63, 1  ;;  %v1893_v47 = vrot.slane %v1891_v28, 1 }
 0x1f5   : > { %v1959_v19 = vsel %vm632_vm0, %v1957_v62, %v1958_v6  ;;  %v1888_v34 = vrot.slane %v1886_v20, 1 }
 0x1f6   : > { %1992 = vrot.lane.b32.xlu0 %v4083_v7, %s3247_s6  ;;  %1990 = vrot.lane.b32.xlu1 %v4092_v49, %s3247_s6  ;;  %v1901_v61 = vor.u32 %v1900_v53, %v1896_v5 }
 0x1f7   : > { %v1889_v40 = vor.u32 %v1888_v34, %v1884_v14 }
 0x1f8   : > { %v1906_v30 = vsel %vm461_vm1, %v1901_v61, %v1905_v15 }
 0x1f9   : > { %v1894_v51 = vsel %vm461_vm1, %v1889_v40, %v1893_v47 }
 0x1fa   : > { %2053 = vrot.lane.b32.xlu0 %v4092_v49, %s3252_s15  ;;  %1977 = vrot.lane.b32.xlu1 %v1962_v0, %s3249_s8 }
 0x1fe   : > { %2103 = vrot.lane.b32.xlu0 %v1962_v0, %s3254_s17  ;;  %2038 = vrot.lane.b32.xlu1 %v1959_v19, %s3248_s7 }
 0x1ff   : > { %v3012_v21 = vpop.f32.mrb[16].mxu0 }
 0x200   : > { %v1650_v13 = vadd.f32 %v3012_v21, %v3935_v27  ;;  %v1641_v26 = vpop.f32.mrb[17].mxu0 }
 0x201   : > { %v1642_v46 = vadd.f32 %v3935_v27, %v1641_v26  ;;  %v3013_v31 = vpop.f32.mrb[18].mxu0 }
 0x202   : > { %v1674_v23 = vmax.f32 %v1650_v13, 0.0  ;;  %v1653_v22 = vadd.f32 %v3013_v31, %v3935_v27  ;;  %2040 = vrot.lane.b32.xlu0 %v1962_v0, %s3248_s7  ;;  %2083 = vrot.lane.b32.xlu1 %v1906_v30, %s3253_s16  ;;  %v1644_v35 = vpop.f32.mrb[19].mxu0 }
 0x203   : > { %v1645_v36 = vadd.f32 %v3935_v27, %v1644_v35  ;;  %v1672_v18 = vmax.f32 %v1642_v46, 0.0 }
 0x204   : > { %v1675_v32 = vmax.f32 %v1653_v22, 0.0  ;;  %v1686_v41 = vmul.f32 %v1685_v1, %v1674_v23  ;;  %v1981_v29 = vpop.permute.xlu0 %1980 }
 0x205   : > { %v1673_v37 = vmax.f32 %v1645_v36, 0.0 }
 0x206   : > { %v1687_v42 = vmul.f32 %v1685_v1, %v1675_v32  ;;  %2101 = vrot.lane.b32.xlu0 %v1959_v19, %s3254_s17  ;;  %1921 = vrot.lane.b32.xlu1 %v1906_v30, %s3250_s11 }
 0x207   : > { %v1696_v44 = vpack.c.bf16 %v1673_v37, %v1672_v18  ;;  %v1966_v16 = vpop.permute.xlu1 %1965 }
 0x208   : > { %v1697_v48 = vpack.c.bf16 %v1687_v42, %v1686_v41  ;;  %v2029_v9 = vpop.permute.xlu0 %2028 }
 0x209   : > { %v1755_v50 = vshrl.u32 %v1696_v44, 16  ;;  %v1758_v54 = vshll.u32 %v1696_v44, 16 }
 0x20a   : > { %v1762_v27 = vshrl.u32 %v1697_v48, 16  ;;  %1975 = vrot.lane.b32.xlu0 %v1959_v19, %s3249_s8  ;;  %2018 = vrot.lane.b32.xlu1 %v1894_v51, %s3251_s14  ;;  %v1765_v55 = vshll.u32 %v1697_v48, 16 }
 0x20b   : > { %v1757_v38 = vrot.slane %v1755_v50, 7  ;;  %v1910_v15 = vpop.permute.xlu1 %1909 }
 0x20c   : > { %v1764_v43 = vrot.slane %v1762_v27, 7  ;;  %v1964_v19 = vpop.permute.xlu0 %1963  ;;  %v2112_v40 = vsel %vm1323_vm3, %v3949_v45, %v1910_v15 }
 0x20d   : > { %v1760_v39 = vor.u32 %v1758_v54, %v1757_v38  ;;  %v1809_v60 = vsel %vm3941_vm14, %v1757_v38, 0  ;;  %v2128_v47 = vsel %vm1344_vm4, %v2112_v40, %v1966_v16 }
 0x20e   : > { %2020 = vrot.lane.b32.xlu0 %v1906_v30, %s3251_s14  ;;  %1919 = vrot.lane.b32.xlu1 %v1894_v51, %s3250_s11  ;;  %v1767_v56 = vor.u32 %v1765_v55, %v1764_v43  ;;  %v2004_v8 = vshll.u32 %v1809_v60, 16  ;;  %v2026_v25 = vrot.slane %v1809_v60, 1  ;;  %v1810_v62 = vsel %vm3941_vm14, %v1764_v43, 0 }
 0x20f   : > { %v1799_v58 = vsel %vm3941_vm14, 0, %v1760_v39  ;;  %v2069_v20 = vshll.u32 %v1810_v62, 16  ;;  %v2091_v31 = vrot.slane %v1810_v62, 1 }
 0x210   : > { %v1999_v57 = vshll.u32 %v1799_v58, 16  ;;  %v1800_v3 = vsel %vm3941_vm14, 0, %v1767_v56  ;;  %v1997_v52 = vshrl.u32 %v1799_v58, 16  ;;  %v2025_v63 = vrot.slane %v1799_v58, 1  ;;  %v2009_v13 = vpop.permute.xlu0 %2008 }
 0x211   : > { %v2064_v33 = vshll.u32 %v1800_v3, 16  ;;  %v2006_v0 = vrot.slane %v2004_v8, 1  ;;  %v2062_v61 = vshrl.u32 %v1800_v3, 16  ;;  %v2071_v17 = vrot.slane %v2069_v20, 1 }
 0x212   : > { %2081 = vrot.lane.b32.xlu0 %v1894_v51, %s3253_s16  ;;  %1994 = vrot.lane.b32.xlu1 %v1799_v58, %s3247_s6  ;;  %v2001_v4 = vrot.slane %v1999_v57, 1  ;;  %v2027_v6 = vsel %vm632_vm0, %v2025_v63, %v2026_v25  ;;  %v2090_v26 = vrot.slane %v1800_v3, 1  ;;  %s2755_s6 = sshll.u32 %s3229_s18, 4  ;;  %s2756_s18 = sshll.u32 %s4386_s19, 5 }
 0x213   : > { %v2066_v53 = vrot.slane %v2064_v33, 1  ;;  %p241_p8 = scmp.lt.s32.totalorder %s2755_s6, 31 }
 0x214   : > { %v2002_v12 = vor.u32 %v2001_v4, %v1997_v52  ;;  %v2092_v23 = vsel %vm632_vm0, %v2090_v26, %v2091_v31  ;;  %vm2381_vm0 = vsmask.f32 7440 }
 0x215   : > { %v2067_v21 = vor.u32 %v2066_v53, %v2062_v61  ;;  %s4388_s6 = smov (!%p241_p8, %s2755_s6), 31 }
 0x216   : > { %2057 = vrot.lane.b32.xlu0 %v1799_v58, %s3252_s15  ;;  %2059 = vrot.lane.b32.xlu1 %v1800_v3, %s3252_s15  ;;  %v2007_v5 = vsel %vm461_vm1, %v2002_v12, %v2006_v0 }
 0x217   : > { %v2072_v46 = vsel %vm461_vm1, %v2067_v21, %v2071_v17  ;;  %vm4237_vm1 = vmor %vm2380_vm15, %vm2381_vm0 }
 0x21a   : > { %2042 = vrot.lane.b32.xlu1 %v2027_v6, %s3248_s7  ;;  %2085 = vrot.lane.b32.xlu0 %v2007_v5, %s3253_s16  ;;  %s244_s7 = sadd.s32 %s2756_s18, %s4388_s6 }
 0x21b   : > { %s2757_s19 = sshll.u32 %s244_s7, 3 }
 0x21e   : > { %2105 = vrot.lane.b32.xlu0 %v2027_v6, %s3254_s17  ;;  %2022 = vrot.lane.b32.xlu1 %v2007_v5, %s3251_s14 }
 0x222   : > { %2087 = vrot.lane.b32.xlu1 %v2072_v46, %s3253_s16  ;;  %s4261_s16 = scalar_lea.vmem %s4370_s5, %s2757_s19 }
 0x224   : > { %v2048_v30 = vpop.permute.xlu1 %2047  ;;  %v1985_v34 = vpop.permute.xlu0 %1984 }
 0x226   : > { %2107 = vrot.lane.b32.xlu1 %v2092_v23, %s3254_s17 }
 0x228   : > { %v1983_v22 = vpop.permute.xlu1 %1982  ;;  %v2046_v35 = vpop.permute.xlu0 %2045 }
 0x229   : > { %v2144_v50 = vsel %vm1365_vm5, %v2128_v47, %v1983_v22 }
 0x22c   : > { %v1970_v1 = vpop.permute.xlu1 %1969  ;;  %v1908_v36 = vpop.permute.xlu0 %1907 }
 0x22d   : > { %v2110_v37 = vsel %vm1323_vm3, %v3959_v59, %v1908_v36 }
 0x22e   : > { %v2126_v41 = vsel %vm1344_vm4, %v2110_v37, %v1964_v19 }
 0x22f   : > { %v2142_v48 = vsel %vm1365_vm5, %v2126_v41, %v1981_v29 }
 0x230   : > { %v2031_v14 = vpop.permute.xlu1 %2030  ;;  %v2096_v28 = vpop.permute.xlu0 %2095  ;;  %v2158_v59 = vsel %vm1386_vm6, %v2142_v48, %v2009_v13 }
 0x231   : > { %v2174_v39 = vsel %vm1407_vm7, %v2158_v59, %v2029_v9 }
 0x232   : > { %v2190_v58 = vsel %vm1428_vm8, %v2174_v39, %v2046_v35 }
 0x234   : > { %v2076_v32 = vpop.permute.xlu1 %2075  ;;  %v2033_v18 = vpop.permute.xlu0 %2032 }
 0x238   : > { %v1914_v42 = vpop.permute.xlu1 %1913  ;;  %v2094_v44 = vpop.permute.xlu0 %2093 }
 0x239   : > { %v2116_v53 = vsel %vm1323_vm3, %v3978_v11, %v1914_v42 }
 0x23a   : > { %v2132_v19 = vsel %vm1344_vm4, %v2116_v53, %v1970_v1 }
 0x23c   : > { %v2011_v51 = vpop.permute.xlu1 %2010  ;;  %v1968_v27 = vpop.permute.xlu0 %1967 }
 0x23d   : > { %v2160_v38 = vsel %vm1386_vm6, %v2144_v50, %v2011_v51 }
 0x23e   : > { %v2176_v54 = vsel %vm1407_vm7, %v2160_v38, %v2031_v14 }
 0x23f   : > { %v2192_v43 = vsel %vm1428_vm8, %v2176_v54, %v2048_v30 }
 0x240   : > { %v1912_v55 = vpop.permute.xlu1 %1911  ;;  %v2013_v45 = vpop.permute.xlu0 %2012  ;;  %v2208_v60 = vsel %vm1449_vm9, %v2192_v43, %v2076_v32 }
 0x241   : > { %v2224_v4 = vsel %vm1470_vm10, %v2208_v60, %v2096_v28  ;;  %v2114_v62 = vsel %vm1323_vm3, %v3989_v24, %v1912_v55 }
 0x242   : > { %v2130_v16 = vsel %vm1344_vm4, %v2114_v62, %v1968_v27 }
 0x243   : > { %v2146_v17 = vsel %vm1365_vm5, %v2130_v16, %v1985_v34 }
 0x244   : > { %v2052_v56 = vpop.permute.xlu1 %2051  ;;  %v2074_v29 = vpop.permute.xlu0 %2073  ;;  %v2162_v24 = vsel %vm1386_vm6, %v2146_v17, %v2013_v45 }
 0x245   : > { %v2206_v57 = vsel %vm1449_vm9, %v2190_v58, %v2074_v29  ;;  %v2178_v31 = vsel %vm1407_vm7, %v2162_v24, %v2033_v18 }
 0x246   : > { %v2222_v3 = vsel %vm1470_vm10, %v2206_v57, %v2094_v44 }
 0x247   : > { %3020 = vmatprep.mubr.msk.bf16.mxu1 %vm1518_vm11, %v2222_v3 }
 0x248   : > { %v1987_v52 = vpop.permute.xlu1 %1986  ;;  %3021 = vmatmul.mubr.msk.bf16.vlgmr.msra.gmra.mrb[0].mxu1 %vm1518_vm11, %v2224_v4  ;;  %v1989_v8 = vpop.permute.xlu0 %1988 }
 0x249   : > { %v2148_v61 = vsel %vm1365_vm5, %v2132_v19, %v1987_v52 }
 0x24c   : > { %v1974_v33 = vpop.permute.xlu1 %1973  ;;  %v2050_v9 = vpop.permute.xlu0 %2049 }
 0x24d   : > { %v2194_v30 = vsel %vm1428_vm8, %v2178_v31, %v2050_v9  ;;  %v3183_v31 = vld [vmem:[%s3324_s30 + $0x24] sm:$0xf] }
 0x250   : > { %v2035_v63 = vpop.permute.xlu1 %2034  ;;  %v2100_v12 = vpop.permute.xlu0 %2099 }
 0x254   : > { %v2080_v25 = vpop.permute.xlu1 %2079  ;;  %v2037_v0 = vpop.permute.xlu0 %2036 }
 0x258   : > { %v1918_v6 = vpop.permute.xlu1 %1917  ;;  %v2098_v5 = vpop.permute.xlu0 %2097 }
 0x259   : > { %v2120_v47 = vsel %vm1323_vm3, %v4037_v10, %v1918_v6 }
 0x25a   : > { %v2136_v27 = vsel %vm1344_vm4, %v2120_v47, %v1974_v33 }
 0x25c   : > { %v2015_v20 = vpop.permute.xlu1 %2014  ;;  %v1972_v21 = vpop.permute.xlu0 %1971 }
 0x25d   : > { %v2164_v15 = vsel %vm1386_vm6, %v2148_v61, %v2015_v20 }
 0x25e   : > { %v2180_v13 = vsel %vm1407_vm7, %v2164_v15, %v2035_v63 }
 0x25f   : > { %v2196_v46 = vsel %vm1428_vm8, %v2180_v13, %v2052_v56 }
 0x260   : > { %v1916_v26 = vpop.permute.xlu1 %1915  ;;  %v2017_v11 = vpop.permute.xlu0 %2016  ;;  %v2212_v35 = vsel %vm1449_vm9, %v2196_v46, %v2080_v25 }
 0x261   : > { %v2228_v36 = vsel %vm1470_vm10, %v2212_v35, %v2100_v12  ;;  %v2118_v44 = vsel %vm1323_vm3, %v4046_v2, %v1916_v26 }
 0x262   : > { %v2134_v51 = vsel %vm1344_vm4, %v2118_v44, %v1972_v21 }
 0x263   : > { %v2150_v55 = vsel %vm1365_vm5, %v2134_v51, %v1989_v8 }
 0x264   : > { %v2056_v23 = vpop.permute.xlu1 %2055  ;;  %v2078_v22 = vpop.permute.xlu0 %2077  ;;  %v2166_v2 = vsel %vm1386_vm6, %v2150_v55, %v2017_v11 }
 0x265   : > { %v2210_v34 = vsel %vm1449_vm9, %v2194_v30, %v2078_v22  ;;  %v2182_v29 = vsel %vm1407_vm7, %v2166_v2, %v2037_v0  ;;  %v2408_v30 = vshrl.u32 %v3183_v31, 16  ;;  %v3184_v22 = vld [vmem:[%s3324_s30 + $0x18] sm:$0xf] }
 0x266   : > { %v2226_v1 = vsel %vm1470_vm10, %v2210_v34, %v2098_v5  ;;  %v2384_v35 = vshrl.u32 %v3184_v22, 16  ;;  %v2387_v34 = vshll.u32 %v3184_v22, 16 }
 0x267   : > { %3024 = vmatprep.mubr.msk.bf16.mxu1 %vm1518_vm11, %v2226_v1  ;;  %v3185_v1 = vld [vmem:[%s3324_s30 + $0x28] sm:$0xf] }
 0x268   : > { %v1991_v14 = vpop.permute.xlu1 %1990  ;;  %3025 = vmatmul.mubr.msk.bf16.gmra.mrb[4].mxu1 %vm1518_vm11, %v2228_v36  ;;  %v1993_v28 = vpop.permute.xlu0 %1992  ;;  %v2421_v36 = vshrl.u32 %v3185_v1, 16 }
 0x269   : > { %v2152_v38 = vsel %vm1365_vm5, %v2136_v27, %v1991_v14  ;;  %v2417_v14 = vshll.u32 %v3185_v1, 16 }
 0x26a   : > { %v2423_v47 = vrot.slane %v2421_v36, 4 }
 0x26b   : > { %v2419_v44 = vrot.slane %v2417_v14, 5 }
 0x26c   : > { %v1978_v32 = vpop.permute.xlu1 %1977  ;;  %v2054_v18 = vpop.permute.xlu0 %2053 }
 0x26d   : > { %v2198_v60 = vsel %vm1428_vm8, %v2182_v29, %v2054_v18 }
 0x270   : > { %v2039_v37 = vpop.permute.xlu1 %2038  ;;  %v2104_v40 = vpop.permute.xlu0 %2103 }
 0x274   : > { %v2084_v41 = vpop.permute.xlu1 %2083  ;;  %v2041_v42 = vpop.permute.xlu0 %2040 }
 0x278   : > { %v1922_v48 = vpop.permute.xlu1 %1921  ;;  %v2102_v50 = vpop.permute.xlu0 %2101 }
 0x279   : > { %v2124_v0 = vsel %vm1323_vm3, %v4083_v7, %v1922_v48 }
 0x27a   : > { %v2140_v5 = vsel %vm1344_vm4, %v2124_v0, %v1978_v32 }
 0x27c   : > { %v2019_v54 = vpop.permute.xlu1 %2018  ;;  %v1976_v59 = vpop.permute.xlu0 %1975 }
 0x27d   : > { %v2168_v45 = vsel %vm1386_vm6, %v2152_v38, %v2019_v54  ;;  %v2424_v38 = vor.u32 %v2423_v47, %v2419_v44  ;;  %v3187_v54 = vld [vmem:[%s3324_s30 + $0x2c] sm:$0x1] }
 0x27e   : > { %v2184_v43 = vsel %vm1407_vm7, %v2168_v45, %v2039_v37  ;;  %v2410_v37 = vrot.slane %v2408_v30, 4  ;;  %v3188_v45 = vld [vmem:[%s3324_s30 + $0x20] sm:$0x1] }
 0x27f   : > { %v2200_v56 = vsel %vm1428_vm8, %v2184_v43, %v2056_v23  ;;  %v2411_v23 = vshll.u32 %v3183_v31, 16  ;;  %v2403_v43 = vshll.u32 %v3188_v45, 16 }
 0x280   : > { %v1920_v39 = vpop.permute.xlu1 %1919  ;;  %v2021_v10 = vpop.permute.xlu0 %2020  ;;  %v2216_v4 = vsel %vm1449_vm9, %v2200_v56, %v2084_v41  ;;  %v2386_v41 = vrot.slane %v2384_v35, 4  ;;  %v2425_v56 = vrot.slane %v2424_v38, 4  ;;  %v3194_v38 = vld [vmem:[%s3324_s30 + $0x38] sm:$0x1] }
 0x281   : > { %v2122_v58 = vsel %vm1323_vm3, %v4092_v49, %v1920_v39  ;;  %v2232_v9 = vsel %vm1470_vm10, %v2216_v4, %v2104_v40  ;;  %v2413_v40 = vrot.slane %v2411_v23, 5  ;;  %v4249_v4 = vld [vmem:[%s4369_s4] ss:$0 sm:$0xff] }
 0x282   : > { %v2138_v52 = vsel %vm1344_vm4, %v2122_v58, %v1976_v59  ;;  %v2427_v59 = vshll.u32 %v3187_v54, 16  ;;  %v3191_v23 = vld [vmem:[%s3324_s30 + $0x40] sm:$0xf]  ;;  %v2451_v54 = vshll.u32 %v3194_v38, 16 }
 0x283   : > { %v2154_v49 = vsel %vm1365_vm5, %v2138_v52, %v1993_v28  ;;  %v3186_v28 = vld [vmem:[%s3324_s30 + $0x1c] sm:$0xf]  ;;  %v2414_v51 = vor.u32 %v2413_v40, %v2410_v37  ;;  %v2469_v22 = vshrl.u32 %v3191_v23, 16  ;;  %v2465_v35 = vshll.u32 %v3191_v23, 16 }
 0x284   : > { %v1995_v57 = vpop.permute.xlu1 %1994  ;;  %v2082_v3 = vpop.permute.xlu0 %2081  ;;  %v2170_v25 = vsel %vm1386_vm6, %v2154_v49, %v2021_v10  ;;  %v2397_v32 = vshrl.u32 %v3186_v28, 16  ;;  %v2393_v18 = vshll.u32 %v3186_v28, 16  ;;  %v2429_v58 = vrot.slane %v2427_v59, 5 }
 0x285   : > { %v2214_v8 = vsel %vm1449_vm9, %v2198_v60, %v2082_v3  ;;  %v2186_v6 = vsel %vm1407_vm7, %v2170_v25, %v2041_v42  ;;  %v2156_v19 = vsel %vm1365_vm5, %v2140_v5, %v1995_v57  ;;  %v2389_v42 = vrot.slane %v2387_v34, 5  ;;  %v3192_v34 = vld [vmem:[%s3324_s30 + $0x34] sm:$0xf] }
 0x286   : > { %v2230_v33 = vsel %vm1470_vm10, %v2214_v8, %v2102_v50  ;;  %v2395_v48 = vrot.slane %v2393_v18, 5  ;;  %v2399_v50 = vrot.slane %v2397_v32, 4  ;;  %v2415_v2 = vrot.slane %v2414_v51, 4 }
 0x287   : > { %3028 = vmatprep.mubr.msk.bf16.mxu1 %vm1518_vm11, %v2230_v33  ;;  %v2390_v27 = vor.u32 %v2389_v42, %v2386_v41  ;;  %v2405_v60 = vrot.slane %v2403_v43, 5  ;;  %v2430_v52 = vsel %vm4237_vm1, %v2425_v56, %v2429_v58  ;;  %v2445_v1 = vshrl.u32 %v3192_v34, 16 }
 0x288   : > { %v2060_v63 = vpop.permute.xlu1 %2059  ;;  %3029 = vmatmul.mubr.msk.bf16.gmra.mrb[8].mxu1 %vm1518_vm11, %v2232_v9  ;;  %v2058_v12 = vpop.permute.xlu0 %2057  ;;  %v2400_v55 = vor.u32 %v2399_v50, %v2395_v48  ;;  %v2420_v57 = vsel %vm4237_vm1, %v2415_v2, %v2419_v44  ;;  %v2594_v25 = vunpack.c.l.bf16 %v2430_v52  ;;  %v2441_v36 = vshll.u32 %v3192_v34, 16  ;;  %v3193_v50 = vld [vmem:[%s3324_s30 + $0x44] sm:$0x1] }
 0x289   : > { %v2202_v16 = vsel %vm1428_vm8, %v2186_v6, %v2058_v12  ;;  %v2391_v10 = vrot.slane %v2390_v27, 4  ;;  %v2593_v8 = vunpack.c.l.bf16 %v2420_v57  ;;  %v2467_v37 = vrot.slane %v2465_v35, 5 }
 0x28a   : > { %v2401_v29 = vrot.slane %v2400_v55, 4  ;;  %v2471_v40 = vrot.slane %v2469_v22, 4  ;;  %v2443_v41 = vrot.slane %v2441_v36, 5  ;;  %v2447_v42 = vrot.slane %v2445_v1, 4 }
 0x28b   : > { %v2396_v3 = vsel %vm4237_vm1, %v2391_v10, %v2395_v48  ;;  %v2475_v51 = vshll.u32 %v3193_v50, 16  ;;  %v2453_v10 = vrot.slane %v2451_v54, 5 }
 0x28c   : > { %v2043_v62 = vpop.permute.xlu1 %2042  ;;  %v2086_v53 = vpop.permute.xlu0 %2085  ;;  %v2406_v33 = vsel %vm4237_vm1, %v2401_v29, %v2405_v60  ;;  %v2591_v49 = vunpack.c.l.bf16 %v2396_v3  ;;  %v2472_v48 = vor.u32 %v2471_v40, %v2467_v37  ;;  %v2448_v27 = vor.u32 %v2447_v42, %v2443_v41  ;;  %v3199_v42 = vld [vmem:[%s3324_s30 + $0x5c] sm:$0x1] }
 0x28d   : > { %v2218_v61 = vsel %vm1449_vm9, %v2202_v16, %v2086_v53  ;;  %v2592_v53 = vunpack.c.l.bf16 %v2406_v33  ;;  %v2477_v43 = vrot.slane %v2475_v51, 5 }
 0x28e   : > { %v2473_v45 = vrot.slane %v2472_v48, 4  ;;  %v2449_v2 = vrot.slane %v2448_v27, 4  ;;  %v3200_v48 = vld [vmem:[%s3324_s30 + $0x50] sm:$0x1] }
 0x28f   : > { %v2499_v50 = vshll.u32 %v3200_v48, 16 }
 0x290   : > { %v2023_v20 = vpop.permute.xlu1 %2022  ;;  %v2106_v21 = vpop.permute.xlu0 %2105  ;;  %v2478_v29 = vsel %vm4237_vm1, %v2473_v45, %v2477_v43  ;;  %v2454_v57 = vsel %vm4237_vm1, %v2449_v2, %v2453_v10  ;;  %v3201_v2 = vld [vmem:[%s3324_s30 + $0x6c] sm:$0xf] }
 0x291   : > { %v2172_v17 = vsel %vm1386_vm6, %v2156_v19, %v2023_v20  ;;  %v2234_v7 = vsel %vm1470_vm10, %v2218_v61, %v2106_v21  ;;  %v2552_v10 = vshrl.u32 %v3201_v2, 16 }
 0x292   : > { %v2188_v15 = vsel %vm1407_vm7, %v2172_v17, %v2043_v62  ;;  %3032 = vmatprep.mubr.msk.bf16.mxu1 %vm1518_vm11, %v2234_v7 }
 0x293   : > { %v2204_v24 = vsel %vm1428_vm8, %v2188_v15, %v2060_v63 }
 0x294   : > { %v2088_v13 = vpop.permute.xlu1 %2087 }
 0x295   : > { %v2220_v26 = vsel %vm1449_vm9, %v2204_v24, %v2088_v13  ;;  %v3189_v24 = vld [vmem:[%s3324_s30 + $0x3c] sm:$0xf] }
 0x298   : > { %v2108_v11 = vpop.permute.xlu1 %2107 }
 0x299   : > { %v2236_v46 = vsel %vm1470_vm10, %v2220_v26, %v2108_v11  ;;  %v2456_v26 = vshrl.u32 %v3189_v24, 16  ;;  %v2459_v11 = vshll.u32 %v3189_v24, 16 }
 0x29a   : > { %3033 = vmatmul.mubr.msk.bf16.gmra.mrb[12].mxu1 %vm1518_vm11, %v2236_v46  ;;  %v3190_v46 = vld [vmem:[%s3324_s30 + $0x30] sm:$0xf] }
 0x29b   : > { %v2432_v31 = vshrl.u32 %v3190_v46, 16  ;;  %v2435_v30 = vshll.u32 %v3190_v46, 16  ;;  %v2458_v14 = vrot.slane %v2456_v26, 4  ;;  %v2461_v28 = vrot.slane %v2459_v11, 5  ;;  %v3197_v11 = vld [vmem:[%s3324_s30 + $0x58] sm:$0xf] }
 0x29c   : > { %v2517_v46 = vshrl.u32 %v3197_v11, 16 }
 0x29d   : > { %v2434_v32 = vrot.slane %v2432_v31, 4  ;;  %v2437_v18 = vrot.slane %v2435_v30, 5  ;;  %v2462_v44 = vor.u32 %v2461_v28, %v2458_v14  ;;  %v2513_v31 = vshll.u32 %v3197_v11, 16  ;;  %v3198_v30 = vld [vmem:[%s3324_s30 + $0x4c] sm:$0xf] }
 0x29e   : > { %v2493_v23 = vshrl.u32 %v3198_v30, 16  ;;  %v2489_v22 = vshll.u32 %v3198_v30, 16  ;;  %v2519_v28 = vrot.slane %v2517_v46, 4 }
 0x29f   : > { %v2438_v47 = vor.u32 %v2437_v18, %v2434_v32  ;;  %v2463_v59 = vrot.slane %v2462_v44, 4  ;;  %v2515_v14 = vrot.slane %v2513_v31, 5  ;;  %v2523_v44 = vshll.u32 %v3199_v42, 16 }
 0x2a0   : > { %v2491_v32 = vrot.slane %v2489_v22, 5  ;;  %v2495_v18 = vrot.slane %v2493_v23, 4 }
 0x2a1   : > { %v2439_v55 = vrot.slane %v2438_v47, 4  ;;  %v2468_v56 = vsel %vm4237_vm1, %v2463_v59, %v2467_v37  ;;  %v2525_v54 = vrot.slane %v2523_v44, 5 }
 0x2a2   : > { %v2597_v60 = vunpack.c.l.bf16 %v2468_v56  ;;  %v2496_v47 = vor.u32 %v2495_v18, %v2491_v32  ;;  %v2555_v56 = vshll.u32 %v3201_v2, 16  ;;  %v3205_v18 = vld [vmem:[%s3324_s30 + $0x74] sm:$0x1] }
 0x2a3   : > { %v2444_v58 = vsel %vm4237_vm1, %v2439_v55, %v2443_v41  ;;  %v2520_v41 = vor.u32 %v2519_v28, %v2515_v14  ;;  %v2501_v55 = vrot.slane %v2499_v50, 5 }
 0x2a4   : > { %v2595_v52 = vunpack.c.l.bf16 %v2444_v58  ;;  %v2497_v59 = vrot.slane %v2496_v47, 4 }
 0x2a5   : > { %v2521_v38 = vrot.slane %v2520_v41, 4  ;;  %v3206_v41 = vld [vmem:[%s3324_s30 + $0x68] sm:$0x1] }
 0x2a6   : > { %v2547_v42 = vshll.u32 %v3206_v41, 16 }
 0x2a7   : > { %v2526_v58 = vsel %vm4237_vm1, %v2521_v38, %v2525_v54 }
 0x31b   : > { %v3022_v9 = vpop.f32.mrb[0].mxu1 }
 0x31c   : > { %v2326_v63 = vadd.f32 %v3022_v9, %v4249_v4  ;;  %v2317_v12 = vpop.f32.mrb[1].mxu1  ;;  %v2598_v9 = vunpack.c.l.bf16 %v2478_v29  ;;  %v3202_v29 = vld [vmem:[%s3324_s30 + $0x60] sm:$0xf] }
 0x31d   : > { %v2318_v0 = vadd.f32 %v4249_v4, %v2317_v12  ;;  %v3023_v62 = vpop.f32.mrb[2].mxu1  ;;  %v2596_v12 = vunpack.c.l.bf16 %v2454_v57  ;;  %v2531_v57 = vshll.u32 %v3202_v29, 16 }
 0x31e   : > { %v2609_v6 = vadd.f32 %v2593_v8, %v2326_v63  ;;  %v2329_v5 = vadd.f32 %v3023_v62, %v4249_v4  ;;  %v2320_v16 = vpop.f32.mrb[3].mxu1 }
 0x31f   : > { %v2607_v19 = vadd.f32 %v2591_v49, %v2318_v0  ;;  %v2321_v61 = vadd.f32 %v4249_v4, %v2320_v16 }
 0x320   : > { %v2625_v20 = vmax.f32 %v2609_v6, 0.0  ;;  %v2610_v21 = vadd.f32 %v2594_v25, %v2329_v5 }
 0x321   : > { %v2623_v17 = vmax.f32 %v2607_v19, 0.0  ;;  %v2608_v7 = vadd.f32 %v2592_v53, %v2321_v61 }
 0x322   : > { %2641 = vst.msk [vmem:[%s4261_s16 + $0x10] sm:$0xff] %vm1323_vm3, %v2625_v20  ;;  %v2626_v15 = vmax.f32 %v2610_v21, 0.0 }
 0x323   : > { %2639 = vst.msk [vmem:[%s4261_s16] sm:$0xff] %vm1323_vm3, %v2623_v17  ;;  %v2624_v13 = vmax.f32 %v2608_v7, 0.0  ;;  %v3195_v17 = vld [vmem:[%s3324_s30 + $0x54] sm:$0xf] }
 0x324   : > { %2642 = vst.msk [vmem:[%s4261_s16 + $0x18] sm:$0xff] %vm1323_vm3, %v2626_v15  ;;  %v2504_v7 = vshrl.u32 %v3195_v17, 16  ;;  %v2507_v15 = vshll.u32 %v3195_v17, 16  ;;  %v2533_v17 = vrot.slane %v2531_v57, 5 }
 0x325   : > { %2640 = vst.msk [vmem:[%s4261_s16 + $0x8] sm:$0xff] %vm1323_vm3, %v2624_v13  ;;  %v3196_v13 = vld [vmem:[%s3324_s30 + $0x48] sm:$0xf] }
 0x326   : > { %v2480_v24 = vshrl.u32 %v3196_v13, 16  ;;  %v2483_v26 = vshll.u32 %v3196_v13, 16  ;;  %v2506_v35 = vrot.slane %v2504_v7, 4  ;;  %v2509_v34 = vrot.slane %v2507_v15, 5 }
 0x328   : > { %v2482_v1 = vrot.slane %v2480_v24, 4  ;;  %v2485_v36 = vrot.slane %v2483_v26, 5  ;;  %v2510_v37 = vor.u32 %v2509_v34, %v2506_v35 }
 0x32a   : > { %v2486_v40 = vor.u32 %v2485_v36, %v2482_v1  ;;  %v2511_v51 = vrot.slane %v2510_v37, 4  ;;  %v2571_v37 = vshll.u32 %v3205_v18, 16 }
 0x32c   : > { %v2487_v27 = vrot.slane %v2486_v40, 4  ;;  %v2516_v45 = vsel %vm4237_vm1, %v2511_v51, %v2515_v14  ;;  %v2573_v50 = vrot.slane %v2571_v37, 5 }
 0x32e   : > { %v2492_v43 = vsel %vm4237_vm1, %v2487_v27, %v2491_v32  ;;  %v2549_v27 = vrot.slane %v2547_v42, 5 }
 0x33b   : > { %v3026_v3 = vpop.f32.mrb[4].mxu1 }
 0x33c   : > { %v2342_v8 = vadd.f32 %v3026_v3, %v4249_v4  ;;  %v2333_v33 = vpop.f32.mrb[5].mxu1  ;;  %v2601_v3 = vunpack.c.l.bf16 %v2516_v45 }
 0x33d   : > { %v2334_v49 = vadd.f32 %v4249_v4, %v2333_v33  ;;  %v3027_v63 = vpop.f32.mrb[6].mxu1 }
 0x33e   : > { %v2613_v25 = vadd.f32 %v2597_v60, %v2342_v8  ;;  %v2345_v0 = vadd.f32 %v3027_v63, %v4249_v4  ;;  %v2336_v62 = vpop.f32.mrb[7].mxu1  ;;  %v2528_v60 = vshrl.u32 %v3202_v29, 16  ;;  %v3203_v8 = vld [vmem:[%s3324_s30 + $0x70] sm:$0xf] }
 0x33f   : > { %v2611_v53 = vadd.f32 %v2595_v52, %v2334_v49  ;;  %v2337_v6 = vadd.f32 %v4249_v4, %v2336_v62  ;;  %v2502_v52 = vsel %vm4237_vm1, %v2497_v59, %v2501_v55  ;;  %v2565_v33 = vshrl.u32 %v3203_v8, 16 }
 0x340   : > { %v2629_v5 = vmax.f32 %v2613_v25, 0.0  ;;  %v2614_v16 = vadd.f32 %v2598_v9, %v2345_v0  ;;  %v2599_v49 = vunpack.c.l.bf16 %v2492_v43  ;;  %v2561_v63 = vshll.u32 %v3203_v8, 16 }
 0x341   : > { %v2627_v19 = vmax.f32 %v2611_v53, 0.0  ;;  %v2612_v61 = vadd.f32 %v2596_v12, %v2337_v6  ;;  %v3204_v12 = vld [vmem:[%s3324_s30 + $0x64] sm:$0xf]  ;;  %v2602_v53 = vunpack.c.l.bf16 %v2526_v58  ;;  %v2567_v46 = vrot.slane %v2565_v33, 4 }
 0x342   : > { %2645 = vst.msk [vmem:[%s4261_s16 + $0x30] sm:$0xff] %vm1323_vm3, %v2629_v5  ;;  %v2630_v20 = vmax.f32 %v2614_v16, 0.0  ;;  %v2541_v25 = vshrl.u32 %v3204_v12, 16  ;;  %v2537_v6 = vshll.u32 %v3204_v12, 16  ;;  %v2554_v5 = vrot.slane %v2552_v10, 4 }
 0x343   : > { %2643 = vst.msk [vmem:[%s4261_s16 + $0x20] sm:$0xff] %vm1323_vm3, %v2627_v19  ;;  %v2628_v21 = vmax.f32 %v2612_v61, 0.0  ;;  %v2557_v16 = vrot.slane %v2555_v56, 5  ;;  %v2563_v11 = vrot.slane %v2561_v63, 5 }
 0x344   : > { %2646 = vst.msk [vmem:[%s4261_s16 + $0x38] sm:$0xff] %vm1323_vm3, %v2630_v20  ;;  %v2600_v20 = vunpack.c.l.bf16 %v2502_v52  ;;  %v2539_v23 = vrot.slane %v2537_v6, 5  ;;  %v2543_v22 = vrot.slane %v2541_v25, 4 }
 0x345   : > { %2644 = vst.msk [vmem:[%s4261_s16 + $0x28] sm:$0xff] %vm1323_vm3, %v2628_v21  ;;  %v2530_v21 = vrot.slane %v2528_v60, 4  ;;  %v2558_v1 = vor.u32 %v2557_v16, %v2554_v5  ;;  %v2568_v32 = vor.u32 %v2567_v46, %v2563_v11 }
 0x346   : > { %v2544_v40 = vor.u32 %v2543_v22, %v2539_v23 }
 0x347   : > { %v2534_v14 = vor.u32 %v2533_v17, %v2530_v21  ;;  %v2559_v44 = vrot.slane %v2558_v1, 4  ;;  %v2569_v48 = vrot.slane %v2568_v32, 4 }
 0x348   : > { %v2545_v51 = vrot.slane %v2544_v40, 4 }
 0x349   : > { %v2535_v47 = vrot.slane %v2534_v14, 4  ;;  %v2564_v38 = vsel %vm4237_vm1, %v2559_v44, %v2563_v11  ;;  %v2574_v59 = vsel %vm4237_vm1, %v2569_v48, %v2573_v50 }
 0x34a   : > { %v2605_v55 = vunpack.c.l.bf16 %v2564_v38  ;;  %v2550_v45 = vsel %vm4237_vm1, %v2545_v51, %v2549_v27  ;;  %v2606_v58 = vunpack.c.l.bf16 %v2574_v59 }
 0x34b   : > { %v2540_v54 = vsel %vm4237_vm1, %v2535_v47, %v2539_v23  ;;  %v2604_v57 = vunpack.c.l.bf16 %v2550_v45 }
 0x34c   : > { %v2603_v2 = vunpack.c.l.bf16 %v2540_v54 }
 0x35b   : > { %v3030_v9 = vpop.f32.mrb[8].mxu1 }
 0x35c   : > { %v2358_v0 = vadd.f32 %v3030_v9, %v4249_v4  ;;  %v2349_v62 = vpop.f32.mrb[9].mxu1 }
 0x35d   : > { %v2350_v19 = vadd.f32 %v4249_v4, %v2349_v62  ;;  %v3031_v61 = vpop.f32.mrb[10].mxu1 }
 0x35e   : > { %v2617_v7 = vadd.f32 %v2601_v3, %v2358_v0  ;;  %v2361_v15 = vadd.f32 %v3031_v61, %v4249_v4  ;;  %v2352_v13 = vpop.f32.mrb[11].mxu1 }
 0x35f   : > { %v2615_v24 = vadd.f32 %v2599_v49, %v2350_v19  ;;  %v2353_v26 = vadd.f32 %v4249_v4, %v2352_v13 }
 0x360   : > { %v2633_v31 = vmax.f32 %v2617_v7, 0.0  ;;  %v2618_v30 = vadd.f32 %v2602_v53, %v2361_v15 }
 0x361   : > { %v2631_v35 = vmax.f32 %v2615_v24, 0.0  ;;  %v2616_v34 = vadd.f32 %v2600_v20, %v2353_v26 }
 0x362   : > { %2649 = vst.msk [vmem:[%s4261_s16 + $0x50] sm:$0xff] %vm1323_vm3, %v2633_v31  ;;  %v2634_v36 = vmax.f32 %v2618_v30, 0.0 }
 0x363   : > { %2647 = vst.msk [vmem:[%s4261_s16 + $0x40] sm:$0xff] %vm1323_vm3, %v2631_v35  ;;  %v2632_v28 = vmax.f32 %v2616_v34, 0.0 }
 0x364   : > { %2650 = vst.msk [vmem:[%s4261_s16 + $0x58] sm:$0xff] %vm1323_vm3, %v2634_v36 }
 0x365   : > { %2648 = vst.msk [vmem:[%s4261_s16 + $0x48] sm:$0xff] %vm1323_vm3, %v2632_v28 }
 0x36d   : > { %v3034_v43 = vpop.f32.mrb[12].mxu1 }
 0x36e   : > { %v2374_v10 = vadd.f32 %v3034_v43, %v4249_v4  ;;  %v2365_v56 = vpop.f32.mrb[13].mxu1 }
 0x36f   : > { %v2366_v29 = vadd.f32 %v4249_v4, %v2365_v56  ;;  %v3035_v60 = vpop.f32.mrb[14].mxu1 }
 0x370   : > { %v2621_v3 = vadd.f32 %v2605_v55, %v2374_v10  ;;  %v2377_v52 = vadd.f32 %v3035_v60, %v4249_v4  ;;  %v2368_v8 = vpop.f32.mrb[15].mxu1 }
 0x371   : > { %v2619_v39 = vadd.f32 %v2603_v2, %v2366_v29  ;;  %v2369_v33 = vadd.f32 %v4249_v4, %v2368_v8 }
 0x372   : > { %v2637_v9 = vmax.f32 %v2621_v3, 0.0  ;;  %v2622_v49 = vadd.f32 %v2606_v58, %v2377_v52 }
 0x373   : > { %v2635_v63 = vmax.f32 %v2619_v39, 0.0  ;;  %v2620_v12 = vadd.f32 %v2604_v57, %v2369_v33 }
 0x374   : > { %2653 = vst.msk [vmem:[%s4261_s16 + $0x70] sm:$0xff] %vm1323_vm3, %v2637_v9  ;;  %v2638_v25 = vmax.f32 %v2622_v49, 0.0 }
 0x375   : > { %2651 = vst.msk [vmem:[%s4261_s16 + $0x60] sm:$0xff] %vm1323_vm3, %v2635_v63  ;;  %v2636_v0 = vmax.f32 %v2620_v12, 0.0 }
 0x376   : > { %2654 = vst.msk [vmem:[%s4261_s16 + $0x78] sm:$0xff] %vm1323_vm3, %v2638_v25 }
 0x377   : > { %2652 = vst.msk [vmem:[%s4261_s16 + $0x68] sm:$0xff] %vm1323_vm3, %v2636_v0 }
 0x378 PF: > { %s15_s22 = sadd.s32 1, %s3245_s22   ;;  %s4375_s18 = smov %s3237_s20 }
 0x379   : > { %p12_p9 = scmp.ge.s32.totalorder %s15_s22, 6   ;;  %s4376_s19 = smov %s3241_s21 }
 0x37a   : > { %s4377_s20 = smov %s4380_s23  ;;  %s4378_s21 = smov %s4384_s24 }
 0x37b   :  { %14 = sbr.rel (!%p12_p9) target bundleno = 3 (0x3), region = 73 }

</bundles_post_ra>
